<compile_context>
chip_gen: v7x
topology: tpu7x:2x2x1
jax: 0.10.0
libtpu: 0.0.40
codegen_flags: <defaults>
</compile_context>

<pallas_src>
import functools
import math

import jax
import jax.numpy as jnp
from jax.experimental import pallas as pl
from jax.experimental.pallas import tpu as pltpu

K_PAD = 16          # input feature dim (7) zero-padded for clean sublane tiling
LBIAS_ROWS = 16     # per-layer bias/LN slab rows (padded to a multiple of 8)
FF_CHUNK = 512      # FFN inner-dim chunk

# Per-layer bias slab row layout (each row is `hidden` lanes wide).
_ROW_QB, _ROW_KB, _ROW_VB, _ROW_OB, _ROW_B2 = 0, 1, 2, 3, 4
_ROW_LN1G, _ROW_LN1B, _ROW_LN2G, _ROW_LN2B = 5, 6, 7, 8
# Global bias slab rows.
_GROW_EMB_B, _GROW_FC_B = 0, 1


# ----------------------------- fused kernel --------------------------------

def _fused_tsformer_kernel(x_ref, emb_w, fc_w, gbias, inw, outw, w1, w2, lb,
                           b1, o_ref, xa_scr, attn_scr, *, B, S, D, H, FF):
    """One encoder layer per grid step; `xa` carried in VMEM scratch.

    Grid step 0 additionally computes the input embedding; the last step
    additionally applies the (lane-dense, zero-padded) fc head.
    """
    l = pl.program_id(0)
    is_first = l == 0
    is_last = l == pl.num_programs(0) - 1
    BS = B * S
    hd = D // H
    n_chunks = FF // FF_CHUNK

    def mm(a, w):
        # bf16 MXU matmul with f32 accumulation.
        return jnp.dot(a.astype(jnp.bfloat16), w,
                       preferred_element_type=jnp.float32)

    def layernorm(z, g, b, eps=1e-5):
        mean = jnp.mean(z, axis=-1, keepdims=True)
        zc = z - mean
        var = jnp.mean(zc * zc, axis=-1, keepdims=True)
        return zc * jax.lax.rsqrt(var + eps) * g + b

    # ---- embedding (first grid step only) --------------------------------
    @pl.when(is_first)
    def _():
        xa_scr[...] = mm(x_ref[...], emb_w[...]) + gbias[_GROW_EMB_B:_GROW_EMB_B + 1, :]

    xa = xa_scr[...]                                   # (BS, D) f32

    # ---- self attention ----------------------------------------------------
    qkv = mm(xa, inw[...])                             # (BS, 3D) f32
    # 1/sqrt(hd) is folded into the Q weights/bias at init time.
    q = (qkv[:, 0:D] + lb[_ROW_QB:_ROW_QB + 1, :]).astype(jnp.bfloat16)
    k = (qkv[:, D:2 * D] + lb[_ROW_KB:_ROW_KB + 1, :]).astype(jnp.bfloat16)
    v = (qkv[:, 2 * D:3 * D] + lb[_ROW_VB:_ROW_VB + 1, :]).astype(jnp.bfloat16)

    # contract dim 1 of both operands: q @ k^T without an explicit transpose
    dn = (((1,), (1,)), ((), ()))
    for b in range(B):                                 # static unroll
        rs = slice(b * S, (b + 1) * S)
        for h in range(H):                             # static unroll
            cs = slice(h * hd, (h + 1) * hd)
            s_ = jax.lax.dot_general(q[rs, cs], k[rs, cs], dn,
                                     preferred_element_type=jnp.float32)
            s_ = s_ - jnp.max(s_, axis=-1, keepdims=True)
            p = jnp.exp(s_)
            p = p * pl.reciprocal(jnp.sum(p, axis=-1, keepdims=True),
                                  approx=True)
            # write the head result straight into the VMEM attention buffer
            attn_scr[rs, cs] = jnp.dot(p.astype(jnp.bfloat16), v[rs, cs],
                                       preferred_element_type=jnp.float32)

    attn = mm(attn_scr[...], outw[...]) + lb[_ROW_OB:_ROW_OB + 1, :]
    x1 = layernorm(xa + attn,
                   lb[_ROW_LN1G:_ROW_LN1G + 1, :],
                   lb[_ROW_LN1B:_ROW_LN1B + 1, :])     # norm1(x + sa)

    # ---- FFN, chunked over the 2048-wide inner dim -------------------------
    x1b = x1.astype(jnp.bfloat16)
    ff = jnp.zeros((BS, D), jnp.float32)
    for c in range(n_chunks):                          # static unroll
        cs = slice(c * FF_CHUNK, (c + 1) * FF_CHUNK)
        hmid = jnp.maximum(mm(x1b, w1[:, cs]) + b1[:, cs], 0.0)
        ff = ff + mm(hmid, w2[cs, :])
    ff = ff + lb[_ROW_B2:_ROW_B2 + 1, :]

    xa_scr[...] = layernorm(x1 + ff,
                            lb[_ROW_LN2G:_ROW_LN2G + 1, :],
                            lb[_ROW_LN2B:_ROW_LN2B + 1, :])   # norm2(x + ff)

    # ---- lane-dense fc head (last grid step only) ---------------------------
    @pl.when(is_last)
    def _():
        o_ref[...] = mm(xa_scr[...], fc_w[...]) + gbias[_GROW_FC_B:_GROW_FC_B + 1, :]


# ------------------------------ wrapper -------------------------------------

def tsformer_forward(x, params, *, nhead=4, out_size=1):
    """x: (batch, seq, input_size) -> (batch, out_size). Eval semantics."""
    B, S, I = x.shape
    D = params["emb_w"].shape[-1]
    L, _, FF = params["w1"].shape
    BS = B * S

    x2d = x.reshape(BS, I).astype(jnp.float32)
    x2d = jnp.pad(x2d, ((0, 0), (0, K_PAD - I)))       # (BS, K_PAD)

    flat = [x2d, params["emb_w"], params["fc_w"], params["gbias"],
            params["in_proj_w"], params["out_proj_w"],
            params["w1"], params["w2"], params["lbias"], params["b1"]]

    def rep(a):               # layer-invariant input: fetched once
        return pl.BlockSpec(a.shape, lambda l, _nd=a.ndim: (0,) * _nd)

    def per_layer(a):         # stacked per-layer weights: block l, leading dim squeezed
        return pl.BlockSpec((None,) + a.shape[1:],
                            lambda l, _nd=a.ndim - 1: (l,) + (0,) * _nd)

    in_specs = [rep(x2d), rep(params["emb_w"]), rep(params["fc_w"]),
                rep(params["gbias"]),
                per_layer(params["in_proj_w"]), per_layer(params["out_proj_w"]),
                per_layer(params["w1"]), per_layer(params["w2"]),
                per_layer(params["lbias"]), per_layer(params["b1"])]

    kernel = functools.partial(_fused_tsformer_kernel,
                               B=B, S=S, D=D, H=nhead, FF=FF)

    y_full = pl.pallas_call(
        kernel,
        out_shape=jax.ShapeDtypeStruct((BS, D), jnp.float32),
        grid_spec=pltpu.PrefetchScalarGridSpec(
            num_scalar_prefetch=0,
            grid=(L,),
            in_specs=in_specs,
            out_specs=pl.BlockSpec((BS, D), lambda l: (0, 0)),
            scratch_shapes=[pltpu.VMEM((BS, D), jnp.float32),   # xa (carried)
                            pltpu.VMEM((BS, D), jnp.float32)],  # attn buffer
        ),
        compiler_params=pltpu.CompilerParams(
            dimension_semantics=("arbitrary",),
            vmem_limit_bytes=16 * 1024 * 1024),
    )(*flat)

    # rows are batch-major (row = b*S + s): pick last seq position per batch,
    # drop the lane padding of the fc head.
    return y_full[S - 1::S, :out_size]


# --------------------------- deterministic init -----------------------------

def _linear_params(key, fan_in, fan_out):
    # torch.nn.Linear-style U(-1/sqrt(fan_in), 1/sqrt(fan_in)); stored (K, N).
    kw, kb = jax.random.split(key)
    bound = 1.0 / math.sqrt(fan_in)
    w = jax.random.uniform(kw, (fan_in, fan_out), jnp.float32, -bound, bound)
    b = jax.random.uniform(kb, (fan_out,), jnp.float32, -bound, bound)
    return w, b


def init_params(key, input_size, hidden, ff, num_layers, output_size, nhead=4):
    """Weights packed for the fused kernel: per-layer arrays stacked on a
    leading L axis, biases/LN params collapsed into dense (rows, hidden) slabs,
    attention scale folded into the Q projection."""
    D = hidden
    hd = D // nhead
    scale = 1.0 / math.sqrt(hd)
    ks = jax.random.split(key, 2 + num_layers)

    emb_w, emb_b = _linear_params(ks[0], input_size, D)
    emb_w = jnp.pad(emb_w, ((0, K_PAD - input_size), (0, 0)))    # pad K to 16

    fc_w, fc_b = _linear_params(ks[1], D, output_size)
    fc_w = jnp.pad(fc_w, ((0, 0), (0, D - output_size)))         # lane-dense head
    fc_b = jnp.pad(fc_b, (0, D - output_size))

    gbias = jnp.zeros((8, D), jnp.float32)
    gbias = gbias.at[_GROW_EMB_B].set(emb_b).at[_GROW_FC_B].set(fc_b)

    in_w_l, out_w_l, w1_l, w2_l, lb_l, b1_l = [], [], [], [], [], []
    for l in range(num_layers):
        kk = jax.random.split(ks[2 + l], 4)
        in_w, in_b = _linear_params(kk[0], D, 3 * D)     # MHA packed in_proj
        out_w, out_b = _linear_params(kk[1], D, D)       # MHA out_proj
        w1, b1 = _linear_params(kk[2], D, ff)            # FFN linear1
        w2, b2 = _linear_params(kk[3], ff, D)            # FFN linear2

        # fold 1/sqrt(head_dim) attention scale into Q weights and Q bias
        in_w = in_w.at[:, :D].multiply(scale)
        in_b = in_b.at[:D].multiply(scale)

        lb = jnp.zeros((LBIAS_ROWS, D), jnp.float32)
        lb = lb.at[_ROW_QB].set(in_b[:D]).at[_ROW_KB].set(in_b[D:2 * D])
        lb = lb.at[_ROW_VB].set(in_b[2 * D:]).at[_ROW_OB].set(out_b)
        lb = lb.at[_ROW_B2].set(b2)
        lb = lb.at[_ROW_LN1G].set(jnp.ones((D,), jnp.float32))
        lb = lb.at[_ROW_LN1B].set(jnp.zeros((D,), jnp.float32))
        lb = lb.at[_ROW_LN2G].set(jnp.ones((D,), jnp.float32))
        lb = lb.at[_ROW_LN2B].set(jnp.zeros((D,), jnp.float32))

        in_w_l.append(in_w.astype(jnp.bfloat16))
        out_w_l.append(out_w.astype(jnp.bfloat16))
        w1_l.append(w1.astype(jnp.bfloat16))
        w2_l.append(w2.astype(jnp.bfloat16))
        lb_l.append(lb)
        b1_l.append(b1.reshape(1, ff))

    return dict(
        emb_w=emb_w.astype(jnp.bfloat16),
        fc_w=fc_w.astype(jnp.bfloat16),
        gbias=gbias,
        in_proj_w=jnp.stack(in_w_l),     # (L, D, 3D)  bf16 (Q pre-scaled)
        out_proj_w=jnp.stack(out_w_l),   # (L, D, D)   bf16
        w1=jnp.stack(w1_l),              # (L, D, FF)  bf16
        w2=jnp.stack(w2_l),              # (L, FF, D)  bf16
        lbias=jnp.stack(lb_l),           # (L, 16, D)  f32
        b1=jnp.stack(b1_l),              # (L, 1, FF)  f32
    )


# ----------------------------------- main -----------------------------------

if __name__ == "__main__":
    key = jax.random.PRNGKey(0)
    kx, kp = jax.random.split(key)

    # Module defaults: input_size=7, hidden_size=128, nhead=4,
    # dim_feedforward=2048 (TransformerEncoderLayer default), num_layers=3,
    # output_size=1.  Small data shapes: batch=2, seq=8.
    B, S, I = 2, 8, 7
    HIDDEN, NHEAD, FF, LAYERS, OUT = 128, 4, 2048, 3, 1

    x = jax.random.normal(kx, (B, S, I), jnp.float32)
    params = init_params(kp, I, HIDDEN, FF, LAYERS, OUT, nhead=NHEAD)

    fwd = jax.jit(functools.partial(tsformer_forward, nhead=NHEAD, out_size=OUT))
    y = fwd(x, params)
    jax.block_until_ready(y)

    assert y.shape == (B, OUT), y.shape
    assert jnp.all(jnp.isfinite(y))
    print("KERNEL_OK")
</pallas_src>

<mosaic_0001>
module attributes {stable_mosaic.version = 11 : i64} {
  func.func @_fused_tsformer_kernel(%arg0: i32, %arg1: memref<16x16xf32, #tpu.memory_space<vmem>>, %arg2: memref<16x128xbf16, #tpu.memory_space<vmem>>, %arg3: memref<128x128xbf16, #tpu.memory_space<vmem>>, %arg4: memref<8x128xf32, #tpu.memory_space<vmem>>, %arg5: memref<1x128x384xbf16, #tpu.memory_space<vmem>>, %arg6: memref<1x128x128xbf16, #tpu.memory_space<vmem>>, %arg7: memref<1x128x2048xbf16, #tpu.memory_space<vmem>>, %arg8: memref<1x2048x128xbf16, #tpu.memory_space<vmem>>, %arg9: memref<1x16x128xf32, #tpu.memory_space<vmem>>, %arg10: memref<1x1x2048xf32, #tpu.memory_space<vmem>>, %arg11: memref<16x128xf32, #tpu.memory_space<vmem>>, %arg12: memref<16x128xf32, #tpu.memory_space<vmem>>, %arg13: memref<16x128xf32, #tpu.memory_space<vmem>>) attributes {dimension_semantics = [#tpu.dimension_semantics<arbitrary>], iteration_bounds = array<i64: 3>, scalar_prefetch = 0 : i64, scratch_operands = 2 : i64, tpu.core_type = #tpu.core_type<tc>, window_params = [{pipeline_mode = #tpu.pipeline_mode<synchronous>, transform_indices = @transform_0, window_bounds = array<i64: 16, 16>}, {pipeline_mode = #tpu.pipeline_mode<synchronous>, transform_indices = @transform_1, window_bounds = array<i64: 16, 128>}, {pipeline_mode = #tpu.pipeline_mode<synchronous>, transform_indices = @transform_2, window_bounds = array<i64: 128, 128>}, {pipeline_mode = #tpu.pipeline_mode<synchronous>, transform_indices = @transform_3, window_bounds = array<i64: 8, 128>}, {transform_indices = @transform_4, window_bounds = array<i64: 1, 128, 384>}, {transform_indices = @transform_5, window_bounds = array<i64: 1, 128, 128>}, {transform_indices = @transform_6, window_bounds = array<i64: 1, 128, 2048>}, {transform_indices = @transform_7, window_bounds = array<i64: 1, 2048, 128>}, {transform_indices = @transform_8, window_bounds = array<i64: 1, 16, 128>}, {transform_indices = @transform_9, window_bounds = array<i64: 1, 1, 2048>}, {pipeline_mode = #tpu.pipeline_mode<synchronous>, transform_indices = @transform_10, window_bounds = array<i64: 16, 128>}]} {
    %c0_i32 = arith.constant 0 : i32
    %0 = arith.cmpi eq, %arg0, %c0_i32 : i32
    %c2_i32 = arith.constant 2 : i32
    %1 = arith.cmpi eq, %arg0, %c2_i32 : i32
    %2 = arith.extui %0 : i1 to i32
    %c0_i32_0 = arith.constant 0 : i32
    %3 = arith.cmpi ne, %2, %c0_i32_0 : i32
    scf.if %3 {
      %c0_134 = arith.constant 0 : index
      %c0_135 = arith.constant 0 : index
      %287 = vector.load %arg1[%c0_134, %c0_135] : memref<16x16xf32, #tpu.memory_space<vmem>>, vector<16x16xf32>
      %c0_136 = arith.constant 0 : index
      %c0_137 = arith.constant 0 : index
      %288 = vector.load %arg2[%c0_136, %c0_137] : memref<16x128xbf16, #tpu.memory_space<vmem>>, vector<16x128xbf16>
      %289 = arith.truncf %287 : vector<16x16xf32> to vector<16x16xbf16>
      %cst_138 = arith.constant dense<0.000000e+00> : vector<16x128xf32>
      %290 = tpu.matmul %289, %288, %cst_138 {dimension_numbers = #tpu.dot_dimension_numbers<[1], [0], [0], [1], [0, 0, 1, 1], [], []>} : vector<16x16xbf16>, vector<16x128xbf16>, vector<16x128xf32> -> vector<16x128xf32>
      %c0_139 = arith.constant 0 : index
      %c0_140 = arith.constant 0 : index
      %291 = vector.load %arg4[%c0_139, %c0_140] : memref<8x128xf32, #tpu.memory_space<vmem>>, vector<1x128xf32>
      %292 = vector.broadcast %291 : vector<1x128xf32> to vector<16x128xf32>
      %293 = arith.addf %290, %292 : vector<16x128xf32>
      %c0_141 = arith.constant 0 : index
      %c0_142 = arith.constant 0 : index
      %294 = vector.load %arg12[%c0_141, %c0_142] : memref<16x128xf32, #tpu.memory_space<vmem>>, vector<16x128xf32>
      tpu.vector_store %arg12[%c0_141, %c0_142], %293 {strides = array<i32>} : memref<16x128xf32, #tpu.memory_space<vmem>>, vector<16x128xf32>,
    } else {
    }
    %c0 = arith.constant 0 : index
    %c0_1 = arith.constant 0 : index
    %4 = vector.load %arg12[%c0, %c0_1] : memref<16x128xf32, #tpu.memory_space<vmem>>, vector<16x128xf32>
    %c0_2 = arith.constant 0 : index
    %c0_3 = arith.constant 0 : index
    %c0_4 = arith.constant 0 : index
    %5 = vector.load %arg5[%c0_2, %c0_3, %c0_4] : memref<1x128x384xbf16, #tpu.memory_space<vmem>>, vector<1x128x384xbf16>
    %6 = vector.shape_cast %5 : vector<1x128x384xbf16> to vector<128x384xbf16>
    %7 = arith.truncf %4 : vector<16x128xf32> to vector<16x128xbf16>
    %cst = arith.constant dense<0.000000e+00> : vector<16x384xf32>
    %8 = tpu.matmul %7, %6, %cst {dimension_numbers = #tpu.dot_dimension_numbers<[1], [0], [0], [1], [0, 0, 1, 1], [], []>} : vector<16x128xbf16>, vector<128x384xbf16>, vector<16x384xf32> -> vector<16x384xf32>
    %9 = vector.extract_strided_slice %8 {offsets = [0, 0], sizes = [16, 128], strides = [1, 1]} : vector<16x384xf32> to vector<16x128xf32>
    %c0_5 = arith.constant 0 : index
    %c0_6 = arith.constant 0 : index
    %c0_7 = arith.constant 0 : index
    %10 = vector.load %arg9[%c0_5, %c0_6, %c0_7] : memref<1x16x128xf32, #tpu.memory_space<vmem>>, vector<1x1x128xf32>
    %11 = vector.shape_cast %10 : vector<1x1x128xf32> to vector<1x128xf32>
    %12 = vector.broadcast %11 : vector<1x128xf32> to vector<16x128xf32>
    %13 = arith.addf %9, %12 : vector<16x128xf32>
    %14 = arith.truncf %13 : vector<16x128xf32> to vector<16x128xbf16>
    %15 = vector.extract_strided_slice %8 {offsets = [0, 128], sizes = [16, 128], strides = [1, 1]} : vector<16x384xf32> to vector<16x128xf32>
    %c0_8 = arith.constant 0 : index
    %c1 = arith.constant 1 : index
    %c0_9 = arith.constant 0 : index
    %16 = vector.load %arg9[%c0_8, %c1, %c0_9] : memref<1x16x128xf32, #tpu.memory_space<vmem>>, vector<1x1x128xf32>
    %17 = vector.shape_cast %16 : vector<1x1x128xf32> to vector<1x128xf32>
    %18 = vector.broadcast %17 : vector<1x128xf32> to vector<16x128xf32>
    %19 = arith.addf %15, %18 : vector<16x128xf32>
    %20 = arith.truncf %19 : vector<16x128xf32> to vector<16x128xbf16>
    %21 = vector.extract_strided_slice %8 {offsets = [0, 256], sizes = [16, 128], strides = [1, 1]} : vector<16x384xf32> to vector<16x128xf32>
    %c0_10 = arith.constant 0 : index
    %c2 = arith.constant 2 : index
    %c0_11 = arith.constant 0 : index
    %22 = vector.load %arg9[%c0_10, %c2, %c0_11] : memref<1x16x128xf32, #tpu.memory_space<vmem>>, vector<1x1x128xf32>
    %23 = vector.shape_cast %22 : vector<1x1x128xf32> to vector<1x128xf32>
    %24 = vector.broadcast %23 : vector<1x128xf32> to vector<16x128xf32>
    %25 = arith.addf %21, %24 : vector<16x128xf32>
    %26 = arith.truncf %25 : vector<16x128xf32> to vector<16x128xbf16>
    %27 = vector.extract_strided_slice %14 {offsets = [0, 0], sizes = [8, 32], strides = [1, 1]} : vector<16x128xbf16> to vector<8x32xbf16>
    %28 = vector.extract_strided_slice %20 {offsets = [0, 0], sizes = [8, 32], strides = [1, 1]} : vector<16x128xbf16> to vector<8x32xbf16>
    %cst_12 = arith.constant dense<0.000000e+00> : vector<8x8xf32>
    %29 = tpu.matmul %27, %28, %cst_12 {dimension_numbers = #tpu.dot_dimension_numbers<[1], [1], [0], [0], [0, 0, 1, 0], [], []>} : vector<8x32xbf16>, vector<8x32xbf16>, vector<8x8xf32> -> vector<8x8xf32>
    %cst_13 = arith.constant dense<0xFF800000> : vector<8xf32>
    %30 = vector.multi_reduction <maximumf>, %29, %cst_13 [1] : vector<8x8xf32> to vector<8xf32>
    %31 = vector.shape_cast %30 : vector<8xf32> to vector<8x1xf32>
    %32 = vector.broadcast %31 : vector<8x1xf32> to vector<8x8xf32>
    %33 = arith.subf %29, %32 : vector<8x8xf32>
    %34 = math.exp %33 : vector<8x8xf32>
    %cst_14 = arith.constant dense<0.000000e+00> : vector<8xf32>
    %35 = vector.multi_reduction <add>, %34, %cst_14 [1] : vector<8x8xf32> to vector<8xf32>
    %36 = vector.shape_cast %35 : vector<8xf32> to vector<8x1xf32>
    %37 = tpu.reciprocal %36 {approx = true} : vector<8x1xf32> -> vector<8x1xf32>
    %38 = vector.broadcast %37 : vector<8x1xf32> to vector<8x8xf32>
    %39 = arith.mulf %34, %38 : vector<8x8xf32>
    %40 = arith.truncf %39 : vector<8x8xf32> to vector<8x8xbf16>
    %41 = vector.extract_strided_slice %26 {offsets = [0, 0], sizes = [8, 32], strides = [1, 1]} : vector<16x128xbf16> to vector<8x32xbf16>
    %cst_15 = arith.constant dense<0.000000e+00> : vector<8x32xf32>
    %42 = tpu.matmul %40, %41, %cst_15 {dimension_numbers = #tpu.dot_dimension_numbers<[1], [0], [0], [1], [0, 0, 1, 1], [], []>} : vector<8x8xbf16>, vector<8x32xbf16>, vector<8x32xf32> -> vector<8x32xf32>
    %c0_16 = arith.constant 0 : index
    %c0_17 = arith.constant 0 : index
    %43 = vector.load %arg13[%c0_16, %c0_17] : memref<16x128xf32, #tpu.memory_space<vmem>>, vector<8x32xf32>
    tpu.vector_store %arg13[%c0_16, %c0_17], %42 {strides = array<i32>} : memref<16x128xf32, #tpu.memory_space<vmem>>, vector<8x32xf32>,
    %44 = vector.extract_strided_slice %14 {offsets = [0, 32], sizes = [8, 32], strides = [1, 1]} : vector<16x128xbf16> to vector<8x32xbf16>
    %45 = vector.extract_strided_slice %20 {offsets = [0, 32], sizes = [8, 32], strides = [1, 1]} : vector<16x128xbf16> to vector<8x32xbf16>
    %cst_18 = arith.constant dense<0.000000e+00> : vector<8x8xf32>
    %46 = tpu.matmul %44, %45, %cst_18 {dimension_numbers = #tpu.dot_dimension_numbers<[1], [1], [0], [0], [0, 0, 1, 0], [], []>} : vector<8x32xbf16>, vector<8x32xbf16>, vector<8x8xf32> -> vector<8x8xf32>
    %cst_19 = arith.constant dense<0xFF800000> : vector<8xf32>
    %47 = vector.multi_reduction <maximumf>, %46, %cst_19 [1] : vector<8x8xf32> to vector<8xf32>
    %48 = vector.shape_cast %47 : vector<8xf32> to vector<8x1xf32>
    %49 = vector.broadcast %48 : vector<8x1xf32> to vector<8x8xf32>
    %50 = arith.subf %46, %49 : vector<8x8xf32>
    %51 = math.exp %50 : vector<8x8xf32>
    %cst_20 = arith.constant dense<0.000000e+00> : vector<8xf32>
    %52 = vector.multi_reduction <add>, %51, %cst_20 [1] : vector<8x8xf32> to vector<8xf32>
    %53 = vector.shape_cast %52 : vector<8xf32> to vector<8x1xf32>
    %54 = tpu.reciprocal %53 {approx = true} : vector<8x1xf32> -> vector<8x1xf32>
    %55 = vector.broadcast %54 : vector<8x1xf32> to vector<8x8xf32>
    %56 = arith.mulf %51, %55 : vector<8x8xf32>
    %57 = arith.truncf %56 : vector<8x8xf32> to vector<8x8xbf16>
    %58 = vector.extract_strided_slice %26 {offsets = [0, 32], sizes = [8, 32], strides = [1, 1]} : vector<16x128xbf16> to vector<8x32xbf16>
    %cst_21 = arith.constant dense<0.000000e+00> : vector<8x32xf32>
    %59 = tpu.matmul %57, %58, %cst_21 {dimension_numbers = #tpu.dot_dimension_numbers<[1], [0], [0], [1], [0, 0, 1, 1], [], []>} : vector<8x8xbf16>, vector<8x32xbf16>, vector<8x32xf32> -> vector<8x32xf32>
    %c0_22 = arith.constant 0 : index
    %c32 = arith.constant 32 : index
    %60 = vector.load %arg13[%c0_22, %c32] : memref<16x128xf32, #tpu.memory_space<vmem>>, vector<8x32xf32>
    tpu.vector_store %arg13[%c0_22, %c32], %59 {strides = array<i32>} : memref<16x128xf32, #tpu.memory_space<vmem>>, vector<8x32xf32>,
    %61 = vector.extract_strided_slice %14 {offsets = [0, 64], sizes = [8, 32], strides = [1, 1]} : vector<16x128xbf16> to vector<8x32xbf16>
    %62 = vector.extract_strided_slice %20 {offsets = [0, 64], sizes = [8, 32], strides = [1, 1]} : vector<16x128xbf16> to vector<8x32xbf16>
    %cst_23 = arith.constant dense<0.000000e+00> : vector<8x8xf32>
    %63 = tpu.matmul %61, %62, %cst_23 {dimension_numbers = #tpu.dot_dimension_numbers<[1], [1], [0], [0], [0, 0, 1, 0], [], []>} : vector<8x32xbf16>, vector<8x32xbf16>, vector<8x8xf32> -> vector<8x8xf32>
    %cst_24 = arith.constant dense<0xFF800000> : vector<8xf32>
    %64 = vector.multi_reduction <maximumf>, %63, %cst_24 [1] : vector<8x8xf32> to vector<8xf32>
    %65 = vector.shape_cast %64 : vector<8xf32> to vector<8x1xf32>
    %66 = vector.broadcast %65 : vector<8x1xf32> to vector<8x8xf32>
    %67 = arith.subf %63, %66 : vector<8x8xf32>
    %68 = math.exp %67 : vector<8x8xf32>
    %cst_25 = arith.constant dense<0.000000e+00> : vector<8xf32>
    %69 = vector.multi_reduction <add>, %68, %cst_25 [1] : vector<8x8xf32> to vector<8xf32>
    %70 = vector.shape_cast %69 : vector<8xf32> to vector<8x1xf32>
    %71 = tpu.reciprocal %70 {approx = true} : vector<8x1xf32> -> vector<8x1xf32>
    %72 = vector.broadcast %71 : vector<8x1xf32> to vector<8x8xf32>
    %73 = arith.mulf %68, %72 : vector<8x8xf32>
    %74 = arith.truncf %73 : vector<8x8xf32> to vector<8x8xbf16>
    %75 = vector.extract_strided_slice %26 {offsets = [0, 64], sizes = [8, 32], strides = [1, 1]} : vector<16x128xbf16> to vector<8x32xbf16>
    %cst_26 = arith.constant dense<0.000000e+00> : vector<8x32xf32>
    %76 = tpu.matmul %74, %75, %cst_26 {dimension_numbers = #tpu.dot_dimension_numbers<[1], [0], [0], [1], [0, 0, 1, 1], [], []>} : vector<8x8xbf16>, vector<8x32xbf16>, vector<8x32xf32> -> vector<8x32xf32>
    %c0_27 = arith.constant 0 : index
    %c64 = arith.constant 64 : index
    %77 = vector.load %arg13[%c0_27, %c64] : memref<16x128xf32, #tpu.memory_space<vmem>>, vector<8x32xf32>
    tpu.vector_store %arg13[%c0_27, %c64], %76 {strides = array<i32>} : memref<16x128xf32, #tpu.memory_space<vmem>>, vector<8x32xf32>,
    %78 = vector.extract_strided_slice %14 {offsets = [0, 96], sizes = [8, 32], strides = [1, 1]} : vector<16x128xbf16> to vector<8x32xbf16>
    %79 = vector.extract_strided_slice %20 {offsets = [0, 96], sizes = [8, 32], strides = [1, 1]} : vector<16x128xbf16> to vector<8x32xbf16>
    %cst_28 = arith.constant dense<0.000000e+00> : vector<8x8xf32>
    %80 = tpu.matmul %78, %79, %cst_28 {dimension_numbers = #tpu.dot_dimension_numbers<[1], [1], [0], [0], [0, 0, 1, 0], [], []>} : vector<8x32xbf16>, vector<8x32xbf16>, vector<8x8xf32> -> vector<8x8xf32>
    %cst_29 = arith.constant dense<0xFF800000> : vector<8xf32>
    %81 = vector.multi_reduction <maximumf>, %80, %cst_29 [1] : vector<8x8xf32> to vector<8xf32>
    %82 = vector.shape_cast %81 : vector<8xf32> to vector<8x1xf32>
    %83 = vector.broadcast %82 : vector<8x1xf32> to vector<8x8xf32>
    %84 = arith.subf %80, %83 : vector<8x8xf32>
    %85 = math.exp %84 : vector<8x8xf32>
    %cst_30 = arith.constant dense<0.000000e+00> : vector<8xf32>
    %86 = vector.multi_reduction <add>, %85, %cst_30 [1] : vector<8x8xf32> to vector<8xf32>
    %87 = vector.shape_cast %86 : vector<8xf32> to vector<8x1xf32>
    %88 = tpu.reciprocal %87 {approx = true} : vector<8x1xf32> -> vector<8x1xf32>
    %89 = vector.broadcast %88 : vector<8x1xf32> to vector<8x8xf32>
    %90 = arith.mulf %85, %89 : vector<8x8xf32>
    %91 = arith.truncf %90 : vector<8x8xf32> to vector<8x8xbf16>
    %92 = vector.extract_strided_slice %26 {offsets = [0, 96], sizes = [8, 32], strides = [1, 1]} : vector<16x128xbf16> to vector<8x32xbf16>
    %cst_31 = arith.constant dense<0.000000e+00> : vector<8x32xf32>
    %93 = tpu.matmul %91, %92, %cst_31 {dimension_numbers = #tpu.dot_dimension_numbers<[1], [0], [0], [1], [0, 0, 1, 1], [], []>} : vector<8x8xbf16>, vector<8x32xbf16>, vector<8x32xf32> -> vector<8x32xf32>
    %c0_32 = arith.constant 0 : index
    %c96 = arith.constant 96 : index
    %94 = vector.load %arg13[%c0_32, %c96] : memref<16x128xf32, #tpu.memory_space<vmem>>, vector<8x32xf32>
    tpu.vector_store %arg13[%c0_32, %c96], %93 {strides = array<i32>} : memref<16x128xf32, #tpu.memory_space<vmem>>, vector<8x32xf32>,
    %95 = vector.extract_strided_slice %14 {offsets = [8, 0], sizes = [8, 32], strides = [1, 1]} : vector<16x128xbf16> to vector<8x32xbf16>
    %96 = vector.extract_strided_slice %20 {offsets = [8, 0], sizes = [8, 32], strides = [1, 1]} : vector<16x128xbf16> to vector<8x32xbf16>
    %cst_33 = arith.constant dense<0.000000e+00> : vector<8x8xf32>
    %97 = tpu.matmul %95, %96, %cst_33 {dimension_numbers = #tpu.dot_dimension_numbers<[1], [1], [0], [0], [0, 0, 1, 0], [], []>} : vector<8x32xbf16>, vector<8x32xbf16>, vector<8x8xf32> -> vector<8x8xf32>
    %cst_34 = arith.constant dense<0xFF800000> : vector<8xf32>
    %98 = vector.multi_reduction <maximumf>, %97, %cst_34 [1] : vector<8x8xf32> to vector<8xf32>
    %99 = vector.shape_cast %98 : vector<8xf32> to vector<8x1xf32>
    %100 = vector.broadcast %99 : vector<8x1xf32> to vector<8x8xf32>
    %101 = arith.subf %97, %100 : vector<8x8xf32>
    %102 = math.exp %101 : vector<8x8xf32>
    %cst_35 = arith.constant dense<0.000000e+00> : vector<8xf32>
    %103 = vector.multi_reduction <add>, %102, %cst_35 [1] : vector<8x8xf32> to vector<8xf32>
    %104 = vector.shape_cast %103 : vector<8xf32> to vector<8x1xf32>
    %105 = tpu.reciprocal %104 {approx = true} : vector<8x1xf32> -> vector<8x1xf32>
    %106 = vector.broadcast %105 : vector<8x1xf32> to vector<8x8xf32>
    %107 = arith.mulf %102, %106 : vector<8x8xf32>
    %108 = arith.truncf %107 : vector<8x8xf32> to vector<8x8xbf16>
    %109 = vector.extract_strided_slice %26 {offsets = [8, 0], sizes = [8, 32], strides = [1, 1]} : vector<16x128xbf16> to vector<8x32xbf16>
    %cst_36 = arith.constant dense<0.000000e+00> : vector<8x32xf32>
    %110 = tpu.matmul %108, %109, %cst_36 {dimension_numbers = #tpu.dot_dimension_numbers<[1], [0], [0], [1], [0, 0, 1, 1], [], []>} : vector<8x8xbf16>, vector<8x32xbf16>, vector<8x32xf32> -> vector<8x32xf32>
    %c8 = arith.constant 8 : index
    %c0_37 = arith.constant 0 : index
    %111 = vector.load %arg13[%c8, %c0_37] : memref<16x128xf32, #tpu.memory_space<vmem>>, vector<8x32xf32>
    tpu.vector_store %arg13[%c8, %c0_37], %110 {strides = array<i32>} : memref<16x128xf32, #tpu.memory_space<vmem>>, vector<8x32xf32>,
    %112 = vector.extract_strided_slice %14 {offsets = [8, 32], sizes = [8, 32], strides = [1, 1]} : vector<16x128xbf16> to vector<8x32xbf16>
    %113 = vector.extract_strided_slice %20 {offsets = [8, 32], sizes = [8, 32], strides = [1, 1]} : vector<16x128xbf16> to vector<8x32xbf16>
    %cst_38 = arith.constant dense<0.000000e+00> : vector<8x8xf32>
    %114 = tpu.matmul %112, %113, %cst_38 {dimension_numbers = #tpu.dot_dimension_numbers<[1], [1], [0], [0], [0, 0, 1, 0], [], []>} : vector<8x32xbf16>, vector<8x32xbf16>, vector<8x8xf32> -> vector<8x8xf32>
    %cst_39 = arith.constant dense<0xFF800000> : vector<8xf32>
    %115 = vector.multi_reduction <maximumf>, %114, %cst_39 [1] : vector<8x8xf32> to vector<8xf32>
    %116 = vector.shape_cast %115 : vector<8xf32> to vector<8x1xf32>
    %117 = vector.broadcast %116 : vector<8x1xf32> to vector<8x8xf32>
    %118 = arith.subf %114, %117 : vector<8x8xf32>
    %119 = math.exp %118 : vector<8x8xf32>
    %cst_40 = arith.constant dense<0.000000e+00> : vector<8xf32>
    %120 = vector.multi_reduction <add>, %119, %cst_40 [1] : vector<8x8xf32> to vector<8xf32>
    %121 = vector.shape_cast %120 : vector<8xf32> to vector<8x1xf32>
    %122 = tpu.reciprocal %121 {approx = true} : vector<8x1xf32> -> vector<8x1xf32>
    %123 = vector.broadcast %122 : vector<8x1xf32> to vector<8x8xf32>
    %124 = arith.mulf %119, %123 : vector<8x8xf32>
    %125 = arith.truncf %124 : vector<8x8xf32> to vector<8x8xbf16>
    %126 = vector.extract_strided_slice %26 {offsets = [8, 32], sizes = [8, 32], strides = [1, 1]} : vector<16x128xbf16> to vector<8x32xbf16>
    %cst_41 = arith.constant dense<0.000000e+00> : vector<8x32xf32>
    %127 = tpu.matmul %125, %126, %cst_41 {dimension_numbers = #tpu.dot_dimension_numbers<[1], [0], [0], [1], [0, 0, 1, 1], [], []>} : vector<8x8xbf16>, vector<8x32xbf16>, vector<8x32xf32> -> vector<8x32xf32>
    %c8_42 = arith.constant 8 : index
    %c32_43 = arith.constant 32 : index
    %128 = vector.load %arg13[%c8_42, %c32_43] : memref<16x128xf32, #tpu.memory_space<vmem>>, vector<8x32xf32>
    tpu.vector_store %arg13[%c8_42, %c32_43], %127 {strides = array<i32>} : memref<16x128xf32, #tpu.memory_space<vmem>>, vector<8x32xf32>,
    %129 = vector.extract_strided_slice %14 {offsets = [8, 64], sizes = [8, 32], strides = [1, 1]} : vector<16x128xbf16> to vector<8x32xbf16>
    %130 = vector.extract_strided_slice %20 {offsets = [8, 64], sizes = [8, 32], strides = [1, 1]} : vector<16x128xbf16> to vector<8x32xbf16>
    %cst_44 = arith.constant dense<0.000000e+00> : vector<8x8xf32>
    %131 = tpu.matmul %129, %130, %cst_44 {dimension_numbers = #tpu.dot_dimension_numbers<[1], [1], [0], [0], [0, 0, 1, 0], [], []>} : vector<8x32xbf16>, vector<8x32xbf16>, vector<8x8xf32> -> vector<8x8xf32>
    %cst_45 = arith.constant dense<0xFF800000> : vector<8xf32>
    %132 = vector.multi_reduction <maximumf>, %131, %cst_45 [1] : vector<8x8xf32> to vector<8xf32>
    %133 = vector.shape_cast %132 : vector<8xf32> to vector<8x1xf32>
    %134 = vector.broadcast %133 : vector<8x1xf32> to vector<8x8xf32>
    %135 = arith.subf %131, %134 : vector<8x8xf32>
    %136 = math.exp %135 : vector<8x8xf32>
    %cst_46 = arith.constant dense<0.000000e+00> : vector<8xf32>
    %137 = vector.multi_reduction <add>, %136, %cst_46 [1] : vector<8x8xf32> to vector<8xf32>
    %138 = vector.shape_cast %137 : vector<8xf32> to vector<8x1xf32>
    %139 = tpu.reciprocal %138 {approx = true} : vector<8x1xf32> -> vector<8x1xf32>
    %140 = vector.broadcast %139 : vector<8x1xf32> to vector<8x8xf32>
    %141 = arith.mulf %136, %140 : vector<8x8xf32>
    %142 = arith.truncf %141 : vector<8x8xf32> to vector<8x8xbf16>
    %143 = vector.extract_strided_slice %26 {offsets = [8, 64], sizes = [8, 32], strides = [1, 1]} : vector<16x128xbf16> to vector<8x32xbf16>
    %cst_47 = arith.constant dense<0.000000e+00> : vector<8x32xf32>
    %144 = tpu.matmul %142, %143, %cst_47 {dimension_numbers = #tpu.dot_dimension_numbers<[1], [0], [0], [1], [0, 0, 1, 1], [], []>} : vector<8x8xbf16>, vector<8x32xbf16>, vector<8x32xf32> -> vector<8x32xf32>
    %c8_48 = arith.constant 8 : index
    %c64_49 = arith.constant 64 : index
    %145 = vector.load %arg13[%c8_48, %c64_49] : memref<16x128xf32, #tpu.memory_space<vmem>>, vector<8x32xf32>
    tpu.vector_store %arg13[%c8_48, %c64_49], %144 {strides = array<i32>} : memref<16x128xf32, #tpu.memory_space<vmem>>, vector<8x32xf32>,
    %146 = vector.extract_strided_slice %14 {offsets = [8, 96], sizes = [8, 32], strides = [1, 1]} : vector<16x128xbf16> to vector<8x32xbf16>
    %147 = vector.extract_strided_slice %20 {offsets = [8, 96], sizes = [8, 32], strides = [1, 1]} : vector<16x128xbf16> to vector<8x32xbf16>
    %cst_50 = arith.constant dense<0.000000e+00> : vector<8x8xf32>
    %148 = tpu.matmul %146, %147, %cst_50 {dimension_numbers = #tpu.dot_dimension_numbers<[1], [1], [0], [0], [0, 0, 1, 0], [], []>} : vector<8x32xbf16>, vector<8x32xbf16>, vector<8x8xf32> -> vector<8x8xf32>
    %cst_51 = arith.constant dense<0xFF800000> : vector<8xf32>
    %149 = vector.multi_reduction <maximumf>, %148, %cst_51 [1] : vector<8x8xf32> to vector<8xf32>
    %150 = vector.shape_cast %149 : vector<8xf32> to vector<8x1xf32>
    %151 = vector.broadcast %150 : vector<8x1xf32> to vector<8x8xf32>
    %152 = arith.subf %148, %151 : vector<8x8xf32>
    %153 = math.exp %152 : vector<8x8xf32>
    %cst_52 = arith.constant dense<0.000000e+00> : vector<8xf32>
    %154 = vector.multi_reduction <add>, %153, %cst_52 [1] : vector<8x8xf32> to vector<8xf32>
    %155 = vector.shape_cast %154 : vector<8xf32> to vector<8x1xf32>
    %156 = tpu.reciprocal %155 {approx = true} : vector<8x1xf32> -> vector<8x1xf32>
    %157 = vector.broadcast %156 : vector<8x1xf32> to vector<8x8xf32>
    %158 = arith.mulf %153, %157 : vector<8x8xf32>
    %159 = arith.truncf %158 : vector<8x8xf32> to vector<8x8xbf16>
    %160 = vector.extract_strided_slice %26 {offsets = [8, 96], sizes = [8, 32], strides = [1, 1]} : vector<16x128xbf16> to vector<8x32xbf16>
    %cst_53 = arith.constant dense<0.000000e+00> : vector<8x32xf32>
    %161 = tpu.matmul %159, %160, %cst_53 {dimension_numbers = #tpu.dot_dimension_numbers<[1], [0], [0], [1], [0, 0, 1, 1], [], []>} : vector<8x8xbf16>, vector<8x32xbf16>, vector<8x32xf32> -> vector<8x32xf32>
    %c8_54 = arith.constant 8 : index
    %c96_55 = arith.constant 96 : index
    %162 = vector.load %arg13[%c8_54, %c96_55] : memref<16x128xf32, #tpu.memory_space<vmem>>, vector<8x32xf32>
    tpu.vector_store %arg13[%c8_54, %c96_55], %161 {strides = array<i32>} : memref<16x128xf32, #tpu.memory_space<vmem>>, vector<8x32xf32>,
    %c0_56 = arith.constant 0 : index
    %c0_57 = arith.constant 0 : index
    %163 = vector.load %arg13[%c0_56, %c0_57] : memref<16x128xf32, #tpu.memory_space<vmem>>, vector<16x128xf32>
    %c0_58 = arith.constant 0 : index
    %c0_59 = arith.constant 0 : index
    %c0_60 = arith.constant 0 : index
    %164 = vector.load %arg6[%c0_58, %c0_59, %c0_60] : memref<1x128x128xbf16, #tpu.memory_space<vmem>>, vector<1x128x128xbf16>
    %165 = vector.shape_cast %164 : vector<1x128x128xbf16> to vector<128x128xbf16>
    %166 = arith.truncf %163 : vector<16x128xf32> to vector<16x128xbf16>
    %cst_61 = arith.constant dense<0.000000e+00> : vector<16x128xf32>
    %167 = tpu.matmul %166, %165, %cst_61 {dimension_numbers = #tpu.dot_dimension_numbers<[1], [0], [0], [1], [0, 0, 1, 1], [], []>} : vector<16x128xbf16>, vector<128x128xbf16>, vector<16x128xf32> -> vector<16x128xf32>
    %c0_62 = arith.constant 0 : index
    %c3 = arith.constant 3 : index
    %c0_63 = arith.constant 0 : index
    %168 = vector.load %arg9[%c0_62, %c3, %c0_63] : memref<1x16x128xf32, #tpu.memory_space<vmem>>, vector<1x1x128xf32>
    %169 = vector.shape_cast %168 : vector<1x1x128xf32> to vector<1x128xf32>
    %170 = vector.broadcast %169 : vector<1x128xf32> to vector<16x128xf32>
    %171 = arith.addf %167, %170 : vector<16x128xf32>
    %172 = arith.addf %4, %171 : vector<16x128xf32>
    %c0_64 = arith.constant 0 : index
    %c5 = arith.constant 5 : index
    %c0_65 = arith.constant 0 : index
    %173 = vector.load %arg9[%c0_64, %c5, %c0_65] : memref<1x16x128xf32, #tpu.memory_space<vmem>>, vector<1x1x128xf32>
    %174 = vector.shape_cast %173 : vector<1x1x128xf32> to vector<1x128xf32>
    %c0_66 = arith.constant 0 : index
    %c6 = arith.constant 6 : index
    %c0_67 = arith.constant 0 : index
    %175 = vector.load %arg9[%c0_66, %c6, %c0_67] : memref<1x16x128xf32, #tpu.memory_space<vmem>>, vector<1x1x128xf32>
    %176 = vector.shape_cast %175 : vector<1x1x128xf32> to vector<1x128xf32>
    %cst_68 = arith.constant dense<0.000000e+00> : vector<16xf32>
    %177 = vector.multi_reduction <add>, %172, %cst_68 [1] : vector<16x128xf32> to vector<16xf32>
    %178 = vector.shape_cast %177 : vector<16xf32> to vector<16x1xf32>
    %cst_69 = arith.constant 1.280000e+02 : f32
    %179 = vector.broadcast %cst_69 : f32 to vector<16x1xf32>
    %180 = arith.divf %178, %179 : vector<16x1xf32>
    %181 = vector.broadcast %180 : vector<16x1xf32> to vector<16x128xf32>
    %182 = arith.subf %172, %181 : vector<16x128xf32>
    %183 = arith.mulf %182, %182 : vector<16x128xf32>
    %cst_70 = arith.constant dense<0.000000e+00> : vector<16xf32>
    %184 = vector.multi_reduction <add>, %183, %cst_70 [1] : vector<16x128xf32> to vector<16xf32>
    %185 = vector.shape_cast %184 : vector<16xf32> to vector<16x1xf32>
    %cst_71 = arith.constant 1.280000e+02 : f32
    %186 = vector.broadcast %cst_71 : f32 to vector<16x1xf32>
    %187 = arith.divf %185, %186 : vector<16x1xf32>
    %cst_72 = arith.constant 9.99999974E-6 : f32
    %188 = vector.broadcast %cst_72 : f32 to vector<16x1xf32>
    %189 = arith.addf %187, %188 : vector<16x1xf32>
    %190 = math.rsqrt %189 : vector<16x1xf32>
    %191 = vector.broadcast %190 : vector<16x1xf32> to vector<16x128xf32>
    %192 = arith.mulf %182, %191 : vector<16x128xf32>
    %193 = vector.broadcast %174 : vector<1x128xf32> to vector<16x128xf32>
    %194 = arith.mulf %192, %193 : vector<16x128xf32>
    %195 = vector.broadcast %176 : vector<1x128xf32> to vector<16x128xf32>
    %196 = arith.addf %194, %195 : vector<16x128xf32>
    %197 = arith.truncf %196 : vector<16x128xf32> to vector<16x128xbf16>
    %cst_73 = arith.constant 0.000000e+00 : f32
    %198 = vector.broadcast %cst_73 : f32 to vector<16x128xf32>
    %c0_74 = arith.constant 0 : index
    %c0_75 = arith.constant 0 : index
    %c0_76 = arith.constant 0 : index
    %199 = vector.load %arg7[%c0_74, %c0_75, %c0_76] : memref<1x128x2048xbf16, #tpu.memory_space<vmem>>, vector<1x128x512xbf16>
    %200 = vector.shape_cast %199 : vector<1x128x512xbf16> to vector<128x512xbf16>
    %cst_77 = arith.constant dense<0.000000e+00> : vector<16x512xf32>
    %201 = tpu.matmul %197, %200, %cst_77 {dimension_numbers = #tpu.dot_dimension_numbers<[1], [0], [0], [1], [0, 0, 1, 1], [], []>} : vector<16x128xbf16>, vector<128x512xbf16>, vector<16x512xf32> -> vector<16x512xf32>
    %c0_78 = arith.constant 0 : index
    %c0_79 = arith.constant 0 : index
    %c0_80 = arith.constant 0 : index
    %202 = vector.load %arg10[%c0_78, %c0_79, %c0_80] : memref<1x1x2048xf32, #tpu.memory_space<vmem>>, vector<1x1x512xf32>
    %203 = vector.shape_cast %202 : vector<1x1x512xf32> to vector<1x512xf32>
    %204 = vector.broadcast %203 : vector<1x512xf32> to vector<16x512xf32>
    %205 = arith.addf %201, %204 : vector<16x512xf32>
    %cst_81 = arith.constant 0.000000e+00 : f32
    %206 = vector.broadcast %cst_81 : f32 to vector<16x512xf32>
    %207 = arith.maximumf %205, %206 : vector<16x512xf32>
    %c0_82 = arith.constant 0 : index
    %c0_83 = arith.constant 0 : index
    %c0_84 = arith.constant 0 : index
    %208 = vector.load %arg8[%c0_82, %c0_83, %c0_84] : memref<1x2048x128xbf16, #tpu.memory_space<vmem>>, vector<1x512x128xbf16>
    %209 = vector.shape_cast %208 : vector<1x512x128xbf16> to vector<512x128xbf16>
    %210 = arith.truncf %207 : vector<16x512xf32> to vector<16x512xbf16>
    %cst_85 = arith.constant dense<0.000000e+00> : vector<16x128xf32>
    %211 = tpu.matmul %210, %209, %cst_85 {dimension_numbers = #tpu.dot_dimension_numbers<[1], [0], [0], [1], [0, 0, 1, 1], [], []>} : vector<16x512xbf16>, vector<512x128xbf16>, vector<16x128xf32> -> vector<16x128xf32>
    %212 = arith.addf %198, %211 : vector<16x128xf32>
    %c0_86 = arith.constant 0 : index
    %c0_87 = arith.constant 0 : index
    %c512 = arith.constant 512 : index
    %213 = vector.load %arg7[%c0_86, %c0_87, %c512] : memref<1x128x2048xbf16, #tpu.memory_space<vmem>>, vector<1x128x512xbf16>
    %214 = vector.shape_cast %213 : vector<1x128x512xbf16> to vector<128x512xbf16>
    %cst_88 = arith.constant dense<0.000000e+00> : vector<16x512xf32>
    %215 = tpu.matmul %197, %214, %cst_88 {dimension_numbers = #tpu.dot_dimension_numbers<[1], [0], [0], [1], [0, 0, 1, 1], [], []>} : vector<16x128xbf16>, vector<128x512xbf16>, vector<16x512xf32> -> vector<16x512xf32>
    %c0_89 = arith.constant 0 : index
    %c0_90 = arith.constant 0 : index
    %c512_91 = arith.constant 512 : index
    %216 = vector.load %arg10[%c0_89, %c0_90, %c512_91] : memref<1x1x2048xf32, #tpu.memory_space<vmem>>, vector<1x1x512xf32>
    %217 = vector.shape_cast %216 : vector<1x1x512xf32> to vector<1x512xf32>
    %218 = vector.broadcast %217 : vector<1x512xf32> to vector<16x512xf32>
    %219 = arith.addf %215, %218 : vector<16x512xf32>
    %cst_92 = arith.constant 0.000000e+00 : f32
    %220 = vector.broadcast %cst_92 : f32 to vector<16x512xf32>
    %221 = arith.maximumf %219, %220 : vector<16x512xf32>
    %c0_93 = arith.constant 0 : index
    %c512_94 = arith.constant 512 : index
    %c0_95 = arith.constant 0 : index
    %222 = vector.load %arg8[%c0_93, %c512_94, %c0_95] : memref<1x2048x128xbf16, #tpu.memory_space<vmem>>, vector<1x512x128xbf16>
    %223 = vector.shape_cast %222 : vector<1x512x128xbf16> to vector<512x128xbf16>
    %224 = arith.truncf %221 : vector<16x512xf32> to vector<16x512xbf16>
    %cst_96 = arith.constant dense<0.000000e+00> : vector<16x128xf32>
    %225 = tpu.matmul %224, %223, %cst_96 {dimension_numbers = #tpu.dot_dimension_numbers<[1], [0], [0], [1], [0, 0, 1, 1], [], []>} : vector<16x512xbf16>, vector<512x128xbf16>, vector<16x128xf32> -> vector<16x128xf32>
    %226 = arith.addf %212, %225 : vector<16x128xf32>
    %c0_97 = arith.constant 0 : index
    %c0_98 = arith.constant 0 : index
    %c1024 = arith.constant 1024 : index
    %227 = vector.load %arg7[%c0_97, %c0_98, %c1024] : memref<1x128x2048xbf16, #tpu.memory_space<vmem>>, vector<1x128x512xbf16>
    %228 = vector.shape_cast %227 : vector<1x128x512xbf16> to vector<128x512xbf16>
    %cst_99 = arith.constant dense<0.000000e+00> : vector<16x512xf32>
    %229 = tpu.matmul %197, %228, %cst_99 {dimension_numbers = #tpu.dot_dimension_numbers<[1], [0], [0], [1], [0, 0, 1, 1], [], []>} : vector<16x128xbf16>, vector<128x512xbf16>, vector<16x512xf32> -> vector<16x512xf32>
    %c0_100 = arith.constant 0 : index
    %c0_101 = arith.constant 0 : index
    %c1024_102 = arith.constant 1024 : index
    %230 = vector.load %arg10[%c0_100, %c0_101, %c1024_102] : memref<1x1x2048xf32, #tpu.memory_space<vmem>>, vector<1x1x512xf32>
    %231 = vector.shape_cast %230 : vector<1x1x512xf32> to vector<1x512xf32>
    %232 = vector.broadcast %231 : vector<1x512xf32> to vector<16x512xf32>
    %233 = arith.addf %229, %232 : vector<16x512xf32>
    %cst_103 = arith.constant 0.000000e+00 : f32
    %234 = vector.broadcast %cst_103 : f32 to vector<16x512xf32>
    %235 = arith.maximumf %233, %234 : vector<16x512xf32>
    %c0_104 = arith.constant 0 : index
    %c1024_105 = arith.constant 1024 : index
    %c0_106 = arith.constant 0 : index
    %236 = vector.load %arg8[%c0_104, %c1024_105, %c0_106] : memref<1x2048x128xbf16, #tpu.memory_space<vmem>>, vector<1x512x128xbf16>
    %237 = vector.shape_cast %236 : vector<1x512x128xbf16> to vector<512x128xbf16>
    %238 = arith.truncf %235 : vector<16x512xf32> to vector<16x512xbf16>
    %cst_107 = arith.constant dense<0.000000e+00> : vector<16x128xf32>
    %239 = tpu.matmul %238, %237, %cst_107 {dimension_numbers = #tpu.dot_dimension_numbers<[1], [0], [0], [1], [0, 0, 1, 1], [], []>} : vector<16x512xbf16>, vector<512x128xbf16>, vector<16x128xf32> -> vector<16x128xf32>
    %240 = arith.addf %226, %239 : vector<16x128xf32>
    %c0_108 = arith.constant 0 : index
    %c0_109 = arith.constant 0 : index
    %c1536 = arith.constant 1536 : index
    %241 = vector.load %arg7[%c0_108, %c0_109, %c1536] : memref<1x128x2048xbf16, #tpu.memory_space<vmem>>, vector<1x128x512xbf16>
    %242 = vector.shape_cast %241 : vector<1x128x512xbf16> to vector<128x512xbf16>
    %cst_110 = arith.constant dense<0.000000e+00> : vector<16x512xf32>
    %243 = tpu.matmul %197, %242, %cst_110 {dimension_numbers = #tpu.dot_dimension_numbers<[1], [0], [0], [1], [0, 0, 1, 1], [], []>} : vector<16x128xbf16>, vector<128x512xbf16>, vector<16x512xf32> -> vector<16x512xf32>
    %c0_111 = arith.constant 0 : index
    %c0_112 = arith.constant 0 : index
    %c1536_113 = arith.constant 1536 : index
    %244 = vector.load %arg10[%c0_111, %c0_112, %c1536_113] : memref<1x1x2048xf32, #tpu.memory_space<vmem>>, vector<1x1x512xf32>
    %245 = vector.shape_cast %244 : vector<1x1x512xf32> to vector<1x512xf32>
    %246 = vector.broadcast %245 : vector<1x512xf32> to vector<16x512xf32>
    %247 = arith.addf %243, %246 : vector<16x512xf32>
    %cst_114 = arith.constant 0.000000e+00 : f32
    %248 = vector.broadcast %cst_114 : f32 to vector<16x512xf32>
    %249 = arith.maximumf %247, %248 : vector<16x512xf32>
    %c0_115 = arith.constant 0 : index
    %c1536_116 = arith.constant 1536 : index
    %c0_117 = arith.constant 0 : index
    %250 = vector.load %arg8[%c0_115, %c1536_116, %c0_117] : memref<1x2048x128xbf16, #tpu.memory_space<vmem>>, vector<1x512x128xbf16>
    %251 = vector.shape_cast %250 : vector<1x512x128xbf16> to vector<512x128xbf16>
    %252 = arith.truncf %249 : vector<16x512xf32> to vector<16x512xbf16>
    %cst_118 = arith.constant dense<0.000000e+00> : vector<16x128xf32>
    %253 = tpu.matmul %252, %251, %cst_118 {dimension_numbers = #tpu.dot_dimension_numbers<[1], [0], [0], [1], [0, 0, 1, 1], [], []>} : vector<16x512xbf16>, vector<512x128xbf16>, vector<16x128xf32> -> vector<16x128xf32>
    %254 = arith.addf %240, %253 : vector<16x128xf32>
    %c0_119 = arith.constant 0 : index
    %c4 = arith.constant 4 : index
    %c0_120 = arith.constant 0 : index
    %255 = vector.load %arg9[%c0_119, %c4, %c0_120] : memref<1x16x128xf32, #tpu.memory_space<vmem>>, vector<1x1x128xf32>
    %256 = vector.shape_cast %255 : vector<1x1x128xf32> to vector<1x128xf32>
    %257 = vector.broadcast %256 : vector<1x128xf32> to vector<16x128xf32>
    %258 = arith.addf %254, %257 : vector<16x128xf32>
    %259 = arith.addf %196, %258 : vector<16x128xf32>
    %c0_121 = arith.constant 0 : index
    %c7 = arith.constant 7 : index
    %c0_122 = arith.constant 0 : index
    %260 = vector.load %arg9[%c0_121, %c7, %c0_122] : memref<1x16x128xf32, #tpu.memory_space<vmem>>, vector<1x1x128xf32>
    %261 = vector.shape_cast %260 : vector<1x1x128xf32> to vector<1x128xf32>
    %c0_123 = arith.constant 0 : index
    %c8_124 = arith.constant 8 : index
    %c0_125 = arith.constant 0 : index
    %262 = vector.load %arg9[%c0_123, %c8_124, %c0_125] : memref<1x16x128xf32, #tpu.memory_space<vmem>>, vector<1x1x128xf32>
    %263 = vector.shape_cast %262 : vector<1x1x128xf32> to vector<1x128xf32>
    %cst_126 = arith.constant dense<0.000000e+00> : vector<16xf32>
    %264 = vector.multi_reduction <add>, %259, %cst_126 [1] : vector<16x128xf32> to vector<16xf32>
    %265 = vector.shape_cast %264 : vector<16xf32> to vector<16x1xf32>
    %cst_127 = arith.constant 1.280000e+02 : f32
    %266 = vector.broadcast %cst_127 : f32 to vector<16x1xf32>
    %267 = arith.divf %265, %266 : vector<16x1xf32>
    %268 = vector.broadcast %267 : vector<16x1xf32> to vector<16x128xf32>
    %269 = arith.subf %259, %268 : vector<16x128xf32>
    %270 = arith.mulf %269, %269 : vector<16x128xf32>
    %cst_128 = arith.constant dense<0.000000e+00> : vector<16xf32>
    %271 = vector.multi_reduction <add>, %270, %cst_128 [1] : vector<16x128xf32> to vector<16xf32>
    %272 = vector.shape_cast %271 : vector<16xf32> to vector<16x1xf32>
    %cst_129 = arith.constant 1.280000e+02 : f32
    %273 = vector.broadcast %cst_129 : f32 to vector<16x1xf32>
    %274 = arith.divf %272, %273 : vector<16x1xf32>
    %cst_130 = arith.constant 9.99999974E-6 : f32
    %275 = vector.broadcast %cst_130 : f32 to vector<16x1xf32>
    %276 = arith.addf %274, %275 : vector<16x1xf32>
    %277 = math.rsqrt %276 : vector<16x1xf32>
    %278 = vector.broadcast %277 : vector<16x1xf32> to vector<16x128xf32>
    %279 = arith.mulf %269, %278 : vector<16x128xf32>
    %280 = vector.broadcast %261 : vector<1x128xf32> to vector<16x128xf32>
    %281 = arith.mulf %279, %280 : vector<16x128xf32>
    %282 = vector.broadcast %263 : vector<1x128xf32> to vector<16x128xf32>
    %283 = arith.addf %281, %282 : vector<16x128xf32>
    %c0_131 = arith.constant 0 : index
    %c0_132 = arith.constant 0 : index
    %284 = vector.load %arg12[%c0_131, %c0_132] : memref<16x128xf32, #tpu.memory_space<vmem>>, vector<16x128xf32>
    tpu.vector_store %arg12[%c0_131, %c0_132], %283 {strides = array<i32>} : memref<16x128xf32, #tpu.memory_space<vmem>>, vector<16x128xf32>,
    %285 = arith.extui %1 : i1 to i32
    %c0_i32_133 = arith.constant 0 : i32
    %286 = arith.cmpi ne, %285, %c0_i32_133 : i32
    scf.if %286 {
      %c0_134 = arith.constant 0 : index
      %c0_135 = arith.constant 0 : index
      %287 = vector.load %arg12[%c0_134, %c0_135] : memref<16x128xf32, #tpu.memory_space<vmem>>, vector<16x128xf32>
      %c0_136 = arith.constant 0 : index
      %c0_137 = arith.constant 0 : index
      %288 = vector.load %arg3[%c0_136, %c0_137] : memref<128x128xbf16, #tpu.memory_space<vmem>>, vector<128x128xbf16>
      %289 = arith.truncf %287 : vector<16x128xf32> to vector<16x128xbf16>
      %cst_138 = arith.constant dense<0.000000e+00> : vector<16x128xf32>
      %290 = tpu.matmul %289, %288, %cst_138 {dimension_numbers = #tpu.dot_dimension_numbers<[1], [0], [0], [1], [0, 0, 1, 1], [], []>} : vector<16x128xbf16>, vector<128x128xbf16>, vector<16x128xf32> -> vector<16x128xf32>
      %c1_139 = arith.constant 1 : index
      %c0_140 = arith.constant 0 : index
      %291 = vector.load %arg4[%c1_139, %c0_140] : memref<8x128xf32, #tpu.memory_space<vmem>>, vector<1x128xf32>
      %292 = vector.broadcast %291 : vector<1x128xf32> to vector<16x128xf32>
      %293 = arith.addf %290, %292 : vector<16x128xf32>
      %c0_141 = arith.constant 0 : index
      %c0_142 = arith.constant 0 : index
      %294 = vector.load %arg11[%c0_141, %c0_142] : memref<16x128xf32, #tpu.memory_space<vmem>>, vector<16x128xf32>
      tpu.vector_store %arg11[%c0_141, %c0_142], %293 {strides = array<i32>} : memref<16x128xf32, #tpu.memory_space<vmem>>, vector<16x128xf32>,
    } else {
    }
    return
  }
  func.func @transform_0(%arg0: i32) -> (i32, i32) {
    %c0_i32 = arith.constant 0 : i32
    %c0_i32_0 = arith.constant 0 : i32
    %c0_i32_1 = arith.constant 0 : i32
    return %c0_i32, %c0_i32_0 : i32, i32
  }
  func.func @transform_1(%arg0: i32) -> (i32, i32) {
    %c0_i32 = arith.constant 0 : i32
    %c0_i32_0 = arith.constant 0 : i32
    %c0_i32_1 = arith.constant 0 : i32
    return %c0_i32, %c0_i32_0 : i32, i32
  }
  func.func @transform_2(%arg0: i32) -> (i32, i32) {
    %c0_i32 = arith.constant 0 : i32
    %c0_i32_0 = arith.constant 0 : i32
    %c0_i32_1 = arith.constant 0 : i32
    return %c0_i32, %c0_i32_0 : i32, i32
  }
  func.func @transform_3(%arg0: i32) -> (i32, i32) {
    %c0_i32 = arith.constant 0 : i32
    %c0_i32_0 = arith.constant 0 : i32
    %c0_i32_1 = arith.constant 0 : i32
    return %c0_i32, %c0_i32_0 : i32, i32
  }
  func.func @transform_4(%arg0: i32) -> (i32, i32, i32) {
    %c0_i32 = arith.constant 0 : i32
    %c0_i32_0 = arith.constant 0 : i32
    %c0_i32_1 = arith.constant 0 : i32
    return %arg0, %c0_i32, %c0_i32_0 : i32, i32, i32
  }
  func.func @transform_5(%arg0: i32) -> (i32, i32, i32) {
    %c0_i32 = arith.constant 0 : i32
    %c0_i32_0 = arith.constant 0 : i32
    %c0_i32_1 = arith.constant 0 : i32
    return %arg0, %c0_i32, %c0_i32_0 : i32, i32, i32
  }
  func.func @transform_6(%arg0: i32) -> (i32, i32, i32) {
    %c0_i32 = arith.constant 0 : i32
    %c0_i32_0 = arith.constant 0 : i32
    %c0_i32_1 = arith.constant 0 : i32
    return %arg0, %c0_i32, %c0_i32_0 : i32, i32, i32
  }
  func.func @transform_7(%arg0: i32) -> (i32, i32, i32) {
    %c0_i32 = arith.constant 0 : i32
    %c0_i32_0 = arith.constant 0 : i32
    %c0_i32_1 = arith.constant 0 : i32
    return %arg0, %c0_i32, %c0_i32_0 : i32, i32, i32
  }
  func.func @transform_8(%arg0: i32) -> (i32, i32, i32) {
    %c0_i32 = arith.constant 0 : i32
    %c0_i32_0 = arith.constant 0 : i32
    %c0_i32_1 = arith.constant 0 : i32
    return %arg0, %c0_i32, %c0_i32_0 : i32, i32, i32
  }
  func.func @transform_9(%arg0: i32) -> (i32, i32, i32) {
    %c0_i32 = arith.constant 0 : i32
    %c0_i32_0 = arith.constant 0 : i32
    %c0_i32_1 = arith.constant 0 : i32
    return %arg0, %c0_i32, %c0_i32_0 : i32, i32, i32
  }
  func.func @transform_10(%arg0: i32) -> (i32, i32) {
    %c0_i32 = arith.constant 0 : i32
    %c0_i32_0 = arith.constant 0 : i32
    %c0_i32_1 = arith.constant 0 : i32
    return %c0_i32, %c0_i32_0 : i32, i32
  }
}

</mosaic_0001>

<bundles_post_ra>
// kernel: tsformer_forward.1
= control target key start
LH: loop header
LB: loop body
LE: loop exit
PB: predicated region body
PF: predicated region fallthrough
CT: control target
= control target key end

     0   :  { %s7433_s0 = inlined_call_operand.vmem [shape: f32[16,16], index: 0, kind: input, shape index: {}]   ;;  %s7434_s1 = inlined_call_operand.hbm [shape: bf16[16,128], index: 1, kind: input, shape index: {}]   ;;  %s7435_s2 = inlined_call_operand.hbm [shape: bf16[128,128], index: 2, kind: input, shape index: {}]   ;;  %s7436_s3 = inlined_call_operand.hbm [shape: f32[8,128], index: 3, kind: input, shape index: {}]   ;;  %s7437_s4 = inlined_call_operand.hbm [shape: bf16[3,128,384], index: 4, kind: input, shape index: {}]   ;;  %s7438_s5 = inlined_call_operand.hbm [shape: bf16[3,128,128], index: 5, kind: input, shape index: {}]   ;;  %s7439_s6 = inlined_call_operand.hbm [shape: bf16[3,128,2048], index: 6, kind: input, shape index: {}]   ;;  %s7440_s7 = inlined_call_operand.hbm [shape: bf16[3,2048,128], index: 7, kind: input, shape index: {}]   ;;  %s7441_s8 = inlined_call_operand.hbm [shape: f32[3,16,128], index: 8, kind: input, shape index: {}]   ;;  %s7442_s9 = inlined_call_operand.hbm [shape: f32[3,1,2048], index: 9, kind: input, shape index: {}]   ;;  %s7443_s10 = inlined_call_operand.vmem [shape: f32[16,128], index: 10, kind: output, shape index: {}]  }
   0x1   :  { %7475 = sst [smem:[#allocation30_spill]] %s7433_s0 }
   0x2   :  { %7476 = sst [smem:[#allocation31_spill]] %s7435_s2 }
   0x3   :  { %7477 = sst [smem:[#allocation32_spill]] %s7437_s4 }
   0x4   :  { %7478 = sst [smem:[#allocation33_spill]] %s7439_s6 }
   0x5   :  { %7479 = sst [smem:[#allocation34_spill]] %s7441_s8 }
   0x6   :  { %7480 = sst [smem:[#allocation35_spill]] %s7443_s10 }
   0x7   :  { %15 = vsyncpa [#allocation5], 0 }
   0x8   :  { %16 = vsyncpa [#allocation7], 0 }
   0x9   :  { %17 = vsyncpa [#allocation10], 0 }
   0xa   :  { %19 = vsyncpa [#allocation10 + $0x1], 0 }
   0xb   :  { %20 = vsyncpa [#allocation13], 0 }
   0xc   :  { %22 = vsyncpa [#allocation13 + $0x1], 0 }
   0xd   :  { %23 = vsyncpa [#allocation16], 0 }
   0xe   :  { %25 = vsyncpa [#allocation16 + $0x1], 0  ;;  %s6441_s13 = smov 0   ;;  %s6443_s14 = smov 0  }
   0xf   :  { %s6445_s15 = smov 0   ;;  %s6447_s16 = smov 0  }
  0x10 LB: > { %7481 = sst [smem:[#allocation23_spill]] %s6350_s14  ;;  %s6460_s17 = sadd.s32 4294967295, %s6358_s16   ;;  %s6358_s16 = sphi %s6447_s16, %s7526_s16   ;;  %s6354_s15 = sphi %s6445_s15, %s7529_s15   ;;  %s6350_s14 = sphi %s6443_s14, %s7528_s14   ;;  %s6346_s13 = sphi %s6441_s13, %s7527_s13  }
  0x11   : > { %7482 = sst [smem:[#allocation24_spill]] %s6354_s15  ;;  %s6463_s18 = sadd.s32 1, %s6358_s16  }
  0x12   : > { %7483 = sst [smem:[#allocation25_spill]] %s6460_s17  ;;  %s119_s19 = ssub.s32 %s6358_s16, %s6463_s18 }
  0x13   : > { %7484 = sst [smem:[#allocation26_spill]] %s6463_s18  ;;  %s122_s20 = sadd.s32 1, %s6354_s15 }
  0x14   : > { %p120_p0 = scmp.eq.s32.totalorder %s119_s19, 0  ;;  %p129_p1 = scmp.ne.s32.totalorder %s6354_s15, %s6350_s14 }
  0x15   : > { %p130_p2 = scmp.eq.s32.totalorder %s6358_s16, 0  ;;  %p135_p3 = scmp.ne.s32.totalorder %s6350_s14, %s6346_s13 }
  0x16   : > { %s6473_s21 = scalar_select %p120_p0, %s6354_s15, %s122_s20  }
  0x17   : > { %p6475_p4 = por %p130_p2, %p129_p1  ;;  %p7444_p5 = scmp.eq.s32.totalorder %s6460_s17, 0 }
  0x18   : > { %7485 = sst [smem:[#allocation27_spill]] %s6473_s21  ;;  %p4947_p6 = scmp.ge.s32.totalorder %s6358_s16, 1 }
  0x19   : > { %p297_p7 = scmp.lt.s32.totalorder %s6358_s16, 4  ;;  %p6484_p8 = por %p7444_p5, %p135_p3 }
  0x1a   : > { %s6360_s25 = smov [#allocation6]   ;;  %p5769_p13 = scmp.lt.s32.totalorder %s6358_s16, 3 }
  0x1b   : > { %s7487_s23 = scalar_select %p6484_p8, 1, 0 }
  0x1c   : > { %p6489_p10 = pnand %p4947_p6, %p297_p7  ;;  %s325_s26 = sshll.u32 %s6360_s25, 4  ;;  %s326_s26 = int_to_ptr.vmem [resolvable:$true] %s325_s26 }
  0x1d   : > { %7488 = sst [smem:[#allocation28_spill]] %s7487_s23  ;;  %s6503_s28 = sand.u32 1, %s6358_s16  }
  0x1e   : > { %s7489_s24 = scalar_select %p6489_p10, 1, 0 }
  0x1f   : > { %p5737_p11 = pneg %p6489_p10  ;;  %s6506_s29 = sand.u32 1, %s6354_s15  }
  0x20   : > { %7490 = sst [smem:[#allocation29_spill]] %s7489_s24  ;;  %p6510_p0 = pnand %p5769_p13, %p6475_p4 }
  0x21   : > { %p6497_p12 = pnand %p5737_p11, %p7444_p5  ;;  %s7493_s2 = sld [smem:[#allocation31_spill]] }
  0x22   : > { %s7492_s30 = scalar_select %p6510_p0, 1, 0 }
  0x23   : > { %s7491_s27 = scalar_select %p6497_p12, 1, 0 }
  0x24   : > { %p6522_p2 = pneg %p6497_p12 }
  0x26   : > { %s7494_s25 = scalar_select %p6522_p2, 1, 0 }
  0x27   : > { %s6044_s13 = scalar_lea.hbm %s7493_s2, 1024 }
  0x28   : > { %p6045_p1 = scmp.ne.s32.totalorder %s7493_s2, %s6044_s13  ;;  %p6051_p6 = scmp.lt.u32.totalorder %s6044_s13, %s7493_s2 }
  0x2a   : > { %p6047_p3 = pnand %p6522_p2, %p6045_p1 }
  0x2c   : > { %p6048_p4 = pneg %p6047_p3 }
  0x2e   : > { %p6053_p7 = pnand %p6051_p6, %p6048_p4 }
  0x30   : > { %6056 = shalt.err (!%p6053_p7)
}
  0x31   : > { %s6057_s11 = scalar_lea.vmem %s326_s26, 1024  ;;  %p6065_p5 = scmp.lt.s32.totalorder %s326_s26, %s326_s26 }
  0x32   : > { %p6058_p11 = scmp.ne.s32.totalorder %s326_s26, %s6057_s11  ;;  %p6066_p8 = scmp.lt.s32.totalorder %s6057_s11, %s6057_s11 }
  0x34   : > { %p6060_p13 = pnand %p6058_p11, %p6522_p2  ;;  %p6067_p10 = por %p6066_p8, %p6065_p5 }
  0x36   : > { %p6061_p9 = pneg %p6060_p13 }
  0x38   : > { %p6068_p0 = pnand %p6067_p10, %p6061_p9 }
  0x3a   : > { %6071 = shalt.err (!%p6068_p0)
}
  0x3b   : > { %s7464_s12 = smov 64   ;;  %s7462_s21 = smov 4  }
  0x3c   : > { %5743 = dma.hbm_to_vmem [thread:$0]  (!%p6497_p12), %s7493_s2, 1024, %s326_s26, [#allocation7], %s7464_s12, %s7464_s12, %s7462_s21  }
  0x3d   : > { %s5710_s20 = smul.u32 192, %s6506_s29  ;;  %s7495_s4 = sld [smem:[#allocation32_spill]] }
  0x3e   : > { %s5711_s22 = smul.u32 3072, %s6358_s16  ;;  %s4956_s23 = sshll.u32 %s6506_s29, 10 }
  0x3f   : > { %s354_s10 = scalar_lea.vmem [#allocation9], %s5710_s20  ;;  %s7466_s14 = scalar_lea.sflag [#allocation10], %s6503_s28 }
  0x40   : > { %s361_s0 = sshll.u32 %s354_s10, 4  ;;  %p7496_p8 = scmp.ne.s32.totalorder %s7492_s30, 0  ;;  %s6548_s0 = int_to_ptr.vmem [resolvable:$true] %s361_s0 }
  0x42   : > { %p6556_p9 = pneg %p7496_p8 }
  0x43   : > { %s6546_s18 = scalar_lea.hbm %s7495_s4, %s5711_s22  ;;  %s6077_s19 = scalar_lea.hbm %s7495_s4, 9216 }
  0x44   : > { %s6072_s17 = scalar_lea.hbm %s6546_s18, 3072  ;;  %p6078_p1 = scmp.lt.u32.totalorder %s6546_s18, %s7495_s4 }
  0x45   : > { %p6073_p5 = scmp.ne.s32.totalorder %s6546_s18, %s6072_s17  ;;  %p6079_p3 = scmp.lt.u32.totalorder %s6077_s19, %s6072_s17 }
  0x46   : > { %s7497_s26 = scalar_select %p6556_p9, 1, 0 }
  0x47   : > { %p6075_p10 = pnand %p6556_p9, %p6073_p5  ;;  %p6080_p4 = por %p6079_p3, %p6078_p1 }
  0x48   : > { %p6081_p6 = scmp.lt.u32.totalorder %s6072_s17, %s6546_s18 }
  0x49   : > { %p6076_p0 = pneg %p6075_p10 }
  0x4a   : > { %p6082_p7 = por %p6081_p6, %p6080_p4 }
  0x4c   : > { %p6083_p11 = pnand %p6082_p7, %p6076_p0 }
  0x4e   : > { %6086 = shalt.err (!%p6083_p11)
}
  0x4f   : > { %s6087_s22 = scalar_lea.vmem %s6548_s0, 3072  ;;  %s6363_s11 = smov [#allocation9]  }
  0x50   : > { %p6088_p13 = scmp.ne.s32.totalorder %s6548_s0, %s6087_s22  ;;  %s6092_s15 = sshll.u32 %s6363_s11, 4  ;;  %s6093_s15 = int_to_ptr.vmem [resolvable:$false] %s6092_s15 }
  0x51   : > { %s6094_s13 = scalar_lea.vmem %s6093_s15, 6144  ;;  %p6095_p12 = scmp.lt.s32.totalorder %s6548_s0, %s6093_s15 }
  0x52   : > { %p6090_p5 = pnand %p6088_p13, %p6556_p9  ;;  %p6096_p2 = scmp.lt.s32.totalorder %s6094_s13, %s6087_s22 }
  0x54   : > { %p6091_p10 = pneg %p6090_p5  ;;  %p6097_p1 = por %p6096_p2, %p6095_p12 }
  0x56   : > { %p6098_p3 = pnand %p6097_p1, %p6091_p10 }
  0x58   : > { %6101 = shalt.err (!%p6098_p3)
}
  0x59   : > { %s6364_s17 = smov 192   ;;  %s6365_s19 = smov 12  }
  0x5a   : > { %5750 = dma.hbm_to_vmem [thread:$0]  (!%p7496_p8), %s6546_s18, 3072, %s6548_s0, %s7466_s14, %s6364_s17, %s6364_s17, %s6365_s19  }
  0x5b   : > { %s5307_s10 = sshll.u32 %s6358_s16, 14  ;;  %s7498_s6 = sld [smem:[#allocation33_spill]] }
  0x5c   : > { %s396_s15 = scalar_lea.vmem [#allocation12], %s4956_s23  ;;  %s7469_s21 = scalar_lea.sflag [#allocation13], %s6503_s28 }
  0x5d   : > { %s403_s13 = sshll.u32 %s396_s15, 4  ;;  %s6591_s13 = int_to_ptr.vmem [resolvable:$true] %s403_s13 }
  0x61   : > { %s6587_s11 = scalar_lea.hbm %s7498_s6, %s5307_s10  ;;  %s6107_s17 = scalar_lea.hbm %s7498_s6, 49152 }
  0x62   : > { %s6102_s12 = scalar_lea.hbm %s6587_s11, 16384  ;;  %p6108_p4 = scmp.lt.u32.totalorder %s6587_s11, %s7498_s6 }
  0x63   : > { %p6103_p12 = scmp.ne.s32.totalorder %s6587_s11, %s6102_s12  ;;  %p6109_p6 = scmp.lt.u32.totalorder %s6107_s17, %s6102_s12 }
  0x64   : > { %p6111_p11 = scmp.lt.u32.totalorder %s6102_s12, %s6587_s11 }
  0x65   : > { %p6105_p2 = pnand %p6103_p12, %p6556_p9  ;;  %p6110_p7 = por %p6109_p6, %p6108_p4 }
  0x67   : > { %p6106_p0 = pneg %p6105_p2  ;;  %p6112_p13 = por %p6111_p11, %p6110_p7 }
  0x69   : > { %p6113_p5 = pnand %p6112_p13, %p6106_p0 }
  0x6b   : > { %6116 = shalt.err (!%p6113_p5)
}
  0x6c   : > { %s6117_s22 = scalar_lea.vmem %s6591_s13, 16384  ;;  %s6366_s15 = smov [#allocation12]  }
  0x6d   : > { %p6118_p10 = scmp.ne.s32.totalorder %s6591_s13, %s6117_s22  ;;  %s6122_s0 = sshll.u32 %s6366_s15, 4  ;;  %s6123_s0 = int_to_ptr.vmem [resolvable:$false] %s6122_s0 }
  0x6e   : > { %s6124_s18 = scalar_lea.vmem %s6123_s0, 32768  ;;  %p6125_p12 = scmp.lt.s32.totalorder %s6591_s13, %s6123_s0 }
  0x6f   : > { %p6120_p1 = pnand %p6118_p10, %p6556_p9  ;;  %p6126_p2 = scmp.lt.s32.totalorder %s6124_s18, %s6117_s22 }
  0x71   : > { %p6121_p3 = pneg %p6120_p1  ;;  %p6127_p4 = por %p6126_p2, %p6125_p12 }
  0x73   : > { %p6128_p6 = pnand %p6127_p4, %p6121_p3 }
  0x75   : > { %6131 = shalt.err (!%p6128_p6)
}
  0x76   : > { %s6367_s12 = smov 1024   ;;  %s7499_s17 = smov 64  }
  0x77   : > { %5756 = dma.hbm_to_vmem [thread:$0]  (!%p7496_p8), %s6587_s11, 16384, %s6591_s13, %s7469_s21, %s6367_s12, %s6367_s12, %s7499_s17  }
  0x78   : > { %s6623_s22 = scalar_lea.hbm %s7440_s7, %s5307_s10  ;;  %s417_s15 = scalar_lea.vmem [#allocation14], %s4956_s23 }
  0x79   : > { %s424_s0 = sshll.u32 %s417_s15, 4  ;;  %s7467_s18 = sshll.u32 %s6506_s29, 4  ;;  %s6627_s0 = int_to_ptr.vmem [resolvable:$true] %s424_s0 }
  0x7a   : > { %s7468_s14 = sshll.u32 %s6358_s16, 8  ;;  %s7500_s8 = sld [smem:[#allocation34_spill]] }
  0x7b   : > { %s438_s10 = scalar_lea.vmem [#allocation15], %s7467_s18  ;;  %s435_s23 = scalar_lea.sflag [#allocation16], %s6503_s28 }
  0x7c   : > { %s445_s11 = sshll.u32 %s438_s10, 4  ;;  %s6640_s11 = int_to_ptr.vmem [resolvable:$true] %s445_s11 }
  0x80   : > { %s6636_s6 = scalar_lea.hbm %s7500_s8, %s7468_s14  ;;  %s6137_s2 = scalar_lea.hbm %s7500_s8, 768 }
  0x81   : > { %s6132_s13 = scalar_lea.hbm %s6636_s6, 256  ;;  %p6138_p13 = scmp.lt.u32.totalorder %s6636_s6, %s7500_s8 }
  0x82   : > { %p6133_p0 = scmp.ne.s32.totalorder %s6636_s6, %s6132_s13  ;;  %p6139_p5 = scmp.lt.u32.totalorder %s6137_s2, %s6132_s13 }
  0x83   : > { %p6141_p1 = scmp.lt.u32.totalorder %s6132_s13, %s6636_s6 }
  0x84   : > { %p6135_p7 = pnand %p6133_p0, %p6556_p9  ;;  %p6140_p10 = por %p6139_p5, %p6138_p13 }
  0x86   : > { %p6136_p11 = pneg %p6135_p7  ;;  %p6142_p3 = por %p6141_p1, %p6140_p10 }
  0x88   : > { %p6143_p12 = pnand %p6142_p3, %p6136_p11 }
  0x8a   : > { %6146 = shalt.err (!%p6143_p12)
}
  0x8b   : > { %s6147_s15 = scalar_lea.vmem %s6640_s11, 256  ;;  %s6368_s10 = smov [#allocation15]  }
  0x8c   : > { %p6148_p2 = scmp.ne.s32.totalorder %s6640_s11, %s6147_s15  ;;  %s6152_s12 = sshll.u32 %s6368_s10, 4  ;;  %s6153_s12 = int_to_ptr.vmem [resolvable:$false] %s6152_s12 }
  0x8d   : > { %s6154_s19 = scalar_lea.vmem %s6153_s12, 512  ;;  %p6155_p0 = scmp.lt.s32.totalorder %s6640_s11, %s6153_s12 }
  0x8e   : > { %p6150_p4 = pnand %p6148_p2, %p6556_p9  ;;  %p6156_p7 = scmp.lt.s32.totalorder %s6154_s19, %s6147_s15 }
  0x90   : > { %p6151_p6 = pneg %p6150_p4  ;;  %p6157_p13 = por %p6156_p7, %p6155_p0 }
  0x92   : > { %p6158_p5 = pnand %p6157_p13, %p6151_p6 }
  0x94   : > { %6161 = shalt.err (!%p6158_p5)
}
  0x95   : > { %s6369_s13 = smov 128   ;;  %s6370_s2 = smov 8  }
  0x96   : > { %5762 = dma.hbm_to_vmem [thread:$0]  (!%p7496_p8), %s6636_s6, 256, %s6640_s11, %s435_s23, %s6369_s13, %s6369_s13, %s6370_s2  }
  0x97   : > { %s6371_s4 = smov [#allocation4]   ;;  %s6372_s10 = smov [#allocation8]  }
  0x98   : > { %s312_s20 = sshll.u32 %s6371_s4, 4  ;;  %s339_s18 = sshll.u32 %s6372_s10, 4  ;;  %s313_s20 = int_to_ptr.vmem [resolvable:$true] %s312_s20  ;;  %s340_s18 = int_to_ptr.vmem [resolvable:$true] %s339_s18 }
  0x99   : > { %s6162_s19 = scalar_lea.hbm %s7434_s1, 128  ;;  %p7501_p10 = scmp.ne.s32.totalorder %s7494_s25, 0 }
  0x9a   : > { %p6163_p11 = scmp.ne.s32.totalorder %s7434_s1, %s6162_s19  ;;  %p6169_p12 = scmp.lt.u32.totalorder %s6162_s19, %s7434_s1 }
  0x9c   : > { %p6165_p1 = pnand %p6163_p11, %p7501_p10 }
  0x9e   : > { %p6166_p3 = pneg %p6165_p1 }
  0xa0   : > { %p6171_p2 = pnand %p6169_p12, %p6166_p3 }
  0xa2   : > { %6174 = shalt.err (!%p6171_p2)
}
  0xa3   : > { %s6175_s6 = scalar_lea.vmem %s313_s20, 128  ;;  %p6183_p7 = scmp.lt.s32.totalorder %s313_s20, %s313_s20 }
  0xa4   : > { %p6176_p4 = scmp.ne.s32.totalorder %s313_s20, %s6175_s6  ;;  %p6184_p13 = scmp.lt.s32.totalorder %s6175_s6, %s6175_s6 }
  0xa6   : > { %p6178_p6 = pnand %p6176_p4, %p7501_p10  ;;  %p6185_p5 = por %p6184_p13, %p6183_p7 }
  0xa8   : > { %p6179_p0 = pneg %p6178_p6 }
  0xaa   : > { %p6186_p8 = pnand %p6185_p5, %p6179_p0 }
  0xac   : > { %6189 = shalt.err (!%p6186_p8)
}
  0xad   : > { %p7502_p11 = scmp.ne.s32.totalorder %s7491_s27, 0  ;;  %s7503_s14 = smov 4  }
  0xae   : > { %s4953_s21 = sshll.u32 %s6506_s29, 6  ;;  %s6190_s2 = scalar_lea.hbm %s7436_s3, 128 }
  0xaf   : > { %5740 = dma.hbm_to_vmem [thread:$0]  (!%p7502_p11), %s7434_s1, 128, %s313_s20, [#allocation5], %s7499_s17, %s7499_s17, %s7503_s14  }
  0xb0   : > { %p6191_p8 = scmp.ne.s32.totalorder %s7436_s3, %s6190_s2  ;;  %p6197_p12 = scmp.lt.u32.totalorder %s6190_s2, %s7436_s3 }
  0xb2   : > { %p6193_p1 = pnand %p6191_p8, %p7501_p10 }
  0xb4   : > { %p6194_p3 = pneg %p6193_p1 }
  0xb6   : > { %p6199_p2 = pnand %p6197_p12, %p6194_p3 }
  0xb8   : > { %6202 = shalt.err (!%p6199_p2)
}
  0xb9   : > { %s6203_s20 = scalar_lea.vmem %s340_s18, 128  ;;  %p6211_p7 = scmp.lt.s32.totalorder %s340_s18, %s340_s18 }
  0xba   : > { %p6204_p4 = scmp.ne.s32.totalorder %s340_s18, %s6203_s20  ;;  %p6212_p13 = scmp.lt.s32.totalorder %s6203_s20, %s6203_s20 }
  0xbc   : > { %p6206_p6 = pnand %p6204_p4, %p7501_p10  ;;  %p6213_p5 = por %p6212_p13, %p6211_p7 }
  0xbe   : > { %p6207_p0 = pneg %p6206_p6 }
  0xc0   : > { %p6214_p9 = pnand %p6213_p5, %p6207_p0 }
  0xc2   : > { %6217 = shalt.err (!%p6214_p9)
}
  0xc3   : > { %5746 = dma.hbm_to_vmem [thread:$0]  (!%p7502_p11), %s7436_s3, 128, %s340_s18, [#allocation7]  }
  0xc4   : > { %s5306_s8 = sshll.u32 %s6358_s16, 10  ;;  %s375_s13 = scalar_lea.vmem [#allocation11], %s4953_s21 }
  0xc5   : > { %s6710_s25 = scalar_lea.hbm %s7438_s5, %s5306_s8  ;;  %s382_s2 = sshll.u32 %s375_s13, 4  ;;  %s6712_s2 = int_to_ptr.vmem [resolvable:$true] %s382_s2 }
  0xc6   : > { %s6218_s27 = scalar_lea.hbm %s6710_s25, 1024  ;;  %p7504_p10 = scmp.ne.s32.totalorder %s7497_s26, 0 }
  0xc7   : > { %p6219_p9 = scmp.ne.s32.totalorder %s6710_s25, %s6218_s27  ;;  %s6223_s10 = scalar_lea.hbm %s7438_s5, 3072 }
  0xc8   : > { %p6224_p11 = scmp.lt.u32.totalorder %s6710_s25, %s7438_s5  ;;  %p6225_p3 = scmp.lt.u32.totalorder %s6223_s10, %s6218_s27 }
  0xc9   : > { %p6221_p8 = pnand %p6219_p9, %p7504_p10  ;;  %p6227_p2 = scmp.lt.u32.totalorder %s6218_s27, %s6710_s25 }
  0xca   : > { %p6226_p12 = por %p6225_p3, %p6224_p11 }
  0xcb   : > { %p6222_p1 = pneg %p6221_p8 }
  0xcc   : > { %p6228_p4 = por %p6227_p2, %p6226_p12 }
  0xce   : > { %p6229_p6 = pnand %p6228_p4, %p6222_p1 }
  0xd0   : > { %6232 = shalt.err (!%p6229_p6)
}
  0xd1   : > { %s6233_s21 = scalar_lea.vmem %s6712_s2, 1024  ;;  %s6373_s20 = smov [#allocation11]  }
  0xd2   : > { %p6234_p0 = scmp.ne.s32.totalorder %s6712_s2, %s6233_s21  ;;  %s6238_s19 = sshll.u32 %s6373_s20, 4  ;;  %s6239_s19 = int_to_ptr.vmem [resolvable:$false] %s6238_s19 }
  0xd3   : > { %s6240_s6 = scalar_lea.vmem %s6239_s19, 2048  ;;  %p6241_p5 = scmp.lt.s32.totalorder %s6712_s2, %s6239_s19 }
  0xd4   : > { %p6236_p7 = pnand %p6234_p0, %p7504_p10  ;;  %p6242_p9 = scmp.lt.s32.totalorder %s6240_s6, %s6233_s21 }
  0xd6   : > { %p6237_p13 = pneg %p6236_p7  ;;  %p6243_p8 = por %p6242_p9, %p6241_p5 }
  0xd8   : > { %p6244_p11 = pnand %p6243_p8, %p6237_p13 }
  0xda   : > { %6247 = shalt.err (!%p6244_p11)
}
  0xdb   : > { %p7505_p1 = scmp.ne.s32.totalorder %s7492_s30, 0  ;;  %s7506_s8 = scalar_lea.sflag [#allocation10], %s6503_s28 }
  0xdc   : > { %s6248_s24 = scalar_lea.hbm %s6623_s22, 16384  ;;  %s6253_s27 = scalar_lea.hbm %s7440_s7, 49152 }
  0xdd   : > { %5753 = dma.hbm_to_vmem [thread:$0]  (!%p7505_p1), %s6710_s25, 1024, %s6712_s2, %s7506_s8, %s7499_s17, %s7499_s17, %s7503_s14  }
  0xde   : > { %p6249_p3 = scmp.ne.s32.totalorder %s6623_s22, %s6248_s24  ;;  %p6254_p4 = scmp.lt.u32.totalorder %s6623_s22, %s7440_s7 }
  0xdf   : > { %p6255_p6 = scmp.lt.u32.totalorder %s6253_s27, %s6248_s24  ;;  %p6257_p7 = scmp.lt.u32.totalorder %s6248_s24, %s6623_s22 }
  0xe0   : > { %p6251_p12 = pnand %p6249_p3, %p7504_p10 }
  0xe1   : > { %p6256_p0 = por %p6255_p6, %p6254_p4 }
  0xe2   : > { %p6252_p2 = pneg %p6251_p12 }
  0xe3   : > { %p6258_p13 = por %p6257_p7, %p6256_p0 }
  0xe5   : > { %p6259_p5 = pnand %p6258_p13, %p6252_p2 }
  0xe7   : > { %6262 = shalt.err (!%p6259_p5)
}
  0xe8   : > { %s6263_s25 = scalar_lea.vmem %s6627_s0, 16384  ;;  %s6374_s2 = smov [#allocation14]  }
  0xe9   : > { %p6264_p9 = scmp.ne.s32.totalorder %s6627_s0, %s6263_s25  ;;  %s6268_s10 = sshll.u32 %s6374_s2, 4  ;;  %s6269_s10 = int_to_ptr.vmem [resolvable:$false] %s6268_s10 }
  0xea   : > { %s6270_s12 = scalar_lea.vmem %s6269_s10, 32768  ;;  %p6271_p3 = scmp.lt.s32.totalorder %s6627_s0, %s6269_s10 }
  0xeb   : > { %p6266_p8 = pnand %p6264_p9, %p7504_p10  ;;  %p6272_p12 = scmp.lt.s32.totalorder %s6270_s12, %s6263_s25 }
  0xed   : > { %p6267_p11 = pneg %p6266_p8  ;;  %p6273_p4 = por %p6272_p12, %p6271_p3 }
  0xef   : > { %p6274_p6 = pnand %p6273_p4, %p6267_p11 }
  0xf1   : > { %6277 = shalt.err (!%p6274_p6)
}
  0xf2   : > { %s7507_s15 = scalar_lea.sflag [#allocation13], %s6503_s28  ;;  %s7508_s21 = sshll.u32 %s6358_s16, 8 }
  0xf3   : > { %5759 = dma.hbm_to_vmem [thread:$0]  (!%p7505_p1), %s6623_s22, 16384, %s6627_s0, %s7507_s15, %s7499_s17, %s7499_s17, %s7503_s14  }
  0xf4   : > { %s6771_s6 = scalar_lea.hbm %s7442_s9, %s7508_s21  ;;  %s7509_s8 = sshll.u32 %s6506_s29, 4 }
  0xf5   : > { %s459_s24 = scalar_lea.vmem [#allocation17], %s7509_s8  ;;  %s6278_s13 = scalar_lea.hbm %s6771_s6, 256 }
  0xf6   : > { %s467_s11 = sshll.u32 %s459_s24, 4  ;;  %p6279_p2 = scmp.ne.s32.totalorder %s6771_s6, %s6278_s13  ;;  %s468_s11 = int_to_ptr.vmem [resolvable:$true] %s467_s11 }
  0xf7   : > { %s6283_s22 = scalar_lea.hbm %s7442_s9, 768  ;;  %p6284_p13 = scmp.lt.u32.totalorder %s6771_s6, %s7442_s9 }
  0xf8   : > { %p6281_p0 = pnand %p6279_p2, %p7504_p10  ;;  %p6285_p5 = scmp.lt.u32.totalorder %s6283_s22, %s6278_s13 }
  0xf9   : > { %p6287_p8 = scmp.lt.u32.totalorder %s6278_s13, %s6771_s6 }
  0xfa   : > { %p6282_p7 = pneg %p6281_p0  ;;  %p6286_p9 = por %p6285_p5, %p6284_p13 }
  0xfc   : > { %p6288_p11 = por %p6287_p8, %p6286_p9 }
  0xfe   : > { %p6289_p3 = pnand %p6288_p11, %p6282_p7 }
 0x100   : > { %6292 = shalt.err (!%p6289_p3)
}
 0x101   : > { %s6293_s29 = scalar_lea.vmem %s468_s11, 256  ;;  %s6375_s27 = smov [#allocation17]  }
 0x102   : > { %p6294_p12 = scmp.ne.s32.totalorder %s468_s11, %s6293_s29  ;;  %s6298_s18 = sshll.u32 %s6375_s27, 4  ;;  %s6299_s18 = int_to_ptr.vmem [resolvable:$false] %s6298_s18 }
 0x103   : > { %s6300_s4 = scalar_lea.vmem %s6299_s18, 512  ;;  %p6301_p2 = scmp.lt.s32.totalorder %s468_s11, %s6299_s18 }
 0x104   : > { %p6296_p4 = pnand %p6294_p12, %p7504_p10  ;;  %p6302_p0 = scmp.lt.s32.totalorder %s6300_s4, %s6293_s29 }
 0x106   : > { %p6297_p6 = pneg %p6296_p4  ;;  %p6303_p1 = por %p6302_p0, %p6301_p2 }
 0x108   : > { %p6304_p5 = pnand %p6303_p1, %p6297_p6 }
 0x10a   : > { %6307 = shalt.err (!%p6304_p5)
}
 0x10b   : > { %p7510_p13 = scmp.ne.s32.totalorder %s7492_s30, 0  ;;  %s7511_s25 = sld [smem:[#allocation29_spill]] }
 0x10d   : > { %5765 = dma.hbm_to_vmem [thread:$0]  (!%p7510_p13), %s6771_s6, 256, %s468_s11, %s435_s23  }
 0x111   : > { %p7512_p7 = scmp.ne.s32.totalorder %s7511_s25, 0 }
 0x112   : > { %s7513_s26 = sld [smem:[#allocation25_spill]] (!%p7512_p7) }
 0x113   : > { %476 = sbr.rel (%p7512_p7) target bundleno = 4354 (0x1102), region = 60 }
 0x118   : > { %p7514_p10 = scmp.eq.s32.totalorder (!%p7512_p7), %s7513_s26, 0 }
 0x11a   : > { %6325 = dma.done.wait (%p7514_p10), [#allocation5], 128   ;;  %p7515_p9 = pmov %p7514_p10 }
 0x11c   : > { %6327 = vsyncadd (%p7515_p9), [#allocation5], 4294967168  ;;  %p7516_p8 = pmov %p7515_p9 }
 0x11e   : > { %6329 = dma.done.wait (%p7516_p8), [#allocation7], 1152   ;;  %p7517_p1 = pmov %p7516_p8 }
 0x11f   : > { %s7518_s30 = sld [smem:[#allocation23_spill]]  ;;  %s7519_s28 = sld [smem:[#allocation28_spill]] }
 0x120   : > { %6331 = vsyncadd (%p7517_p1), [#allocation7], 4294966144  ;;  %s490_s2 = sand.u32 1, %s7513_s26  }
 0x121   : > { %s491_s12 = scalar_lea.sflag [#allocation10], %s490_s2 }
 0x125   : > { %s492_s23 = sand.u32 1, %s7518_s30   ;;  %p7520_p11 = scmp.ne.s32.totalorder %s7519_s28, 0 }
 0x126   : > { %s5712_s10 = smul.u32 192, %s492_s23 }
 0x128   : > { %s6806_s15 = scalar_lea.vmem [#allocation9], %s5712_s10 }
 0x129   : > { %6333 = dma.done.wait (%p7520_p11), %s491_s12, 4096  }
 0x12a   : > { %6335 = vsyncadd (%p7520_p11), %s491_s12, 4294963200  ;;  %s4972_s21 = sshll.u32 %s492_s23, 6  ;;  %s4973_s20 = sshll.u32 %s492_s23, 10 }
 0x12b   : > { %s6812_s19 = scalar_lea.vmem [#allocation11], %s4972_s21  ;;  %s509_s6 = scalar_lea.sflag [#allocation13], %s490_s2 }
 0x12c   : > { %s6814_s8 = scalar_lea.vmem [#allocation12], %s4973_s20 }
 0x12d   : > { %6337 = dma.done.wait (%p7520_p11), %s509_s6, 32768  }
 0x12e   : > { %6339 = vsyncadd (%p7520_p11), %s509_s6, 4294934528  ;;  %s4975_s24 = sshll.u32 %s492_s23, 4  ;;  %s6820_s11 = scalar_lea.vmem [#allocation14], %s4973_s20 }
 0x12f   : > { %s527_s13 = scalar_lea.sflag [#allocation16], %s490_s2  ;;  %s6822_s17 = scalar_lea.vmem [#allocation15], %s4975_s24 }
 0x130   : > { %6341 = dma.done.wait (%p7520_p11), %s527_s13, 512  }
 0x131   : > { %6343 = vsyncadd (%p7520_p11), %s527_s13, 4294966784  ;;  %s6828_s16 = scalar_lea.vmem [#allocation17], %s4975_s24  ;;  %p7521_p3 = scmp.ne.s32.totalorder %s7513_s26, 0 }
 0x132   : > { %v5825_v0 = vld [vmem:[#allocation4] sm:$0xff] (!%p7521_p3)   ;;  %v6376_v1 = vmov (!%p7521_p3), 0.0   ;;  %s7522_s14 = sld [smem:[#allocation30_spill]] (!%p7521_p3)  ;;  %vm6377_vm0 = vmmov (!%p7521_p3), 0   ;;  %vm618_vm1 = vcmask (!%p7521_p3), 130048  }
 0x133   : > { %601 = sbr.rel (%p7521_p3) target bundleno = 533 (0x215), region = 100  ;;  %5548 = vmatprep.subr.bf16.mxu0 (!%p7521_p3), %v6376_v1  ;;  %5550 = vmatprep.mubr.msk.bf16.mxu0 (!%p7521_p3), %vm6377_vm0, %v6376_v1  ;;  %v4978_v5 = vld [vmem:[#allocation8] ss:$0 sm:$0xff] (!%p7521_p3) }
 0x134   : > { %5549 = vmatpush3.bf16.msra.mxu0 (!%p7521_p3), %v5825_v0 }
 0x138   : > { %s7523_s29 = smov (!%p7521_p3), %s7522_s14  ;;  %v602_v2 = vld [vmem:[%s7522_s14] sm:$0xff] (!%p7521_p3) }
 0x139   : > { %v603_v3 = vld [vmem:[%s7523_s29 + $0x8] sm:$0xff] (!%p7521_p3) }
 0x13a   : > { %v606_v4 = vpack.c.bf16 %v603_v3, %v602_v2 }
 0x13c   : > { %5551 = vmatmul.mubr.msk.bf16.vlgmr.msra.gmra.mrb[0].mxu0 %vm618_vm1, %v606_v4 }
 0x20f   : > { %v656_v6 = vpop.f32.mrb[0].mxu0 }
 0x210   : > { %v657_v7 = vadd.f32 %v4978_v5, %v656_v6  ;;  %v5552_v8 = vpop.f32.mrb[1].mxu0 }
 0x211   : > { %v659_v9 = vpop.f32.mrb[2].mxu0 }
 0x212   : > { %663 = vst [vmem:[#allocation2] sm:$0xff] %v657_v7  ;;  %v660_v10 = vadd.f32 %v4978_v5, %v659_v9  ;;  %v5553_v11 = vpop.f32.mrb[3].mxu0 }
 0x214   : > { %664 = vst [vmem:[#allocation2 + $0x8] sm:$0xff] %v660_v10 }
 0x215 PF: > { %v5826_v12 = vld [vmem:[%s6806_s15 + $0x4] ss:$12 sps:$4 sm:$0xff]   ;;  %v5828_v13 = vld [vmem:[%s6806_s15] ss:$12 sps:$4 sm:$0xff]   ;;  %v6378_v14 = vmov 0   ;;  %v6379_v15 = vmov 0.0  }
 0x216   : > { %860 = vmatprep.mubr.bf16.mxu0 %v6378_v14  ;;  %5554 = vmatprep.subr.bf16.mxu1 %v6379_v15  ;;  %v5829_v16 = vld [vmem:[%s6806_s15 + $0x1c] ss:$12 sps:$4 sm:$0xff]   ;;  %v5831_v17 = vld [vmem:[%s6806_s15 + $0x18] ss:$12 sps:$4 sm:$0xff]   ;;  %v5832_v18 = vld [vmem:[%s6806_s15 + $0x34] ss:$12 sps:$4 sm:$0xff]  }
 0x217   : > { %828 = vmatprep.subr.bf16.mxu0 %v5826_v12  ;;  %v5834_v19 = vld [vmem:[%s6806_s15 + $0x30] ss:$12 sps:$4 sm:$0xff]   ;;  %v5835_v20 = vld [vmem:[%s6806_s15 + $0x4c] ss:$12 sps:$4 sm:$0xff]   ;;  %v5837_v21 = vld [vmem:[%s6806_s15 + $0x48] ss:$12 sps:$4 sm:$0xff]  }
 0x218   : > { %829 = vmatpush1.bf16.msra.mxu0 %v5828_v13  ;;  %v5838_v22 = vld [vmem:[%s6806_s15 + $0x64] ss:$12 sps:$4 sm:$0xff]   ;;  %v5850_v23 = vld [vmem:[%s6806_s15 + $0x8] ss:$12 sps:$4 sm:$0xff]   ;;  %v5851_v24 = vld [vmem:[%s6806_s15 + $0x20] ss:$12 sps:$4 sm:$0xff]  }
 0x219   : > { %830 = vmatprep.subr.bf16.mxu0 %v5829_v16  ;;  %5555 = vmatpush3.bf16.msra.mxu1 %v5850_v23  ;;  %v5840_v25 = vld [vmem:[%s6806_s15 + $0x60] ss:$12 sps:$4 sm:$0xff]   ;;  %v5841_v26 = vld [vmem:[%s6806_s15 + $0x7c] ss:$12 sps:$4 sm:$0xff]   ;;  %v5843_v27 = vld [vmem:[%s6806_s15 + $0x78] ss:$12 sps:$4 sm:$0xff]  }
 0x21a   : > { %5556 = vmatprep.subr.bf16.mxu1 %v6379_v15  ;;  %v5844_v28 = vld [vmem:[%s6806_s15 + $0x94] ss:$12 sps:$4 sm:$0xff]   ;;  %v5852_v29 = vld [vmem:[%s6806_s15 + $0x38] ss:$12 sps:$4 sm:$0xff]   ;;  %v5853_v30 = vld [vmem:[%s6806_s15 + $0x50] ss:$12 sps:$4 sm:$0xff]  }
 0x21b   : > { %v5846_v31 = vld [vmem:[%s6806_s15 + $0x90] ss:$12 sps:$4 sm:$0xff]   ;;  %v5847_v32 = vld [vmem:[%s6806_s15 + $0xac] ss:$12 sps:$4 sm:$0xff]   ;;  %v5854_v33 = vld [vmem:[%s6806_s15 + $0x68] ss:$12 sps:$4 sm:$0xff]  }
 0x21c   : > { %831 = vmatpush1.bf16.msra.mxu0 %v5831_v17  ;;  %v5849_v34 = vld [vmem:[%s6806_s15 + $0xa8] ss:$12 sps:$4 sm:$0xff]   ;;  %v666_v36 = vld [vmem:[#allocation2 + $0x8] sm:$0xff]  ;;  %v5855_v37 = vld [vmem:[%s6806_s15 + $0x80] ss:$12 sps:$4 sm:$0xff]   ;;  %vm6380_vm2 = vmmov 0  }
 0x21d   : > { %832 = vmatprep.subr.bf16.mxu0 %v5832_v18  ;;  %5557 = vmatpush3.bf16.msra.mxu1 %v5851_v24  ;;  %v665_v35 = vld [vmem:[#allocation2] sm:$0xff]  ;;  %v5856_v39 = vld [vmem:[%s6806_s15 + $0x98] ss:$12 sps:$4 sm:$0xff]   ;;  %vm936_vm3 = vcmask 261120   ;;  %s6381_s4 = smov 96   ;;  %s6382_s25 = smov 64  }
 0x21e   : > { %5558 = vmatprep.subr.bf16.mxu1 %v6379_v15  ;;  %v699_v38 = vpack.c.bf16 %v666_v36, %v665_v35  ;;  %v5857_v40 = vld [vmem:[%s6806_s15 + $0xb0] ss:$12 sps:$4 sm:$0xff]   ;;  %5570 = vmatprep.mubr.msk.bf16.mxu1 %vm6380_vm2, %v6379_v15  ;;  %s6383_s26 = smov 32   ;;  %vm999_vm4 = vcmask 1043456   ;;  %vm983_vm5 = vcmask 64512   ;;  %vm1161_vm6 = vcmask 523520  }
 0x21f   : > { %v5005_v42 = vld [vmem:[%s6822_s17] ss:$0 sm:$0xff]  ;;  %v5006_v44 = vld [vmem:[%s6822_s17 + $0x1] ss:$0 sm:$0xff]  ;;  %v5007_v56 = vld [vmem:[%s6822_s17 + $0x2] ss:$0 sm:$0xff] }
 0x220   : > { %833 = vmatpush1.bf16.msra.mxu0 %v5834_v19  ;;  %vm1277_vm7 = vcmask 785920   ;;  %vm1393_vm8 = vcmask 1048320   ;;  %s7524_s30 = sld [smem:[#allocation25_spill]] }
 0x221   : > { %834 = vmatprep.subr.bf16.mxu0 %v5835_v20  ;;  %5559 = vmatpush3.bf16.msra.mxu1 %v5852_v29 }
 0x222   : > { %5560 = vmatprep.subr.bf16.mxu1 %v6379_v15 }
 0x224   : > { %835 = vmatpush1.bf16.msra.mxu0 %v5837_v21 }
 0x225   : > { %836 = vmatprep.subr.bf16.mxu0 %v5838_v22  ;;  %5561 = vmatpush3.bf16.msra.mxu1 %v5853_v30 }
 0x226   : > { %5562 = vmatprep.subr.bf16.mxu1 %v6379_v15  ;;  %p5294_p12 = scmp.ne.s32.totalorder %s7524_s30, 2 }
 0x227   : > { %vm6385_vm9 = vmmov (!%p5294_p12), 0   ;;  %s7525_s23 = sld [smem:[#allocation35_spill]] (!%p5294_p12) }
 0x228   : > { %837 = vmatpush1.bf16.msra.mxu0 %v5840_v25 }
 0x229   : > { %838 = vmatprep.subr.bf16.mxu0 %v5841_v26  ;;  %5563 = vmatpush3.bf16.msra.mxu1 %v5854_v33 }
 0x22a   : > { %5564 = vmatprep.subr.bf16.mxu1 %v6379_v15 }
 0x22c   : > { %839 = vmatpush1.bf16.msra.mxu0 %v5843_v27 }
 0x22d   : > { %840 = vmatprep.subr.bf16.mxu0 %v5844_v28  ;;  %5565 = vmatpush3.bf16.msra.mxu1 %v5855_v37 }
 0x22e   : > { %5566 = vmatprep.subr.bf16.mxu1 %v6379_v15 }
 0x230   : > { %841 = vmatpush1.bf16.msra.mxu0 %v5846_v31 }
 0x231   : > { %842 = vmatprep.subr.bf16.mxu0 %v5847_v32  ;;  %5567 = vmatpush3.bf16.msra.mxu1 %v5856_v39 }
 0x232   : > { %5568 = vmatprep.subr.bf16.mxu1 %v6379_v15 }
 0x234   : > { %843 = vmatpush1.bf16.msra.mxu0 %v5849_v34 }
 0x235   : > { %5598 = vmatprep.subr.bf16.mxu0 %v6379_v15  ;;  %5569 = vmatpush3.bf16.msra.mxu1 %v5857_v40 }
 0x236   : > { %5574 = vmatprep.subr.bf16.mxu1 %v6379_v15 }
 0x237   : > { %861 = vmatmul.mubr.bf16.vlgmr.msra.gmra.mrb[0].mxu0 %v699_v38 }
 0x238   : > { %5600 = vmatprep.mubr.msk.bf16.mxu0 %vm6380_vm2, %v6379_v15  ;;  %5571 = vmatmul.mubr.bf16.vlgmr.msra.gmra.mrb[0].mxu1 %v699_v38 }
 0x239   : > { %5576 = vmatprep.mubr.msk.bf16.mxu1 %vm6380_vm2, %v6379_v15 }
 0x30a   : > { %v862_v41 = vpop.f32.mrb[0].mxu0 }
 0x30b   : > { %v864_v43 = vpop.f32.mrb[1].mxu0  ;;  %v917_v46 = vadd.f32 %v5005_v42, %v862_v41  ;;  %v905_v57 = vpop.f32.mrb[0].mxu1 }
 0x30c   : > { %v866_v45 = vpop.f32.mrb[2].mxu0  ;;  %v925_v49 = vadd.f32 %v5006_v44, %v864_v43  ;;  %v933_v58 = vadd.f32 %v5007_v56, %v905_v57  ;;  %v5572_v59 = vpop.f32.mrb[1].mxu1 }
 0x30d   : > { %v918_v47 = vadd.f32 %v5005_v42, %v866_v45  ;;  %v868_v48 = vpop.f32.mrb[3].mxu0  ;;  %v908_v60 = vpop.f32.mrb[2].mxu1 }
 0x30e   : > { %v926_v50 = vadd.f32 %v5006_v44, %v868_v48  ;;  %v934_v61 = vadd.f32 %v5007_v56, %v908_v60  ;;  %v5573_v62 = vpop.f32.mrb[3].mxu1 }
 0x30f   : > { %v919_v51 = vpack.c.bf16 %v918_v47, %v917_v46 }
 0x310   : > { %v927_v52 = vpack.c.bf16 %v926_v50, %v925_v49  ;;  %v6899_v63 = vpack.c.bf16 %v934_v61, %v933_v58 }
 0x311   : > { %v6892_v55 = vrot.slane %v919_v51, 4 }
 0x312   : > { %1048 = vrot.lane.b32.xlu1 %v927_v52, %s6381_s4  ;;  %v941_v53 = vsel %vm936_vm3, %v927_v52, 0  ;;  %v1396_v54 = vrot.slane %v927_v52, 4  ;;  %v1001_v0 = vsel %vm999_vm4, %v6899_v63, 0 }
 0x313   : > { %5575 = vmatpush3.bf16.xpose.msra.mxu1 %v941_v53 }
 0x314   : > { %5580 = vmatprep.subr.bf16.mxu1 %v6379_v15  ;;  %v1401_v26 = vsel %vm936_vm3, %v1396_v54, 0 }
 0x316   : > { %1045 = vrot.lane.b32.xlu1 %v919_v51, %s6381_s4 }
 0x31a   : > { %1163 = vrot.lane.b32.xlu1 %v919_v51, %s6382_s25  ;;  %5577 = vmatmul.mubr.msk.bf16.vlgmr.msra.gmra.mrb[4].mxu1 %vm936_vm3, %v919_v51 }
 0x31b   : > { %5582 = vmatprep.mubr.msk.bf16.mxu1 %vm6380_vm2, %v6379_v15  ;;  %5581 = vmatpush3.bf16.msra.mxu1 %v1001_v0 }
 0x31c   : > { %5586 = vmatprep.subr.bf16.mxu1 %v6379_v15 }
 0x31e   : > { %1281 = vrot.lane.b32.xlu1 %v927_v52, %s6383_s26 }
 0x322   : > { %1279 = vrot.lane.b32.xlu1 %v919_v51, %s6383_s26 }
 0x326   : > { %1505 = vrot.lane.b32.xlu1 %v1396_v54, %s6381_s4 }
 0x32a   : > { %1503 = vrot.lane.b32.xlu1 %v6892_v55, %s6381_s4 }
 0x32e   : > { %1620 = vrot.lane.b32.xlu1 %v1396_v54, %s6382_s25 }
 0x332   : > { %1735 = vrot.lane.b32.xlu1 %v1396_v54, %s6383_s26 }
 0x384   : > { %v1049_v11 = vpop.permute.xlu1 %1048 }
 0x385   : > { %v1054_v24 = vsel %vm936_vm3, %v1049_v11, 0 }
 0x388   : > { %v1046_v12 = vpop.permute.xlu1 %1045 }
 0x38c   : > { %v1164_v16 = vpop.permute.xlu1 %1163 }
 0x390   : > { %v1282_v19 = vpop.permute.xlu1 %1281 }
 0x391   : > { %v1287_v22 = vsel %vm936_vm3, %v1282_v19, 0 }
 0x394   : > { %v1280_v25 = vpop.permute.xlu1 %1279 }
 0x398   : > { %v1506_v27 = vpop.permute.xlu1 %1505 }
 0x399   : > { %v1511_v29 = vsel %vm936_vm3, %v1506_v27, 0 }
 0x39c   : > { %v1504_v28 = vpop.permute.xlu1 %1503 }
 0x3a0   : > { %v1621_v30 = vpop.permute.xlu1 %1620 }
 0x3a1   : > { %v1626_v31 = vsel %vm936_vm3, %v1621_v30, 0 }
 0x3a4   : > { %v1736_v32 = vpop.permute.xlu1 %1735 }
 0x3a5   : > { %v1741_v34 = vsel %vm936_vm3, %v1736_v32, 0 }
 0x3ed   : > { %v977_v1 = vpop.f32.mrb[4].mxu1 }
 0x3ee   : > { %v5578_v2 = vpop.f32.mrb[5].mxu1  ;;  %v984_v3 = vsel %vm983_vm5, %v977_v1, -inf }
 0x3ef   : > { %985 = vmax.xlane.f32.xlu0 %v984_v3  ;;  %v980_v4 = vpop.f32.mrb[6].mxu1 }
 0x3f0   : > { %v5579_v5 = vpop.f32.mrb[7].mxu1 }
 0x47c   : > { %v986_v6 = vpop.xlane.xlu0 %985 }
 0x47d   : > { %v987_v7 = vsub.f32 %v977_v1, %v986_v6 }
 0x47f   : > { %v988_v8 = vmul.f32 1.442695, %v987_v7 }
 0x481   : > { %5994 = vpow2.f32 %v988_v8 }
 0x48b   : > { %v5995_v9 = vpop.eup %5994 }
 0x48c   : > { %v990_v10 = vsel %vm983_vm5, %v5995_v9, 0.0 }
 0x48d   : > { %991 = vadd.xlane.f32.xlu0 %v990_v10 }
 0x4a3   : > { %1165 = vrot.lane.b32.xlu0 %v927_v52, %s6382_s25 }
 0x4a7   : > { %1618 = vrot.lane.b32.xlu0 %v6892_v55, %s6382_s25 }
 0x4ab   : > { %1733 = vrot.lane.b32.xlu0 %v6892_v55, %s6383_s26 }
 0x51a   : > { %v992_v13 = vpop.xlane.xlu0 %991 }
 0x51b   : > { %5996 = vrcp.f32 %v992_v13 }
 0x51e   : > { %v1166_v17 = vpop.permute.xlu0 %1165 }
 0x51f   : > { %v1171_v18 = vsel %vm936_vm3, %v1166_v17, 0 }
 0x520   : > { %5599 = vmatpush3.bf16.xpose.msra.mxu0 %v1171_v18 }
 0x521   : > { %5610 = vmatprep.subr.bf16.mxu0 %v6379_v15 }
 0x522   : > { %v1619_v33 = vpop.permute.xlu0 %1618 }
 0x525   : > { %v5997_v20 = vpop.eup %5996 }
 0x526   : > { %v994_v21 = vmul.f32 %v5997_v20, %v5995_v9  ;;  %v1734_v35 = vpop.permute.xlu0 %1733 }
 0x527   : > { %5601 = vmatmul.mubr.msk.bf16.vlgmr.msra.gmra.mrb[4].mxu0 %vm936_vm3, %v1164_v16 }
 0x528   : > { %5611 = vmatpush3.bf16.xpose.msra.mxu0 %v1287_v22  ;;  %v995_v23 = vpack.c.bf16 %v994_v21, %v994_v21  ;;  %5612 = vmatprep.mubr.msk.bf16.mxu0 %vm6380_vm2, %v6379_v15 }
 0x529   : > { %5622 = vmatprep.subr.bf16.mxu0 %v6379_v15 }
 0x52a   : > { %5583 = vmatmul.mubr.msk.bf16.vlgmr.msra.gmra.mrb[8].mxu1 %vm983_vm5, %v995_v23 }
 0x52b   : > { %5587 = vmatpush3.bf16.xpose.msra.mxu1 %v1054_v24  ;;  %5588 = vmatprep.mubr.msk.bf16.mxu1 %vm6380_vm2, %v6379_v15 }
 0x52c   : > { %5592 = vmatprep.subr.bf16.mxu1 %v6379_v15 }
 0x52f   : > { %5613 = vmatmul.mubr.msk.bf16.vlgmr.msra.gmra.mrb[8].mxu0 %vm936_vm3, %v1280_v25 }
 0x530   : > { %5623 = vmatpush3.bf16.xpose.msra.mxu0 %v1401_v26  ;;  %5624 = vmatprep.mubr.msk.bf16.mxu0 %vm6380_vm2, %v6379_v15 }
 0x531   : > { %5634 = vmatprep.subr.bf16.mxu0 %v6379_v15 }
 0x532   : > { %5589 = vmatmul.mubr.msk.bf16.vlgmr.msra.gmra.mrb[12].mxu1 %vm936_vm3, %v1046_v12 }
 0x533   : > { %5594 = vmatprep.mubr.msk.bf16.mxu1 %vm6380_vm2, %v6379_v15 }
 0x537   : > { %5625 = vmatmul.mubr.msk.bf16.vlgmr.msra.gmra.mrb[12].mxu0 %vm936_vm3, %v6892_v55 }
 0x538   : > { %5635 = vmatpush3.bf16.xpose.msra.mxu0 %v1511_v29  ;;  %5636 = vmatprep.mubr.msk.bf16.mxu0 %vm6380_vm2, %v6379_v15 }
 0x539   : > { %5646 = vmatprep.subr.bf16.mxu0 %v6379_v15 }
 0x53f   : > { %5637 = vmatmul.mubr.msk.bf16.vlgmr.msra.gmra.mrb[16].mxu0 %vm936_vm3, %v1504_v28 }
 0x540   : > { %5647 = vmatpush3.bf16.xpose.msra.mxu0 %v1626_v31  ;;  %5648 = vmatprep.mubr.msk.bf16.mxu0 %vm6380_vm2, %v6379_v15 }
 0x541   : > { %5658 = vmatprep.subr.bf16.mxu0 %v6379_v15 }
 0x547   : > { %5649 = vmatmul.mubr.msk.bf16.vlgmr.msra.gmra.mrb[20].mxu0 %vm936_vm3, %v1619_v33 }
 0x548   : > { %5659 = vmatpush3.bf16.xpose.msra.mxu0 %v1741_v34  ;;  %5660 = vmatprep.mubr.msk.bf16.mxu0 %vm6380_vm2, %v6379_v15 }
 0x549   : > { %5670 = vmatprep.subr.bf16.mxu0 %v6379_v15 }
 0x54f   : > { %5661 = vmatmul.mubr.msk.bf16.vlgmr.msra.gmra.mrb[24].mxu0 %vm936_vm3, %v1734_v35 }
 0x550   : > { %5686 = vmatprep.mubr.msk.bf16.mxu0 %vm6380_vm2, %v6379_v15 }
 0x5fa   : > { %v1207_v36 = vpop.f32.mrb[4].mxu0 }
 0x5fb   : > { %v5602_v37 = vpop.f32.mrb[5].mxu0  ;;  %v1213_v38 = vsel %vm983_vm5, %v1207_v36, -inf }
 0x5fc   : > { %1214 = vmax.xlane.f32.xlu0 %v1213_v38  ;;  %v1210_v39 = vpop.f32.mrb[6].mxu0 }
 0x5fd   : > { %v1037_v40 = vpop.f32.mrb[8].mxu1  ;;  %v5603_v41 = vpop.f32.mrb[7].mxu0 }
 0x5fe   : > { %1043 = vst.msk [vmem:[#allocation3] sm:$0xff] %vm936_vm3, %v1037_v40  ;;  %v5584_v42 = vpop.f32.mrb[9].mxu1 }
 0x5ff   : > { %v1040_v43 = vpop.f32.mrb[10].mxu1 }
 0x600   : > { %v5585_v44 = vpop.f32.mrb[11].mxu1 }
 0x602   : > { %v1323_v45 = vpop.f32.mrb[8].mxu0 }
 0x603   : > { %v5614_v46 = vpop.f32.mrb[9].mxu0  ;;  %v1329_v47 = vsel %vm983_vm5, %v1323_v45, -inf }
 0x604   : > { %1330 = vmax.xlane.f32.xlu0 %v1329_v47  ;;  %v1326_v48 = vpop.f32.mrb[10].mxu0 }
 0x605   : > { %v1090_v49 = vpop.f32.mrb[12].mxu1  ;;  %v5615_v50 = vpop.f32.mrb[11].mxu0 }
 0x606   : > { %v5590_v51 = vpop.f32.mrb[13].mxu1  ;;  %v1096_v52 = vsel %vm983_vm5, %v1090_v49, -inf }
 0x607   : > { %1097 = vmax.xlane.f32.xlu1 %v1096_v52  ;;  %v1093_v53 = vpop.f32.mrb[14].mxu1 }
 0x608   : > { %v5591_v54 = vpop.f32.mrb[15].mxu1 }
 0x60a   : > { %v1437_v55 = vpop.f32.mrb[12].mxu0 }
 0x60b   : > { %v5626_v56 = vpop.f32.mrb[13].mxu0  ;;  %v1443_v57 = vsel %vm983_vm5, %v1437_v55, -inf }
 0x60c   : > { %v1440_v58 = vpop.f32.mrb[14].mxu0  ;;  %1444 = vmax.xlane.f32.xlu1 %v1443_v57 }
 0x60d   : > { %v5627_v59 = vpop.f32.mrb[15].mxu0 }
 0x612   : > { %v1547_v60 = vpop.f32.mrb[16].mxu0 }
 0x613   : > { %v5638_v61 = vpop.f32.mrb[17].mxu0  ;;  %v1553_v62 = vsel %vm983_vm5, %v1547_v60, -inf }
 0x614   : > { %1554 = vmax.xlane.f32.xlu0 %v1553_v62  ;;  %v1550_v0 = vpop.f32.mrb[18].mxu0 }
 0x615   : > { %v5639_v1 = vpop.f32.mrb[19].mxu0 }
 0x61a   : > { %v1662_v2 = vpop.f32.mrb[20].mxu0 }
 0x61b   : > { %v5650_v3 = vpop.f32.mrb[21].mxu0  ;;  %v1668_v4 = vsel %vm983_vm5, %v1662_v2, -inf }
 0x61c   : > { %v1665_v5 = vpop.f32.mrb[22].mxu0  ;;  %1669 = vmax.xlane.f32.xlu1 %v1668_v4 }
 0x61d   : > { %v5651_v6 = vpop.f32.mrb[23].mxu0 }
 0x622   : > { %v1777_v7 = vpop.f32.mrb[24].mxu0 }
 0x623   : > { %v5662_v8 = vpop.f32.mrb[25].mxu0  ;;  %v1783_v9 = vsel %vm983_vm5, %v1777_v7, -inf }
 0x624   : > { %1784 = vmax.xlane.f32.xlu0 %v1783_v9  ;;  %v1780_v10 = vpop.f32.mrb[26].mxu0 }
 0x625   : > { %v5663_v11 = vpop.f32.mrb[27].mxu0 }
 0x689   : > { %v1215_v12 = vpop.xlane.xlu0 %1214 }
 0x68a   : > { %v1216_v13 = vsub.f32 %v1207_v36, %v1215_v12 }
 0x68c   : > { %v1217_v16 = vmul.f32 1.442695, %v1216_v13 }
 0x68e   : > { %5998 = vpow2.f32 %v1217_v16 }
 0x691   : > { %v1331_v17 = vpop.xlane.xlu0 %1330 }
 0x692   : > { %v1332_v18 = vsub.f32 %v1323_v45, %v1331_v17 }
 0x694   : > { %v1333_v19 = vmul.f32 1.442695, %v1332_v18  ;;  %v1098_v20 = vpop.xlane.xlu1 %1097 }
 0x695   : > { %v1099_v21 = vsub.f32 %v1090_v49, %v1098_v20  ;;  %v1455_v49 = vrot.slane %v6899_v63, 4 }
 0x696   : > { %6000 = vpow2.f32 %v1333_v19 }
 0x697   : > { %v1100_v22 = vmul.f32 1.442695, %v1099_v21 }
 0x698   : > { %v6958_v23 = vpop.eup %5998 }
 0x699   : > { %6002 = vpow2.f32 %v1100_v22  ;;  %v1445_v24 = vpop.xlane.xlu1 %1444  ;;  %v1219_v25 = vsel %vm983_vm5, %v6958_v23, 0.0 }
 0x69a   : > { %v1446_v26 = vsub.f32 %v1437_v55, %v1445_v24  ;;  %1220 = vadd.xlane.f32.xlu0 %v1219_v25 }
 0x69c   : > { %v1447_v27 = vmul.f32 1.442695, %v1446_v26 }
 0x69e   : > { %6004 = vpow2.f32 %v1447_v27 }
 0x6a0   : > { %v6962_v28 = vpop.eup %6000 }
 0x6a1   : > { %v1555_v29 = vpop.xlane.xlu0 %1554  ;;  %v1335_v30 = vsel %vm983_vm5, %v6962_v28, 0.0 }
 0x6a2   : > { %v1556_v31 = vsub.f32 %v1547_v60, %v1555_v29  ;;  %1336 = vadd.xlane.f32.xlu1 %v1335_v30 }
 0x6a3   : > { %v6003_v32 = vpop.eup %6002 }
 0x6a4   : > { %v1557_v33 = vmul.f32 1.442695, %v1556_v31  ;;  %v1102_v34 = vsel %vm983_vm5, %v6003_v32, 0.0 }
 0x6a6   : > { %6006 = vpow2.f32 %v1557_v33  ;;  %1103 = vadd.xlane.f32.xlu1 %v1102_v34 }
 0x6a8   : > { %v6967_v35 = vpop.eup %6004 }
 0x6a9   : > { %v1449_v36 = vsel %vm983_vm5, %v6967_v35, 0.0  ;;  %v1670_v39 = vpop.xlane.xlu1 %1669 }
 0x6aa   : > { %1450 = vadd.xlane.f32.xlu0 %v1449_v36  ;;  %v1671_v40 = vsub.f32 %v1662_v2, %v1670_v39 }
 0x6ac   : > { %v1672_v41 = vmul.f32 1.442695, %v1671_v40 }
 0x6ae   : > { %6008 = vpow2.f32 %v1672_v41 }
 0x6b0   : > { %v6971_v37 = vpop.eup %6006 }
 0x6b1   : > { %v1559_v38 = vsel %vm983_vm5, %v6971_v37, 0.0  ;;  %v1785_v42 = vpop.xlane.xlu0 %1784 }
 0x6b2   : > { %1560 = vadd.xlane.f32.xlu0 %v1559_v38  ;;  %v1786_v43 = vsub.f32 %v1777_v7, %v1785_v42  ;;  %v1460_v7 = vsel %vm999_vm4, %v1455_v49, 0 }
 0x6b4   : > { %v1787_v45 = vmul.f32 1.442695, %v1786_v43 }
 0x6b6   : > { %6010 = vpow2.f32 %v1787_v45  ;;  %v5858_v45 = vld [vmem:[%s6812_s19] sm:$0xff]  }
 0x6b7   : > { %1109 = vrot.lane.b32.xlu1 %v6899_v63, %s6381_s4  ;;  %5671 = vmatpush3.bf16.msra.mxu0 %v5858_v45 }
 0x6b8   : > { %v6981_v44 = vpop.eup %6008  ;;  %5672 = vmatprep.subr.bf16.mxu0 %v6379_v15 }
 0x6b9   : > { %v1674_v46 = vsel %vm983_vm5, %v6981_v44, 0.0 }
 0x6c0   : > { %v6985_v47 = vpop.eup %6010 }
 0x6c1   : > { %v1789_v48 = vsel %vm983_vm5, %v6985_v47, 0.0 }
 0x6c8   : > { %1225 = vrot.lane.b32.xlu0 %v6899_v63, %s6382_s25 }
 0x6cc   : > { %1341 = vrot.lane.b32.xlu0 %v6899_v63, %s6383_s26 }
 0x6db   : > { %1675 = vadd.xlane.f32.xlu1 %v1674_v46  ;;  %v5859_v46 = vld [vmem:[%s6812_s19 + $0x8] sm:$0xff]  }
 0x6dc   : > { %5673 = vmatpush3.bf16.msra.mxu0 %v5859_v46  ;;  %v2009_v46 = vld [vmem:[%s6814_s8 + $0x100] sm:$0xff] }
 0x6dd   : > { %5674 = vmatprep.subr.bf16.mxu0 %v6379_v15 }
 0x6eb   : > { %1790 = vadd.xlane.f32.xlu0 %v1789_v48  ;;  %v5861_v48 = vld [vmem:[%s6812_s19 + $0x18] sm:$0xff]  }
 0x6ec   : > { %1565 = vrot.lane.b32.xlu1 %v1455_v49, %s6381_s4 }
 0x6f0   : > { %1795 = vrot.lane.b32.xlu1 %v1455_v49, %s6383_s26 }
 0x701   : > { %1680 = vrot.lane.b32.xlu0 %v1455_v49, %s6382_s25 }
 0x727   : > { %v1221_v52 = vpop.xlane.xlu0 %1220 }
 0x72f   : > { %v1337_v50 = vpop.xlane.xlu1 %1336 }
 0x733   : > { %v1104_v51 = vpop.xlane.xlu1 %1103 }
 0x734   : > { %6012 = vrcp.f32 %v1104_v51 }
 0x735   : > { %6014 = vrcp.f32 %v1221_v52 }
 0x736   : > { %6016 = vrcp.f32 %v1337_v50 }
 0x737   : > { %v1110_v53 = vpop.permute.xlu1 %1109  ;;  %v1451_v55 = vpop.xlane.xlu0 %1450 }
 0x738   : > { %v1115_v54 = vsel %vm999_vm4, %v1110_v53, 0  ;;  %6018 = vrcp.f32 %v1451_v55  ;;  %v5862_v53 = vld [vmem:[%s6812_s19 + $0x20] sm:$0xff]   ;;  %v5864_v55 = vld [vmem:[%s6812_s19 + $0x30] sm:$0xff]  }
 0x739   : > { %5593 = vmatpush3.bf16.msra.mxu1 %v1115_v54  ;;  %v5863_v54 = vld [vmem:[%s6812_s19 + $0x28] sm:$0xff]  }
 0x73a   : > { %5604 = vmatprep.subr.bf16.mxu1 %v6379_v15 }
 0x73e   : > { %v6013_v63 = vpop.eup %6012 }
 0x73f   : > { %v1106_v56 = vmul.f32 %v6013_v63, %v6003_v32  ;;  %v1561_v57 = vpop.xlane.xlu0 %1560  ;;  %v6015_v59 = vpop.eup %6014  ;;  %v5865_v63 = vld [vmem:[%s6812_s19 + $0x38] sm:$0xff]  }
 0x740   : > { %v1223_v62 = vmul.f32 %v6015_v59, %v6958_v23  ;;  %v6017_v2 = vpop.eup %6016  ;;  %6020 = vrcp.f32 %v1561_v57 }
 0x741   : > { %v1107_v58 = vpack.c.bf16 %v1106_v56, %v1106_v56  ;;  %v1339_v4 = vmul.f32 %v6017_v2, %v6962_v28 }
 0x742   : > { %v1224_v1 = vpack.c.bf16 %v1223_v62, %v1223_v62  ;;  %v6019_v6 = vpop.eup %6018 }
 0x743   : > { %v1226_v60 = vpop.permute.xlu0 %1225  ;;  %5595 = vmatmul.mubr.msk.bf16.vlgmr.msra.gmra.mrb[16].mxu1 %vm983_vm5, %v1107_v58  ;;  %v1340_v5 = vpack.c.bf16 %v1339_v4, %v1339_v4  ;;  %v1453_v8 = vmul.f32 %v6019_v6, %v6967_v35 }
 0x744   : > { %v1231_v61 = vsel %vm999_vm4, %v1226_v60, 0  ;;  %5606 = vmatprep.mubr.msk.bf16.mxu1 %vm6380_vm2, %v6379_v15 }
 0x745   : > { %5605 = vmatpush3.bf16.msra.mxu1 %v1231_v61  ;;  %v1454_v9 = vpack.c.bf16 %v1453_v8, %v1453_v8 }
 0x746   : > { %5616 = vmatprep.subr.bf16.mxu1 %v6379_v15 }
 0x747   : > { %v1342_v0 = vpop.permute.xlu0 %1341 }
 0x748   : > { %v1347_v3 = vsel %vm999_vm4, %v1342_v0, 0 }
 0x74a   : > { %v6021_v10 = vpop.eup %6020 }
 0x74b   : > { %5607 = vmatmul.mubr.msk.bf16.vlgmr.msra.gmra.mrb[20].mxu1 %vm983_vm5, %v1224_v1  ;;  %v1563_v12 = vmul.f32 %v6021_v10, %v6971_v37 }
 0x74c   : > { %5617 = vmatpush3.bf16.msra.mxu1 %v1347_v3  ;;  %5618 = vmatprep.mubr.msk.bf16.mxu1 %vm6380_vm2, %v6379_v15 }
 0x74d   : > { %5628 = vmatprep.subr.bf16.mxu1 %v6379_v15  ;;  %v1564_v17 = vpack.c.bf16 %v1563_v12, %v1563_v12 }
 0x753   : > { %5619 = vmatmul.mubr.msk.bf16.vlgmr.msra.gmra.mrb[24].mxu1 %vm983_vm5, %v1340_v5 }
 0x754   : > { %5629 = vmatpush3.bf16.msra.mxu1 %v1460_v7  ;;  %5630 = vmatprep.mubr.msk.bf16.mxu1 %vm6380_vm2, %v6379_v15 }
 0x755   : > { %5640 = vmatprep.subr.bf16.mxu1 %v6379_v15 }
 0x75b   : > { %5631 = vmatmul.mubr.msk.bf16.vlgmr.msra.gmra.mrb[28].mxu1 %vm983_vm5, %v1454_v9  ;;  %v5024_v9 = vld [vmem:[%s6822_s17 + $0x3] ss:$0 sm:$0xff] }
 0x75c   : > { %5642 = vmatprep.mubr.msk.bf16.mxu1 %vm6380_vm2, %v6379_v15 }
 0x768   : > { %v1676_v11 = vpop.xlane.xlu1 %1675 }
 0x769   : > { %6022 = vrcp.f32 %v1676_v11 }
 0x76c   : > { %v1566_v13 = vpop.permute.xlu1 %1565 }
 0x76d   : > { %v1571_v16 = vsel %vm999_vm4, %v1566_v13, 0 }
 0x76e   : > { %5641 = vmatpush3.bf16.msra.mxu1 %v1571_v16 }
 0x76f   : > { %5652 = vmatprep.subr.bf16.mxu1 %v6379_v15 }
 0x770   : > { %v1796_v23 = vpop.permute.xlu1 %1795 }
 0x771   : > { %5643 = vmatmul.mubr.msk.bf16.vlgmr.msra.gmra.mrb[32].mxu1 %vm983_vm5, %v1564_v17  ;;  %v1801_v25 = vsel %vm999_vm4, %v1796_v23, 0  ;;  %v2003_v23 = vld [vmem:[%s6814_s8 + $0x40] sm:$0xff] }
 0x772   : > { %5654 = vmatprep.mubr.msk.bf16.mxu1 %vm6380_vm2, %v6379_v15 }
 0x773   : > { %v6023_v18 = vpop.eup %6022 }
 0x774   : > { %v1678_v20 = vmul.f32 %v6023_v18, %v6981_v44  ;;  %v6034_v18 = vld [vmem:[#allocation2] sm:$0xff] }
 0x776   : > { %v1679_v24 = vpack.c.bf16 %v1678_v20, %v1678_v20  ;;  %v6035_v20 = vld [vmem:[#allocation2 + $0x8] sm:$0xff] }
 0x778   : > { %v1791_v19 = vpop.xlane.xlu0 %1790 }
 0x779   : > { %6024 = vrcp.f32 %v1791_v19 }
 0x77c   : > { %v1681_v21 = vpop.permute.xlu0 %1680 }
 0x77d   : > { %v1686_v22 = vsel %vm999_vm4, %v1681_v21, 0 }
 0x77e   : > { %5653 = vmatpush3.bf16.msra.mxu1 %v1686_v22  ;;  %v2001_v22 = vld [vmem:[%s6814_s8] sm:$0xff] }
 0x77f   : > { %5664 = vmatprep.subr.bf16.mxu1 %v6379_v15 }
 0x781   : > { %5655 = vmatmul.mubr.msk.bf16.vlgmr.msra.gmra.mrb[36].mxu1 %vm983_vm5, %v1679_v24  ;;  %v2002_v24 = vld [vmem:[%s6814_s8 + $0x8] sm:$0xff] }
 0x782   : > { %5665 = vmatpush3.bf16.msra.mxu1 %v1801_v25  ;;  %5666 = vmatprep.mubr.msk.bf16.mxu1 %vm6380_vm2, %v6379_v15  ;;  %v5035_v25 = vcombine.low %v2001_v22, %v2003_v23 }
 0x783   : > { %v6025_v26 = vpop.eup %6024 }
 0x784   : > { %v1793_v27 = vmul.f32 %v6025_v26, %v6985_v47  ;;  %v5860_v47 = vld [vmem:[%s6812_s19 + $0x10] sm:$0xff]   ;;  %v5036_v26 = vcombine.high %v2001_v22, %v2003_v23  ;;  %v2029_v23 = vld [vmem:[%s6814_s8 + $0x380] sm:$0xff] }
 0x785   : > { %5675 = vmatpush3.bf16.msra.mxu0 %v5860_v47  ;;  %v2011_v47 = vld [vmem:[%s6814_s8 + $0x140] sm:$0xff] }
 0x786   : > { %v1794_v28 = vpack.c.bf16 %v1793_v27, %v1793_v27  ;;  %5676 = vmatprep.subr.bf16.mxu0 %v6379_v15  ;;  %v2004_v27 = vld [vmem:[%s6814_s8 + $0x48] sm:$0xff]  ;;  %2215 = vmatprep.subr.bf16.mxu1 %v5036_v26 }
 0x789   : > { %5667 = vmatmul.mubr.msk.bf16.vlgmr.msra.gmra.mrb[40].mxu1 %vm983_vm5, %v1794_v28  ;;  %5677 = vmatpush3.bf16.msra.mxu0 %v5861_v48  ;;  %v2005_v28 = vld [vmem:[%s6814_s8 + $0x80] sm:$0xff]  ;;  %v2010_v48 = vld [vmem:[%s6814_s8 + $0x108] sm:$0xff] }
 0x78a   : > { %2247 = vmatprep.mubr.bf16.mxu1 %v6378_v14  ;;  %5678 = vmatprep.subr.bf16.mxu0 %v6379_v15 }
 0x78b   : > { %2216 = vmatpush1.bf16.msra.mxu1 %v5035_v25  ;;  %v2030_v25 = vld [vmem:[%s6814_s8 + $0x388] sm:$0xff] }
 0x78d   : > { %5679 = vmatpush3.bf16.msra.mxu0 %v5862_v53 }
 0x78e   : > { %5680 = vmatprep.subr.bf16.mxu0 %v6379_v15 }
 0x791   : > { %5681 = vmatpush3.bf16.msra.mxu0 %v5863_v54  ;;  %v2013_v54 = vld [vmem:[%s6814_s8 + $0x180] sm:$0xff] }
 0x792   : > { %5682 = vmatprep.subr.bf16.mxu0 %v6379_v15 }
 0x795   : > { %5683 = vmatpush3.bf16.msra.mxu0 %v5864_v55  ;;  %v2015_v55 = vld [vmem:[%s6814_s8 + $0x1c0] sm:$0xff] }
 0x796   : > { %5684 = vmatprep.subr.bf16.mxu0 %v6379_v15 }
 0x799   : > { %5685 = vmatpush3.bf16.msra.mxu0 %v5865_v63  ;;  %v2014_v63 = vld [vmem:[%s6814_s8 + $0x188] sm:$0xff] }
 0x816   : > { %v1151_v29 = vpop.f32.mrb[16].mxu1 }
 0x817   : > { %1158 = vrot.lane.b32.xlu1 %v1151_v29, %s6383_s26  ;;  %v5596_v30 = vpop.f32.mrb[17].mxu1  ;;  %v2007_v29 = vld [vmem:[%s6814_s8 + $0xc0] sm:$0xff] }
 0x818   : > { %v1154_v31 = vpop.f32.mrb[18].mxu1  ;;  %v5037_v30 = vcombine.low %v2002_v24, %v2004_v27 }
 0x819   : > { %v5597_v32 = vpop.f32.mrb[19].mxu1  ;;  %v5038_v31 = vcombine.high %v2002_v24, %v2004_v27  ;;  %v2031_v24 = vld [vmem:[%s6814_s8 + $0x3c0] sm:$0xff]  ;;  %v2032_v27 = vld [vmem:[%s6814_s8 + $0x3c8] sm:$0xff] }
 0x81a   : > { %v5040_v32 = vcombine.high %v2005_v28, %v2007_v29  ;;  %v5064_v26 = vcombine.high %v2029_v23, %v2031_v24 }
 0x81b   : > { %2258 = vmatprep.subr.bf16.mxu0 %v5038_v31  ;;  %v2377_v31 = vld [vmem:[%s6814_s8 + $0x10] sm:$0xff] }
 0x81c   : > { %2217 = vmatprep.subr.bf16.mxu1 %v5040_v32  ;;  %v2379_v32 = vld [vmem:[%s6814_s8 + $0x50] sm:$0xff] }
 0x81e   : > { %v1267_v33 = vpop.f32.mrb[20].mxu1 }
 0x81f   : > { %1274 = vrot.lane.b32.xlu1 %v1267_v33, %s6382_s25  ;;  %v5608_v34 = vpop.f32.mrb[21].mxu1  ;;  %v2006_v33 = vld [vmem:[%s6814_s8 + $0x88] sm:$0xff] }
 0x820   : > { %v1270_v35 = vpop.f32.mrb[22].mxu1  ;;  %v2008_v34 = vld [vmem:[%s6814_s8 + $0xc8] sm:$0xff] }
 0x821   : > { %v5609_v36 = vpop.f32.mrb[23].mxu1  ;;  %v5042_v35 = vcombine.high %v2006_v33, %v2008_v34 }
 0x822   : > { %v5039_v36 = vcombine.low %v2005_v28, %v2007_v29  ;;  %v5063_v28 = vcombine.low %v2029_v23, %v2031_v24  ;;  %v5065_v29 = vcombine.low %v2030_v25, %v2032_v27  ;;  %v2397_v23 = vld [vmem:[%s6814_s8 + $0x290] sm:$0xff] }
 0x823   : > { %v2399_v24 = vld [vmem:[%s6814_s8 + $0x2d0] sm:$0xff] }
 0x824   : > { %2218 = vmatpush1.bf16.msra.mxu1 %v5039_v36  ;;  %v2380_v36 = vld [vmem:[%s6814_s8 + $0x58] sm:$0xff] }
 0x826   : > { %v1383_v37 = vpop.f32.mrb[24].mxu1 }
 0x827   : > { %v5620_v38 = vpop.f32.mrb[25].mxu1 }
 0x828   : > { %v1386_v39 = vpop.f32.mrb[26].mxu1 }
 0x829   : > { %v5621_v40 = vpop.f32.mrb[27].mxu1 }
 0x82e   : > { %v1496_v41 = vpop.f32.mrb[28].mxu1 }
 0x82f   : > { %1502 = vst.msk [vmem:[#allocation3 + $0x8] sm:$0xff] %vm936_vm3, %v1496_v41  ;;  %v5632_v42 = vpop.f32.mrb[29].mxu1 }
 0x830   : > { %v1499_v43 = vpop.f32.mrb[30].mxu1 }
 0x831   : > { %v5633_v44 = vpop.f32.mrb[31].mxu1 }
 0x844   : > { %v1607_v49 = vpop.f32.mrb[32].mxu1 }
 0x845   : > { %1614 = vrot.lane.b32.xlu1 %v1607_v49, %s6383_s26  ;;  %v5644_v50 = vpop.f32.mrb[33].mxu1  ;;  %v5044_v49 = vcombine.high %v2009_v46, %v2011_v47 }
 0x846   : > { %v1610_v51 = vpop.f32.mrb[34].mxu1  ;;  %v2012_v50 = vld [vmem:[%s6814_s8 + $0x148] sm:$0xff] }
 0x847   : > { %v5645_v52 = vpop.f32.mrb[35].mxu1  ;;  %v5043_v51 = vcombine.low %v2009_v46, %v2011_v47  ;;  %v5046_v53 = vcombine.high %v2010_v48, %v2012_v50  ;;  %2219 = vmatprep.subr.bf16.mxu1 %v5044_v49 }
 0x848   : > { %v5045_v52 = vcombine.low %v2010_v48, %v2012_v50  ;;  %v5033_v48 = vld [vmem:[%s6822_s17 + $0x5] ss:$0 sm:$0xff] }
 0x849   : > { %1390 = vrot.lane.b32.xlu1 %v1383_v37, %s6381_s4  ;;  %v5041_v37 = vcombine.low %v2006_v33, %v2008_v34  ;;  %2220 = vmatpush1.bf16.msra.mxu1 %v5043_v51  ;;  %v2378_v33 = vld [vmem:[%s6814_s8 + $0x18] sm:$0xff]  ;;  %v5067_v34 = vcombine.low %v2377_v31, %v2379_v32 }
 0x854   : > { %v1722_v56 = vpop.f32.mrb[36].mxu1 }
 0x855   : > { %1729 = vrot.lane.b32.xlu0 %v1722_v56, %s6382_s25  ;;  %v5656_v57 = vpop.f32.mrb[37].mxu1  ;;  %v5048_v56 = vcombine.high %v2013_v54, %v2015_v55 }
 0x856   : > { %v1725_v58 = vpop.f32.mrb[38].mxu1  ;;  %v2016_v57 = vld [vmem:[%s6814_s8 + $0x1c8] sm:$0xff] }
 0x857   : > { %v5657_v59 = vpop.f32.mrb[39].mxu1  ;;  %v5047_v58 = vcombine.low %v2013_v54, %v2015_v55  ;;  %2221 = vmatprep.subr.bf16.mxu1 %v5048_v56  ;;  %v2381_v55 = vld [vmem:[%s6814_s8 + $0x90] sm:$0xff]  ;;  %v2382_v56 = vld [vmem:[%s6814_s8 + $0x98] sm:$0xff] }
 0x858   : > { %v5049_v59 = vcombine.low %v2014_v63, %v2016_v57 }
 0x859   : > { %2222 = vmatpush1.bf16.msra.mxu1 %v5047_v58 }
 0x85c   : > { %v1837_v60 = vpop.f32.mrb[40].mxu1 }
 0x85d   : > { %1844 = vrot.lane.b32.xlu0 %v1837_v60, %s6381_s4  ;;  %v5668_v61 = vpop.f32.mrb[41].mxu1  ;;  %v5050_v60 = vcombine.high %v2014_v63, %v2016_v57  ;;  %v2383_v63 = vld [vmem:[%s6814_s8 + $0xd0] sm:$0xff]  ;;  %v2384_v57 = vld [vmem:[%s6814_s8 + $0xd8] sm:$0xff] }
 0x85e   : > { %v1840_v62 = vpop.f32.mrb[42].mxu1  ;;  %v2017_v61 = vld [vmem:[%s6814_s8 + $0x200] sm:$0xff] }
 0x85f   : > { %v5669_v0 = vpop.f32.mrb[43].mxu1  ;;  %v2019_v62 = vld [vmem:[%s6814_s8 + $0x240] sm:$0xff] }
 0x860   : > { %v2018_v0 = vld [vmem:[%s6814_s8 + $0x208] sm:$0xff] }
 0x889   : > { %v1159_v1 = vpop.permute.xlu1 %1158 }
 0x88a   : > { %1162 = vst.msk [vmem:[#allocation3] sm:$0xff] %vm1161_vm6, %v1159_v1  ;;  %v5052_v1 = vcombine.high %v2017_v61, %v2019_v62 }
 0x88c   : > { %2223 = vmatprep.subr.bf16.mxu1 %v5052_v1  ;;  %v2388_v1 = vld [vmem:[%s6814_s8 + $0x158] sm:$0xff] }
 0x891   : > { %v1275_v2 = vpop.permute.xlu1 %1274 }
 0x892   : > { %1278 = vst.msk [vmem:[#allocation3] sm:$0xff] %vm1277_vm7, %v1275_v2  ;;  %v2020_v2 = vld [vmem:[%s6814_s8 + $0x248] sm:$0xff] }
 0x8b7   : > { %v1615_v15 = vpop.permute.xlu1 %1614 }
 0x8b8   : > { %1617 = vst.msk [vmem:[#allocation3 + $0x8] sm:$0xff] %vm1161_vm6, %v1615_v15  ;;  %v5051_v15 = vcombine.low %v2017_v61, %v2019_v62  ;;  %v5074_v61 = vcombine.high %v2382_v56, %v2384_v57  ;;  %v2385_v62 = vld [vmem:[%s6814_s8 + $0x110] sm:$0xff] }
 0x8ba   : > { %2224 = vmatpush1.bf16.msra.mxu1 %v5051_v15  ;;  %v5073_v15 = vcombine.low %v2382_v56, %v2384_v57  ;;  %v5872_v56 = vld [vmem:[%s6820_s11 + $0x108] sm:$0xff]  }
 0x8bb   : > { %v1391_v3 = vpop.permute.xlu1 %1390  ;;  %v5873_v57 = vld [vmem:[%s6820_s11 + $0x188] sm:$0xff]  }
 0x8bc   : > { %1394 = vst.msk [vmem:[#allocation3] sm:$0xff] %vm1393_vm8, %v1391_v3  ;;  %v5053_v3 = vcombine.low %v2018_v0, %v2020_v2 }
 0x8c3   : > { %v1848_v6 = vld [vmem:[#allocation3] sm:$0xff] }
 0x8c7   : > { %v1730_v4 = vpop.permute.xlu0 %1729 }
 0x8c8   : > { %1732 = vst.msk [vmem:[#allocation3 + $0x8] sm:$0xff] %vm1277_vm7, %v1730_v4  ;;  %v5054_v4 = vcombine.high %v2018_v0, %v2020_v2  ;;  %v2386_v0 = vld [vmem:[%s6814_s8 + $0x118] sm:$0xff]  ;;  %v5071_v2 = vcombine.low %v2381_v55, %v2383_v63 }
 0x8cf   : > { %v1845_v5 = vpop.permute.xlu0 %1844 }
 0x8d0   : > { %1847 = vst.msk [vmem:[#allocation3 + $0x8] sm:$0xff] %vm1393_vm8, %v1845_v5  ;;  %v2021_v5 = vld [vmem:[%s6814_s8 + $0x280] sm:$0xff] }
 0x8d7   : > { %v1849_v7 = vld [vmem:[#allocation3 + $0x8] sm:$0xff] }
 0x8d8   : > { %v1866_v8 = vpack.c.bf16 %v1849_v7, %v1848_v6  ;;  %v2023_v6 = vld [vmem:[%s6814_s8 + $0x2c0] sm:$0xff]  ;;  %v2022_v7 = vld [vmem:[%s6814_s8 + $0x288] sm:$0xff] }
 0x8da   : > { %5687 = vmatmul.mubr.bf16.vlgmr.msra.gmra.mrb[28].mxu0 %v1866_v8  ;;  %v5056_v8 = vcombine.high %v2021_v5, %v2023_v6 }
 0x8db   : > { %2290 = vmatprep.mubr.bf16.mxu0 %v6378_v14  ;;  %2259 = vmatpush1.bf16.msra.mxu0 %v5037_v30  ;;  %v5066_v30 = vcombine.high %v2030_v25, %v2032_v27  ;;  %v2398_v25 = vld [vmem:[%s6814_s8 + $0x298] sm:$0xff] }
 0x8dc   : > { %2260 = vmatprep.subr.bf16.mxu0 %v5042_v35  ;;  %2225 = vmatprep.subr.bf16.mxu1 %v5056_v8  ;;  %v5068_v35 = vcombine.high %v2377_v31, %v2379_v32  ;;  %v2392_v8 = vld [vmem:[%s6814_s8 + $0x1d8] sm:$0xff]  ;;  %v2401_v31 = vld [vmem:[%s6814_s8 + $0x310] sm:$0xff] }
 0x8dd   : > { %v2403_v32 = vld [vmem:[%s6814_s8 + $0x350] sm:$0xff] }
 0x8df   : > { %2261 = vmatpush1.bf16.msra.mxu0 %v5041_v37  ;;  %v5069_v37 = vcombine.low %v2378_v33, %v2380_v36 }
 0x8e0   : > { %2262 = vmatprep.subr.bf16.mxu0 %v5046_v53  ;;  %v5034_v53 = vld [vmem:[%s6822_s17 + $0x6] ss:$0 sm:$0xff] }
 0x8e3   : > { %2263 = vmatpush1.bf16.msra.mxu0 %v5045_v52 }
 0x8e4   : > { %2264 = vmatprep.subr.bf16.mxu0 %v5050_v60  ;;  %v5072_v60 = vcombine.high %v2381_v55, %v2383_v63  ;;  %v5870_v55 = vld [vmem:[%s6820_s11 + $0x148] sm:$0xff]  }
 0x8e5   : > { %v5871_v63 = vld [vmem:[%s6820_s11 + $0x1c8] sm:$0xff]  }
 0x8e7   : > { %2265 = vmatpush1.bf16.msra.mxu0 %v5049_v59 }
 0x8e8   : > { %2266 = vmatprep.subr.bf16.mxu0 %v5054_v4  ;;  %v5078_v4 = vcombine.high %v2386_v0, %v2388_v1 }
 0x8eb   : > { %2267 = vmatpush1.bf16.msra.mxu0 %v5053_v3 }
 0x9ad   : > { %v1954_v10 = vpop.f32.mrb[28].mxu0 }
 0x9ae   : > { %v1955_v11 = vadd.f32 %v5024_v9, %v1954_v10  ;;  %v5688_v12 = vpop.f32.mrb[29].mxu0  ;;  %v5055_v10 = vcombine.low %v2021_v5, %v2023_v6  ;;  %v2389_v5 = vld [vmem:[%s6814_s8 + $0x190] sm:$0xff] }
 0x9af   : > { %v1957_v13 = vpop.f32.mrb[30].mxu0  ;;  %v2391_v6 = vld [vmem:[%s6814_s8 + $0x1d0] sm:$0xff] }
 0x9b0   : > { %v1958_v16 = vadd.f32 %v5024_v9, %v1957_v13  ;;  %v5689_v17 = vpop.f32.mrb[31].mxu0  ;;  %v1961_v19 = vadd.f32 %v6034_v18, %v1955_v11  ;;  %v2024_v9 = vld [vmem:[%s6814_s8 + $0x2c8] sm:$0xff]  ;;  %2226 = vmatpush1.bf16.msra.mxu1 %v5055_v10  ;;  %v2025_v13 = vld [vmem:[%s6814_s8 + $0x300] sm:$0xff]  ;;  %v5077_v10 = vcombine.low %v2386_v0, %v2388_v1  ;;  %v5878_v0 = vld [vmem:[%s6820_s11 + $0x158] sm:$0xff]  }
 0x9b1   : > { %v5057_v11 = vcombine.low %v2022_v7, %v2024_v9  ;;  %v5058_v12 = vcombine.high %v2022_v7, %v2024_v9  ;;  %v2026_v17 = vld [vmem:[%s6814_s8 + $0x308] sm:$0xff]  ;;  %v2390_v7 = vld [vmem:[%s6814_s8 + $0x198] sm:$0xff] }
 0x9b2   : > { %1965 = vadd.xlane.f32.xlu1 %v1961_v19  ;;  %v1962_v21 = vadd.f32 %v6035_v20, %v1958_v16  ;;  %v2027_v16 = vld [vmem:[%s6814_s8 + $0x340] sm:$0xff]  ;;  %v5879_v1 = vld [vmem:[%s6820_s11 + $0x1d8] sm:$0xff]  }
 0x9b3   : > { %2268 = vmatprep.subr.bf16.mxu0 %v5058_v12  ;;  %v5060_v18 = vcombine.high %v2025_v13, %v2027_v16  ;;  %v5059_v20 = vcombine.low %v2025_v13, %v2027_v16  ;;  %v5082_v12 = vcombine.high %v2390_v7, %v2392_v8  ;;  %v2393_v13 = vld [vmem:[%s6814_s8 + $0x210] sm:$0xff] }
 0x9b4   : > { %1967 = vadd.xlane.f32.xlu0 %v1962_v21  ;;  %2269 = vmatpush1.bf16.msra.mxu0 %v5057_v11  ;;  %v5080_v11 = vcombine.high %v2389_v5, %v2391_v6  ;;  %v2395_v16 = vld [vmem:[%s6814_s8 + $0x250] sm:$0xff] }
 0x9b5   : > { %2227 = vmatprep.subr.bf16.mxu1 %v5060_v18  ;;  %v2396_v18 = vld [vmem:[%s6814_s8 + $0x258] sm:$0xff]  ;;  %v5083_v27 = vcombine.low %v2393_v13, %v2395_v16 }
 0x9b6   : > { %2228 = vmatpush1.bf16.msra.mxu1 %v5059_v20  ;;  %v5081_v20 = vcombine.low %v2390_v7, %v2392_v8  ;;  %v5886_v7 = vld [vmem:[%s6820_s11 + $0x168] sm:$0xff]  }
 0x9b7   : > { %2229 = vmatprep.subr.bf16.mxu1 %v5064_v26  ;;  %v2400_v26 = vld [vmem:[%s6814_s8 + $0x2d8] sm:$0xff]  ;;  %v5887_v8 = vld [vmem:[%s6820_s11 + $0x1e8] sm:$0xff]  }
 0x9ba   : > { %2230 = vmatpush1.bf16.msra.mxu1 %v5063_v28 }
 0x9bb   : > { %2591 = vmatprep.subr.bf16.mxu1 %v5068_v35  ;;  %v5087_v35 = vcombine.low %v2397_v23, %v2399_v24 }
 0xa3f   : > { %v1966_v38 = vpop.xlane.xlu1 %1965 }
 0xa40   : > { %v1970_v39 = vmul.f32 0.0078125, %v1966_v38  ;;  %v5070_v38 = vcombine.high %v2378_v33, %v2380_v36  ;;  %v2402_v33 = vld [vmem:[%s6814_s8 + $0x318] sm:$0xff]  ;;  %v5089_v36 = vcombine.low %v2398_v25, %v2400_v26 }
 0xa41   : > { %v1968_v40 = vpop.xlane.xlu0 %1967 }
 0xa42   : > { %v7064_v41 = vsub.f32 %v1961_v19, %v1970_v39  ;;  %v1971_v42 = vmul.f32 0.0078125, %v1968_v40  ;;  %v2028_v19 = vld [vmem:[%s6814_s8 + $0x348] sm:$0xff] }
 0xa43   : > { %v5062_v22 = vcombine.high %v2026_v17, %v2028_v19 }
 0xa44   : > { %v7066_v43 = vsub.f32 %v1962_v21, %v1971_v42  ;;  %v1974_v44 = vmul.f32 %v7064_v41, %v7064_v41  ;;  %v5061_v21 = vcombine.low %v2026_v17, %v2028_v19  ;;  %v2394_v17 = vld [vmem:[%s6814_s8 + $0x218] sm:$0xff]  ;;  %v5079_v19 = vcombine.low %v2389_v5, %v2391_v6  ;;  %v5884_v5 = vld [vmem:[%s6820_s11 + $0x120] sm:$0xff]  }
 0xa45   : > { %2270 = vmatprep.subr.bf16.mxu0 %v5062_v22  ;;  %v5086_v22 = vcombine.high %v2394_v17, %v2396_v18  ;;  %v5085_v28 = vcombine.low %v2394_v17, %v2396_v18  ;;  %v5885_v6 = vld [vmem:[%s6820_s11 + $0x1a0] sm:$0xff]   ;;  %v5894_v17 = vld [vmem:[%s6820_s11 + $0x178] sm:$0xff]  }
 0xa46   : > { %1976 = vadd.xlane.f32.xlu0 %v1974_v44  ;;  %v1975_v45 = vmul.f32 %v7066_v43, %v7066_v43  ;;  %2271 = vmatpush1.bf16.msra.mxu0 %v5061_v21  ;;  %v5084_v21 = vcombine.high %v2393_v13, %v2395_v16  ;;  %v5892_v13 = vld [vmem:[%s6820_s11 + $0x130] sm:$0xff]   ;;  %v5895_v18 = vld [vmem:[%s6820_s11 + $0x1f8] sm:$0xff]  }
 0xa47   : > { %2272 = vmatprep.subr.bf16.mxu0 %v5066_v30  ;;  %v5090_v30 = vcombine.high %v2398_v25, %v2400_v26  ;;  %v5893_v16 = vld [vmem:[%s6820_s11 + $0x1b0] sm:$0xff]  }
 0xa48   : > { %1978 = vadd.xlane.f32.xlu1 %v1975_v45 }
 0xa4a   : > { %2273 = vmatpush1.bf16.msra.mxu0 %v5065_v29  ;;  %v5088_v29 = vcombine.high %v2397_v23, %v2399_v24  ;;  %v2035_v23 = vlaneseq }
 0xa4b   : > { %2634 = vmatprep.subr.bf16.mxu0 %v5070_v38 }
 0xa4c   : > { %v2036_v24 = vshrl.u32 %v2035_v23, 7 }
 0xa4e   : > { %v7180_v25 = vsub.s32 0, %v2036_v24  ;;  %v7182_v26 = vsub.s32 2, %v2036_v24 }
 0xad3   : > { %v1977_v39 = vpop.xlane.xlu0 %1976 }
 0xad4   : > { %v1980_v40 = vmul.f32 0.0078125, %v1977_v39  ;;  %v2405_v39 = vld [vmem:[%s6814_s8 + $0x390] sm:$0xff] }
 0xad5   : > { %v1979_v42 = vpop.xlane.xlu1 %1978 }
 0xad6   : > { %v1982_v44 = vadd.f32 1e-05, %v1980_v40  ;;  %v1981_v45 = vmul.f32 0.0078125, %v1979_v42  ;;  %v2407_v40 = vld [vmem:[%s6814_s8 + $0x3d0] sm:$0xff]  ;;  %v2406_v42 = vld [vmem:[%s6814_s8 + $0x398] sm:$0xff] }
 0xad8   : > { %6026 = vrsqrt.f32 %v1982_v44  ;;  %v1983_v46 = vadd.f32 1e-05, %v1981_v45  ;;  %v2408_v44 = vld [vmem:[%s6814_s8 + $0x3d8] sm:$0xff]  ;;  %v5091_v45 = vcombine.low %v2401_v31, %v2403_v32 }
 0xada   : > { %6028 = vrsqrt.f32 %v1983_v46 }
 0xae2   : > { %v6027_v47 = vpop.eup %6026 }
 0xae3   : > { %v1986_v49 = vmul.f32 %v6027_v47, %v7064_v41  ;;  %v5096_v47 = vcombine.high %v2405_v39, %v2407_v40 }
 0xae4   : > { %v6029_v50 = vpop.eup %6028 }
 0xae5   : > { %v1992_v51 = vmul.f32 %v5033_v48, %v1986_v49  ;;  %v1987_v52 = vmul.f32 %v6029_v50, %v7066_v43  ;;  %v2387_v43 = vld [vmem:[%s6814_s8 + $0x150] sm:$0xff]  ;;  %v5095_v49 = vcombine.low %v2405_v39, %v2407_v40  ;;  %v5097_v50 = vcombine.low %v2406_v42, %v2408_v44 }
 0xae6   : > { %v5076_v3 = vcombine.high %v2385_v62, %v2387_v43  ;;  %v5075_v9 = vcombine.low %v2385_v62, %v2387_v43  ;;  %v5876_v62 = vld [vmem:[%s6820_s11 + $0x110] sm:$0xff]  }
 0xae7   : > { %v1993_v54 = vmul.f32 %v5033_v48, %v1987_v52  ;;  %v7108_v58 = vadd.f32 %v5034_v53, %v1992_v51  ;;  %v5098_v48 = vcombine.high %v2406_v42, %v2408_v44  ;;  %v5866_v51 = vld [vmem:[%s6820_s11 + $0x140] sm:$0xff]   ;;  %v5877_v43 = vld [vmem:[%s6820_s11 + $0x190] sm:$0xff]  }
 0xae8   : > { %v5867_v52 = vld [vmem:[%s6820_s11 + $0x1c0] sm:$0xff]  }
 0xae9   : > { %v7110_v59 = vadd.f32 %v5034_v53, %v1993_v54  ;;  %v5868_v53 = vld [vmem:[%s6820_s11 + $0x100] sm:$0xff]  }
 0xaea   : > { %v5869_v54 = vld [vmem:[%s6820_s11 + $0x180] sm:$0xff]  }
 0xaeb   : > { %v7114_v41 = vpack.c.bf16 %v7110_v59, %v7108_v58 }
 0xaed   : > { %2248 = vmatmul.mubr.bf16.vlgmr.msra.gmra.mrb[44].mxu1 %v7114_v41  ;;  %2291 = vmatmul.mubr.bf16.vlgmr.msra.gmra.mrb[32].mxu0 %v7114_v41 }
 0xaee   : > { %2592 = vmatpush1.bf16.msra.mxu1 %v5067_v34  ;;  %2635 = vmatpush1.bf16.msra.mxu0 %v5069_v37  ;;  %v2404_v34 = vld [vmem:[%s6814_s8 + $0x358] sm:$0xff]  ;;  %v5092_v37 = vcombine.high %v2401_v31, %v2403_v32 }
 0xaef   : > { %2593 = vmatprep.subr.bf16.mxu1 %v5072_v60  ;;  %2636 = vmatprep.subr.bf16.mxu0 %v5074_v61  ;;  %v5094_v38 = vcombine.high %v2402_v33, %v2404_v34  ;;  %v5093_v46 = vcombine.low %v2402_v33, %v2404_v34  ;;  %v5874_v60 = vld [vmem:[%s6820_s11 + $0x150] sm:$0xff]  }
 0xaf0   : > { %2623 = vmatprep.mubr.bf16.mxu1 %v6378_v14  ;;  %2666 = vmatprep.mubr.bf16.mxu0 %v6378_v14  ;;  %v5875_v61 = vld [vmem:[%s6820_s11 + $0x1d0] sm:$0xff]  }
 0xaf2   : > { %2594 = vmatpush1.bf16.msra.mxu1 %v5071_v2  ;;  %2637 = vmatpush1.bf16.msra.mxu0 %v5073_v15  ;;  %v5880_v2 = vld [vmem:[%s6820_s11 + $0x118] sm:$0xff]  }
 0xaf3   : > { %2595 = vmatprep.subr.bf16.mxu1 %v5076_v3  ;;  %2638 = vmatprep.subr.bf16.mxu0 %v5078_v4  ;;  %v5881_v15 = vld [vmem:[%s6820_s11 + $0x198] sm:$0xff]   ;;  %v5882_v3 = vld [vmem:[%s6820_s11 + $0x160] sm:$0xff]  }
 0xaf4   : > { %v5883_v4 = vld [vmem:[%s6820_s11 + $0x1e0] sm:$0xff]  }
 0xaf6   : > { %2596 = vmatpush1.bf16.msra.mxu1 %v5075_v9  ;;  %2639 = vmatpush1.bf16.msra.mxu0 %v5077_v10  ;;  %v5888_v9 = vld [vmem:[%s6820_s11 + $0x128] sm:$0xff]  }
 0xaf7   : > { %2597 = vmatprep.subr.bf16.mxu1 %v5080_v11  ;;  %2640 = vmatprep.subr.bf16.mxu0 %v5082_v12  ;;  %v5889_v10 = vld [vmem:[%s6820_s11 + $0x1a8] sm:$0xff]   ;;  %v5890_v11 = vld [vmem:[%s6820_s11 + $0x170] sm:$0xff]  }
 0xaf8   : > { %v5891_v12 = vld [vmem:[%s6820_s11 + $0x1f0] sm:$0xff]  }
 0xafa   : > { %2598 = vmatpush1.bf16.msra.mxu1 %v5079_v19  ;;  %2641 = vmatpush1.bf16.msra.mxu0 %v5081_v20  ;;  %v5896_v19 = vld [vmem:[%s6820_s11 + $0x138] sm:$0xff]  }
 0xafb   : > { %2599 = vmatprep.subr.bf16.mxu1 %v5084_v21  ;;  %2642 = vmatprep.subr.bf16.mxu0 %v5086_v22  ;;  %v5897_v20 = vld [vmem:[%s6820_s11 + $0x1b8] sm:$0xff]   ;;  %v5898_v21 = vld [vmem:[%s6820_s11 + $0x40] sm:$0xff]  }
 0xafc   : > { %v5899_v22 = vld [vmem:[%s6820_s11 + $0xc0] sm:$0xff]  }
 0xafe   : > { %2600 = vmatpush1.bf16.msra.mxu1 %v5083_v27  ;;  %2643 = vmatpush1.bf16.msra.mxu0 %v5085_v28  ;;  %v2033_v27 = vld [vmem:[%s6828_s16] sm:$0xf]  ;;  %v7185_v28 = vsub.s32 1, %v2036_v24 }
 0xaff   : > { %2601 = vmatprep.subr.bf16.mxu1 %v5088_v29  ;;  %2644 = vmatprep.subr.bf16.mxu0 %v5090_v30  ;;  %v7187_v29 = vsub.s32 3, %v2036_v24  ;;  %v2038_v30 = vrot.slane %v2033_v27, %v7180_v25  ;;  %v2046_v31 = vrot.slane %v2033_v27, %v7182_v26 }
 0xb00   : > { %v2042_v32 = vrot.slane %v2033_v27, %v7185_v28 }
 0xb01   : > { %v2050_v33 = vrot.slane %v2033_v27, %v7187_v29 }
 0xb02   : > { %2602 = vmatpush1.bf16.msra.mxu1 %v5087_v35  ;;  %2645 = vmatpush1.bf16.msra.mxu0 %v5089_v36 }
 0xb03   : > { %2603 = vmatprep.subr.bf16.mxu1 %v5092_v37  ;;  %2646 = vmatprep.subr.bf16.mxu0 %v5094_v38 }
 0xb06   : > { %2604 = vmatpush1.bf16.msra.mxu1 %v5091_v45  ;;  %2647 = vmatpush1.bf16.msra.mxu0 %v5093_v46 }
 0xb07   : > { %2605 = vmatprep.subr.bf16.mxu1 %v5096_v47  ;;  %2648 = vmatprep.subr.bf16.mxu0 %v5098_v48 }
 0xb0a   : > { %2606 = vmatpush1.bf16.msra.mxu1 %v5095_v49  ;;  %2649 = vmatpush1.bf16.msra.mxu0 %v5097_v50 }
 0xb0b   : > { %5363 = vmatprep.subr.bf16.mxu1 %v5866_v51  ;;  %5385 = vmatprep.subr.bf16.mxu0 %v5867_v52 }
 0xb0d   : > { %2624 = vmatmul.mubr.bf16.vlgmr.msra.gmra.mrb[48].mxu1 %v7114_v41  ;;  %2667 = vmatmul.mubr.bf16.vlgmr.msra.gmra.mrb[36].mxu0 %v7114_v41 }
 0xb0e   : > { %5364 = vmatpush3.bf16.msra.mxu1 %v5868_v53  ;;  %5386 = vmatpush3.bf16.msra.mxu0 %v5869_v54 }
 0xb0f   : > { %5365 = vmatprep.subr.bf16.mxu1 %v5870_v55  ;;  %5387 = vmatprep.subr.bf16.mxu0 %v5871_v63 }
 0xb12   : > { %5366 = vmatpush3.bf16.msra.mxu1 %v5872_v56  ;;  %5388 = vmatpush3.bf16.msra.mxu0 %v5873_v57 }
 0xb13   : > { %5367 = vmatprep.subr.bf16.mxu1 %v5874_v60  ;;  %5389 = vmatprep.subr.bf16.mxu0 %v5875_v61 }
 0xb16   : > { %5368 = vmatpush3.bf16.msra.mxu1 %v5876_v62  ;;  %5390 = vmatpush3.bf16.msra.mxu0 %v5877_v43 }
 0xb17   : > { %5369 = vmatprep.subr.bf16.mxu1 %v5878_v0  ;;  %5391 = vmatprep.subr.bf16.mxu0 %v5879_v1  ;;  %v2409_v1 = vld [vmem:[%s6828_s16 + $0x4] sm:$0xf] }
 0xb1a   : > { %5370 = vmatpush3.bf16.msra.mxu1 %v5880_v2  ;;  %5392 = vmatpush3.bf16.msra.mxu0 %v5881_v15  ;;  %v2414_v2 = vrot.slane %v2409_v1, %v7180_v25  ;;  %v2422_v15 = vrot.slane %v2409_v1, %v7182_v26 }
 0xb1b   : > { %5371 = vmatprep.subr.bf16.mxu1 %v5882_v3  ;;  %5393 = vmatprep.subr.bf16.mxu0 %v5883_v4  ;;  %v2418_v3 = vrot.slane %v2409_v1, %v7185_v28  ;;  %v2426_v4 = vrot.slane %v2409_v1, %v7187_v29  ;;  %v5921_v1 = vld [vmem:[%s6820_s11 + $0xa8] sm:$0xff]  }
 0xb1e   : > { %5372 = vmatpush3.bf16.msra.mxu1 %v5884_v5  ;;  %5394 = vmatpush3.bf16.msra.mxu0 %v5885_v6 }
 0xb1f   : > { %5373 = vmatprep.subr.bf16.mxu1 %v5886_v7  ;;  %5395 = vmatprep.subr.bf16.mxu0 %v5887_v8 }
 0xb22   : > { %5374 = vmatpush3.bf16.msra.mxu1 %v5888_v9  ;;  %5396 = vmatpush3.bf16.msra.mxu0 %v5889_v10 }
 0xb23   : > { %5375 = vmatprep.subr.bf16.mxu1 %v5890_v11  ;;  %5397 = vmatprep.subr.bf16.mxu0 %v5891_v12 }
 0xb26   : > { %5376 = vmatpush3.bf16.msra.mxu1 %v5892_v13  ;;  %5398 = vmatpush3.bf16.msra.mxu0 %v5893_v16 }
 0xb27   : > { %5377 = vmatprep.subr.bf16.mxu1 %v5894_v17  ;;  %5399 = vmatprep.subr.bf16.mxu0 %v5895_v18 }
 0xb2a   : > { %5378 = vmatpush3.bf16.msra.mxu1 %v5896_v19  ;;  %5400 = vmatpush3.bf16.msra.mxu0 %v5897_v20 }
 0xb2b   : > { %5407 = vmatprep.subr.bf16.mxu1 %v5898_v21  ;;  %5429 = vmatprep.subr.bf16.mxu0 %v5899_v22 }
 0xbc0   : > { %v2249_v34 = vpop.f32.mrb[44].mxu1  ;;  %v2292_v35 = vpop.f32.mrb[32].mxu0 }
 0xbc1   : > { %v2250_v36 = vadd.f32 %v2249_v34, %v2038_v30  ;;  %v2293_v37 = vadd.f32 %v2292_v35, %v2046_v31  ;;  %v2251_v38 = vpop.f32.mrb[45].mxu1  ;;  %v2294_v39 = vpop.f32.mrb[33].mxu0 }
 0xbc2   : > { %v2252_v40 = vadd.f32 %v2251_v38, %v2042_v32  ;;  %v2295_v42 = vadd.f32 %v2294_v39, %v2050_v33  ;;  %v2253_v44 = vpop.f32.mrb[46].mxu1  ;;  %v2296_v45 = vpop.f32.mrb[34].mxu0  ;;  %v5900_v39 = vld [vmem:[%s6820_s11] sm:$0xff]  }
 0xbc3   : > { %v2254_v46 = vadd.f32 %v2253_v44, %v2038_v30  ;;  %v2297_v47 = vadd.f32 %v2296_v45, %v2046_v31  ;;  %v2255_v48 = vpop.f32.mrb[47].mxu1  ;;  %v2298_v49 = vpop.f32.mrb[35].mxu0  ;;  %v2301_v52 = vmax.f32 %v2250_v36, 0.0  ;;  %v2303_v53 = vmax.f32 %v2293_v37, 0.0  ;;  %v5903_v44 = vld [vmem:[%s6820_s11 + $0xc8] sm:$0xff]  }
 0xbc4   : > { %v2256_v50 = vadd.f32 %v2255_v48, %v2042_v32  ;;  %v2299_v51 = vadd.f32 %v2298_v49, %v2050_v33  ;;  %v2302_v63 = vmax.f32 %v2252_v40, 0.0  ;;  %v2304_v56 = vmax.f32 %v2295_v42, 0.0  ;;  %v5901_v40 = vld [vmem:[%s6820_s11 + $0x80] sm:$0xff]   ;;  %v5902_v42 = vld [vmem:[%s6820_s11 + $0x48] sm:$0xff]   ;;  %v5907_v48 = vld [vmem:[%s6820_s11 + $0xd0] sm:$0xff]  }
 0xbc5   : > { %v2305_v54 = vmax.f32 %v2254_v46, 0.0  ;;  %v2307_v55 = vmax.f32 %v2297_v47, 0.0  ;;  %v5904_v45 = vld [vmem:[%s6820_s11 + $0x8] sm:$0xff]   ;;  %v5906_v47 = vld [vmem:[%s6820_s11 + $0x50] sm:$0xff]  }
 0xbc6   : > { %v2306_v57 = vmax.f32 %v2256_v50, 0.0  ;;  %v2308_v60 = vmax.f32 %v2299_v51, 0.0  ;;  %v5905_v46 = vld [vmem:[%s6820_s11 + $0x88] sm:$0xff]   ;;  %v5908_v49 = vld [vmem:[%s6820_s11 + $0x10] sm:$0xff]   ;;  %v5910_v51 = vld [vmem:[%s6820_s11 + $0x58] sm:$0xff]  }
 0xbc7   : > { %v7193_v61 = vpack.c.bf16 %v2305_v54, %v2301_v52  ;;  %v7195_v62 = vpack.c.bf16 %v2307_v55, %v2303_v53  ;;  %v5909_v50 = vld [vmem:[%s6820_s11 + $0x90] sm:$0xff]   ;;  %v5911_v52 = vld [vmem:[%s6820_s11 + $0xd8] sm:$0xff]   ;;  %v5914_v55 = vld [vmem:[%s6820_s11 + $0x60] sm:$0xff]  }
 0xbc8   : > { %v2374_v43 = vpack.c.bf16 %v2306_v57, %v2302_v63  ;;  %v2376_v0 = vpack.c.bf16 %v2308_v60, %v2304_v56  ;;  %v5912_v53 = vld [vmem:[%s6820_s11 + $0x18] sm:$0xff]   ;;  %v5915_v63 = vld [vmem:[%s6820_s11 + $0xe0] sm:$0xff]   ;;  %v5918_v60 = vld [vmem:[%s6820_s11 + $0x68] sm:$0xff]  }
 0xbc9   : > { %v5913_v54 = vld [vmem:[%s6820_s11 + $0x98] sm:$0xff]   ;;  %v5916_v56 = vld [vmem:[%s6820_s11 + $0x20] sm:$0xff]  }
 0xbca   : > { %v5917_v57 = vld [vmem:[%s6820_s11 + $0xa0] sm:$0xff]  }
 0xbe0   : > { %v2625_v5 = vpop.f32.mrb[48].mxu1  ;;  %v2668_v6 = vpop.f32.mrb[36].mxu0 }
 0xbe1   : > { %v2626_v7 = vadd.f32 %v2625_v5, %v2414_v2  ;;  %v2669_v8 = vadd.f32 %v2668_v6, %v2422_v15  ;;  %v2627_v9 = vpop.f32.mrb[49].mxu1  ;;  %v2670_v10 = vpop.f32.mrb[37].mxu0  ;;  %v5926_v5 = vld [vmem:[%s6820_s11 + $0x78] sm:$0xff]  }
 0xbe2   : > { %v2628_v11 = vadd.f32 %v2627_v9, %v2418_v3  ;;  %v2671_v12 = vadd.f32 %v2670_v10, %v2426_v4  ;;  %v2629_v13 = vpop.f32.mrb[50].mxu1  ;;  %v2672_v16 = vpop.f32.mrb[38].mxu0  ;;  %v5927_v6 = vld [vmem:[%s6820_s11 + $0xf8] sm:$0xff]   ;;  %v3302_v9 = vld [vmem:[%s6814_s8 + $0x28] sm:$0xff] }
 0xbe3   : > { %v2630_v17 = vadd.f32 %v2629_v13, %v2414_v2  ;;  %v2673_v18 = vadd.f32 %v2672_v16, %v2422_v15  ;;  %v2631_v19 = vpop.f32.mrb[51].mxu1  ;;  %v2674_v20 = vpop.f32.mrb[39].mxu0  ;;  %v2677_v23 = vmax.f32 %v2626_v7, 0.0  ;;  %v2679_v24 = vmax.f32 %v2669_v8, 0.0  ;;  %v5922_v2 = vld [vmem:[%s6820_s11 + $0x70] sm:$0xff]   ;;  %v3301_v7 = vld [vmem:[%s6814_s8 + $0x20] sm:$0xff] }
 0xbe4   : > { %v2632_v21 = vadd.f32 %v2631_v19, %v2418_v3  ;;  %v2675_v22 = vadd.f32 %v2674_v20, %v2426_v4  ;;  %v2678_v31 = vmax.f32 %v2628_v11, 0.0  ;;  %v2680_v32 = vmax.f32 %v2671_v12, 0.0  ;;  %v5923_v15 = vld [vmem:[%s6820_s11 + $0xf0] sm:$0xff]   ;;  %v3303_v8 = vld [vmem:[%s6814_s8 + $0x60] sm:$0xff]  ;;  %v3304_v10 = vld [vmem:[%s6814_s8 + $0x68] sm:$0xff] }
 0xbe5   : > { %v2681_v27 = vmax.f32 %v2630_v17, 0.0  ;;  %v2683_v30 = vmax.f32 %v2673_v18, 0.0  ;;  %v5924_v3 = vld [vmem:[%s6820_s11 + $0x30] sm:$0xff]   ;;  %v5928_v11 = vld [vmem:[%s6820_s11 + $0x38] sm:$0xff]   ;;  %v5164_v13 = vcombine.high %v3301_v7, %v3303_v8  ;;  %v5166_v16 = vcombine.high %v3302_v9, %v3304_v10  ;;  %v3305_v17 = vld [vmem:[%s6814_s8 + $0xa0] sm:$0xff] }
 0xbe6   : > { %v2682_v33 = vmax.f32 %v2632_v21, 0.0  ;;  %v2684_v34 = vmax.f32 %v2675_v22, 0.0  ;;  %v5925_v4 = vld [vmem:[%s6820_s11 + $0xb0] sm:$0xff]   ;;  %v5929_v12 = vld [vmem:[%s6820_s11 + $0xb8] sm:$0xff]   ;;  %v3307_v18 = vld [vmem:[%s6814_s8 + $0xe0] sm:$0xff]  ;;  %v5163_v21 = vcombine.low %v3301_v7, %v3303_v8  ;;  %v5165_v22 = vcombine.low %v3302_v9, %v3304_v10 }
 0xbe7   : > { %v2749_v35 = vpack.c.bf16 %v2681_v27, %v2677_v23  ;;  %v2751_v36 = vpack.c.bf16 %v2683_v30, %v2679_v24  ;;  %v3306_v19 = vld [vmem:[%s6814_s8 + $0xa8] sm:$0xff]  ;;  %v5168_v23 = vcombine.high %v3305_v17, %v3307_v18  ;;  %v3309_v27 = vld [vmem:[%s6814_s8 + $0x120] sm:$0xff] }
 0xbe8   : > { %v2750_v37 = vpack.c.bf16 %v2682_v33, %v2678_v31  ;;  %v2752_v38 = vpack.c.bf16 %v2684_v34, %v2680_v32  ;;  %v3308_v20 = vld [vmem:[%s6814_s8 + $0xe8] sm:$0xff]  ;;  %v3311_v30 = vld [vmem:[%s6814_s8 + $0x160] sm:$0xff]  ;;  %v5167_v33 = vcombine.low %v3305_v17, %v3307_v18 }
 0xbe9   : > { %v5170_v24 = vcombine.high %v3306_v19, %v3308_v20  ;;  %v3310_v31 = vld [vmem:[%s6814_s8 + $0x128] sm:$0xff]  ;;  %v5169_v34 = vcombine.low %v3306_v19, %v3308_v20  ;;  %v3329_v7 = vld [vmem:[%s6814_s8 + $0x3a0] sm:$0xff] }
 0xbea   : > { %2977 = vmatprep.mubr.bf16.mxu1 %v2750_v37  ;;  %3018 = vmatprep.mubr.bf16.mxu0 %v2752_v38  ;;  %v3312_v32 = vld [vmem:[%s6814_s8 + $0x168] sm:$0xff]  ;;  %v3313_v37 = vld [vmem:[%s6814_s8 + $0x1a0] sm:$0xff] }
 0xbeb   : > { %2978 = vmatmul.mubr.bf16.vlgmr.msra.gmra.mrb[52].mxu1 %v2749_v35  ;;  %3019 = vmatmul.mubr.bf16.vlgmr.msra.gmra.mrb[40].mxu0 %v2751_v36  ;;  %v5172_v35 = vcombine.high %v3309_v27, %v3311_v30  ;;  %v5174_v36 = vcombine.high %v3310_v31, %v3312_v32  ;;  %v3315_v38 = vld [vmem:[%s6814_s8 + $0x1e0] sm:$0xff]  ;;  %v3330_v9 = vld [vmem:[%s6814_s8 + $0x3a8] sm:$0xff] }
 0xbec   : > { %5408 = vmatpush3.bf16.msra.mxu1 %v5900_v39  ;;  %5430 = vmatpush3.bf16.msra.mxu0 %v5901_v40  ;;  %v3314_v39 = vld [vmem:[%s6814_s8 + $0x1a8] sm:$0xff]  ;;  %v3331_v8 = vld [vmem:[%s6814_s8 + $0x3e0] sm:$0xff] }
 0xbed   : > { %3251 = vmatprep.mubr.bf16.mxu1 %v2374_v43  ;;  %3292 = vmatprep.mubr.bf16.mxu0 %v2376_v0  ;;  %v5919_v43 = vld [vmem:[%s6820_s11 + $0xe8] sm:$0xff]   ;;  %v5191_v17 = vcombine.low %v3329_v7, %v3331_v8  ;;  %v5930_v19 = vld [vmem:[%s6820_s11 + $0x240] sm:$0xff]  }
 0xbee   : > { %5409 = vmatprep.subr.bf16.mxu1 %v5902_v42  ;;  %5431 = vmatprep.subr.bf16.mxu0 %v5903_v44  ;;  %v5920_v0 = vld [vmem:[%s6820_s11 + $0x28] sm:$0xff]   ;;  %v5176_v42 = vcombine.high %v3313_v37, %v3315_v38  ;;  %v5931_v20 = vld [vmem:[%s6820_s11 + $0x2c0] sm:$0xff]  }
 0xbef   : > { %v3316_v40 = vld [vmem:[%s6814_s8 + $0x1e8] sm:$0xff] }
 0xbf0   : > { %5410 = vmatpush3.bf16.msra.mxu1 %v5904_v45  ;;  %5432 = vmatpush3.bf16.msra.mxu0 %v5905_v46  ;;  %v5178_v44 = vcombine.high %v3314_v39, %v3316_v40  ;;  %v3317_v45 = vld [vmem:[%s6814_s8 + $0x220] sm:$0xff]  ;;  %v3332_v10 = vld [vmem:[%s6814_s8 + $0x3e8] sm:$0xff] }
 0xbf1   : > { %5411 = vmatprep.subr.bf16.mxu1 %v5906_v47  ;;  %5433 = vmatprep.subr.bf16.mxu0 %v5907_v48  ;;  %v3319_v46 = vld [vmem:[%s6814_s8 + $0x260] sm:$0xff]  ;;  %v3318_v47 = vld [vmem:[%s6814_s8 + $0x228] sm:$0xff]  ;;  %v5193_v18 = vcombine.low %v3330_v9, %v3332_v10 }
 0xbf2   : > { %v3320_v48 = vld [vmem:[%s6814_s8 + $0x268] sm:$0xff] }
 0xbf4   : > { %5412 = vmatpush3.bf16.msra.mxu1 %v5908_v49  ;;  %5434 = vmatpush3.bf16.msra.mxu0 %v5909_v50  ;;  %v5175_v49 = vcombine.low %v3313_v37, %v3315_v38  ;;  %v5177_v50 = vcombine.low %v3314_v39, %v3316_v40  ;;  %v5944_v37 = vld [vmem:[%s6820_s11 + $0x218] sm:$0xff]   ;;  %v5946_v39 = vld [vmem:[%s6820_s11 + $0x260] sm:$0xff]  }
 0xbf5   : > { %5413 = vmatprep.subr.bf16.mxu1 %v5910_v51  ;;  %5435 = vmatprep.subr.bf16.mxu0 %v5911_v52  ;;  %v5180_v51 = vcombine.high %v3317_v45, %v3319_v46  ;;  %v5182_v52 = vcombine.high %v3318_v47, %v3320_v48  ;;  %v5945_v38 = vld [vmem:[%s6820_s11 + $0x298] sm:$0xff]   ;;  %v5947_v40 = vld [vmem:[%s6820_s11 + $0x2e0] sm:$0xff]  }
 0xbf8   : > { %5414 = vmatpush3.bf16.msra.mxu1 %v5912_v53  ;;  %5436 = vmatpush3.bf16.msra.mxu0 %v5913_v54  ;;  %v3321_v53 = vld [vmem:[%s6814_s8 + $0x2a0] sm:$0xff] }
 0xbf9   : > { %5415 = vmatprep.subr.bf16.mxu1 %v5914_v55  ;;  %5437 = vmatprep.subr.bf16.mxu0 %v5915_v63  ;;  %v3323_v54 = vld [vmem:[%s6814_s8 + $0x2e0] sm:$0xff]  ;;  %v3322_v55 = vld [vmem:[%s6814_s8 + $0x2a8] sm:$0xff] }
 0xbfa   : > { %v3324_v63 = vld [vmem:[%s6814_s8 + $0x2e8] sm:$0xff] }
 0xbfc   : > { %5416 = vmatpush3.bf16.msra.mxu1 %v5916_v56  ;;  %5438 = vmatpush3.bf16.msra.mxu0 %v5917_v57  ;;  %v5179_v56 = vcombine.low %v3317_v45, %v3319_v46  ;;  %v5181_v57 = vcombine.low %v3318_v47, %v3320_v48  ;;  %v5952_v45 = vld [vmem:[%s6820_s11 + $0x228] sm:$0xff]   ;;  %v5954_v47 = vld [vmem:[%s6820_s11 + $0x270] sm:$0xff]  }
 0xbfd   : > { %5417 = vmatprep.subr.bf16.mxu1 %v5918_v60  ;;  %5439 = vmatprep.subr.bf16.mxu0 %v5919_v43  ;;  %v5184_v60 = vcombine.high %v3321_v53, %v3323_v54  ;;  %v5186_v43 = vcombine.high %v3322_v55, %v3324_v63  ;;  %v5953_v46 = vld [vmem:[%s6820_s11 + $0x2a8] sm:$0xff]   ;;  %v5955_v48 = vld [vmem:[%s6820_s11 + $0x2f0] sm:$0xff]  }
 0xc00   : > { %5418 = vmatpush3.bf16.msra.mxu1 %v5920_v0  ;;  %5440 = vmatpush3.bf16.msra.mxu0 %v5921_v1  ;;  %v3325_v0 = vld [vmem:[%s6814_s8 + $0x320] sm:$0xff] }
 0xc01   : > { %5419 = vmatprep.subr.bf16.mxu1 %v5922_v2  ;;  %5441 = vmatprep.subr.bf16.mxu0 %v5923_v15  ;;  %v3327_v1 = vld [vmem:[%s6814_s8 + $0x360] sm:$0xff]  ;;  %v3326_v2 = vld [vmem:[%s6814_s8 + $0x328] sm:$0xff] }
 0xc02   : > { %v3328_v15 = vld [vmem:[%s6814_s8 + $0x368] sm:$0xff] }
 0xc04   : > { %5420 = vmatpush3.bf16.msra.mxu1 %v5924_v3  ;;  %5442 = vmatpush3.bf16.msra.mxu0 %v5925_v4  ;;  %v5183_v3 = vcombine.low %v3321_v53, %v3323_v54  ;;  %v5185_v4 = vcombine.low %v3322_v55, %v3324_v63  ;;  %v5960_v53 = vld [vmem:[%s6820_s11 + $0x238] sm:$0xff]   ;;  %v7303_v55 = vld [vmem:[%s6814_s8 + $0x30] sm:$0xff] }
 0xc05   : > { %5421 = vmatprep.subr.bf16.mxu1 %v5926_v5  ;;  %5443 = vmatprep.subr.bf16.mxu0 %v5927_v6  ;;  %v5188_v5 = vcombine.high %v3325_v0, %v3327_v1  ;;  %v5190_v6 = vcombine.high %v3326_v2, %v3328_v15  ;;  %v5961_v54 = vld [vmem:[%s6820_s11 + $0x2b8] sm:$0xff]   ;;  %v7306_v63 = vld [vmem:[%s6814_s8 + $0x70] sm:$0xff] }
 0xc08   : > { %5422 = vmatpush3.bf16.msra.mxu1 %v5928_v11  ;;  %5444 = vmatpush3.bf16.msra.mxu0 %v5929_v12  ;;  %v5187_v11 = vcombine.low %v3325_v0, %v3327_v1  ;;  %v5189_v12 = vcombine.low %v3326_v2, %v3328_v15 }
 0xc09   : > { %3515 = vmatprep.subr.bf16.mxu1 %v5164_v13  ;;  %3558 = vmatprep.subr.bf16.mxu0 %v5166_v16  ;;  %v5192_v13 = vcombine.high %v3329_v7, %v3331_v8  ;;  %v5194_v16 = vcombine.high %v3330_v9, %v3332_v10 }
 0xc0b   : > { %3252 = vmatmul.mubr.bf16.vlgmr.msra.gmra.mrb[56].mxu1 %v7193_v61  ;;  %3293 = vmatmul.mubr.bf16.vlgmr.msra.gmra.mrb[44].mxu0 %v7195_v62  ;;  %v5171_v61 = vcombine.low %v3309_v27, %v3311_v30  ;;  %v5173_v62 = vcombine.low %v3310_v31, %v3312_v32  ;;  %v5936_v27 = vld [vmem:[%s6820_s11 + $0x208] sm:$0xff]   ;;  %v5938_v31 = vld [vmem:[%s6820_s11 + $0x250] sm:$0xff]  }
 0xc0c   : > { %3516 = vmatpush1.bf16.msra.mxu1 %v5163_v21  ;;  %3559 = vmatpush1.bf16.msra.mxu0 %v5165_v22  ;;  %v5932_v21 = vld [vmem:[%s6820_s11 + $0x200] sm:$0xff]   ;;  %v5937_v30 = vld [vmem:[%s6820_s11 + $0x288] sm:$0xff]   ;;  %v5939_v32 = vld [vmem:[%s6820_s11 + $0x2d0] sm:$0xff]  }
 0xc0d   : > { %3517 = vmatprep.subr.bf16.mxu1 %v5168_v23  ;;  %3560 = vmatprep.subr.bf16.mxu0 %v5170_v24  ;;  %v5933_v22 = vld [vmem:[%s6820_s11 + $0x280] sm:$0xff]   ;;  %v5934_v23 = vld [vmem:[%s6820_s11 + $0x248] sm:$0xff]  }
 0xc0e   : > { %3547 = vmatprep.mubr.bf16.mxu1 %v6378_v14  ;;  %3590 = vmatprep.mubr.bf16.mxu0 %v6378_v14  ;;  %v5935_v24 = vld [vmem:[%s6820_s11 + $0x2c8] sm:$0xff]  }
 0xc10   : > { %3518 = vmatpush1.bf16.msra.mxu1 %v5167_v33  ;;  %3561 = vmatpush1.bf16.msra.mxu0 %v5169_v34  ;;  %v5940_v33 = vld [vmem:[%s6820_s11 + $0x210] sm:$0xff]  }
 0xc11   : > { %3519 = vmatprep.subr.bf16.mxu1 %v5172_v35  ;;  %3562 = vmatprep.subr.bf16.mxu0 %v5174_v36  ;;  %v5941_v34 = vld [vmem:[%s6820_s11 + $0x290] sm:$0xff]   ;;  %v5942_v35 = vld [vmem:[%s6820_s11 + $0x258] sm:$0xff]  }
 0xc12   : > { %v5943_v36 = vld [vmem:[%s6820_s11 + $0x2d8] sm:$0xff]  }
 0xc14   : > { %3520 = vmatpush1.bf16.msra.mxu1 %v5171_v61  ;;  %3563 = vmatpush1.bf16.msra.mxu0 %v5173_v62  ;;  %v5948_v61 = vld [vmem:[%s6820_s11 + $0x220] sm:$0xff]  }
 0xc15   : > { %3521 = vmatprep.subr.bf16.mxu1 %v5176_v42  ;;  %3564 = vmatprep.subr.bf16.mxu0 %v5178_v44  ;;  %v5949_v62 = vld [vmem:[%s6820_s11 + $0x2a0] sm:$0xff]   ;;  %v5950_v42 = vld [vmem:[%s6820_s11 + $0x268] sm:$0xff]  }
 0xc16   : > { %v5951_v44 = vld [vmem:[%s6820_s11 + $0x2e8] sm:$0xff]  }
 0xc18   : > { %3522 = vmatpush1.bf16.msra.mxu1 %v5175_v49  ;;  %3565 = vmatpush1.bf16.msra.mxu0 %v5177_v50  ;;  %v5956_v49 = vld [vmem:[%s6820_s11 + $0x230] sm:$0xff]  }
 0xc19   : > { %3523 = vmatprep.subr.bf16.mxu1 %v5180_v51  ;;  %3566 = vmatprep.subr.bf16.mxu0 %v5182_v52  ;;  %v5957_v50 = vld [vmem:[%s6820_s11 + $0x2b0] sm:$0xff]   ;;  %v5958_v51 = vld [vmem:[%s6820_s11 + $0x278] sm:$0xff]  }
 0xc1a   : > { %v5959_v52 = vld [vmem:[%s6820_s11 + $0x2f8] sm:$0xff]  }
 0xc1c   : > { %3524 = vmatpush1.bf16.msra.mxu1 %v5179_v56  ;;  %3567 = vmatpush1.bf16.msra.mxu0 %v5181_v57  ;;  %v7309_v56 = vld [vmem:[%s6814_s8 + $0x38] sm:$0xff]  ;;  %v5228_v57 = vcombine.high %v7303_v55, %v7306_v63 }
 0xc1d   : > { %3525 = vmatprep.subr.bf16.mxu1 %v5184_v60  ;;  %3568 = vmatprep.subr.bf16.mxu0 %v5186_v43  ;;  %v7314_v60 = vld [vmem:[%s6814_s8 + $0x78] sm:$0xff]  ;;  %v5227_v43 = vcombine.low %v7303_v55, %v7306_v63 }
 0xc1e   : > { %v5229_v0 = vcombine.low %v7309_v56, %v7314_v60  ;;  %v5230_v1 = vcombine.high %v7309_v56, %v7314_v60 }
 0xc20   : > { %3526 = vmatpush1.bf16.msra.mxu1 %v5183_v3  ;;  %3569 = vmatpush1.bf16.msra.mxu0 %v5185_v4 }
 0xc21   : > { %3527 = vmatprep.subr.bf16.mxu1 %v5188_v5  ;;  %3570 = vmatprep.subr.bf16.mxu0 %v5190_v6 }
 0xc24   : > { %3528 = vmatpush1.bf16.msra.mxu1 %v5187_v11  ;;  %3571 = vmatpush1.bf16.msra.mxu0 %v5189_v12 }
 0xc25   : > { %3529 = vmatprep.subr.bf16.mxu1 %v5192_v13  ;;  %3572 = vmatprep.subr.bf16.mxu0 %v5194_v16 }
 0xc28   : > { %3530 = vmatpush1.bf16.msra.mxu1 %v5191_v17  ;;  %3573 = vmatpush1.bf16.msra.mxu0 %v5193_v18 }
 0xc29   : > { %5451 = vmatprep.subr.bf16.mxu1 %v5930_v19  ;;  %5473 = vmatprep.subr.bf16.mxu0 %v5931_v20 }
 0xc2b   : > { %3548 = vmatmul.mubr.bf16.vlgmr.msra.gmra.mrb[60].mxu1 %v7114_v41  ;;  %3591 = vmatmul.mubr.bf16.vlgmr.msra.gmra.mrb[48].mxu0 %v7114_v41 }
 0xc2c   : > { %5452 = vmatpush3.bf16.msra.mxu1 %v5932_v21  ;;  %5474 = vmatpush3.bf16.msra.mxu0 %v5933_v22 }
 0xc2d   : > { %5453 = vmatprep.subr.bf16.mxu1 %v5934_v23  ;;  %5475 = vmatprep.subr.bf16.mxu0 %v5935_v24 }
 0xc30   : > { %5454 = vmatpush3.bf16.msra.mxu1 %v5936_v27  ;;  %5476 = vmatpush3.bf16.msra.mxu0 %v5937_v30 }
 0xc31   : > { %5455 = vmatprep.subr.bf16.mxu1 %v5938_v31  ;;  %5477 = vmatprep.subr.bf16.mxu0 %v5939_v32 }
 0xc34   : > { %5456 = vmatpush3.bf16.msra.mxu1 %v5940_v33  ;;  %5478 = vmatpush3.bf16.msra.mxu0 %v5941_v34 }
 0xc35   : > { %5457 = vmatprep.subr.bf16.mxu1 %v5942_v35  ;;  %5479 = vmatprep.subr.bf16.mxu0 %v5943_v36 }
 0xc38   : > { %5458 = vmatpush3.bf16.msra.mxu1 %v5944_v37  ;;  %5480 = vmatpush3.bf16.msra.mxu0 %v5945_v38  ;;  %v3333_v37 = vld [vmem:[%s6828_s16 + $0x8] sm:$0xf] }
 0xc39   : > { %5459 = vmatprep.subr.bf16.mxu1 %v5946_v39  ;;  %5481 = vmatprep.subr.bf16.mxu0 %v5947_v40  ;;  %v3338_v38 = vrot.slane %v3333_v37, %v7180_v25  ;;  %v3346_v39 = vrot.slane %v3333_v37, %v7182_v26  ;;  %v3342_v40 = vrot.slane %v3333_v37, %v7185_v28 }
 0xc3c   : > { %5460 = vmatpush3.bf16.msra.mxu1 %v5948_v61  ;;  %5482 = vmatpush3.bf16.msra.mxu0 %v5949_v62  ;;  %v3350_v61 = vrot.slane %v3333_v37, %v7187_v29  ;;  %v3967_v37 = vld [vmem:[%s6814_s8 + $0x1f0] sm:$0xff] }
 0xc3d   : > { %5461 = vmatprep.subr.bf16.mxu1 %v5950_v42  ;;  %5483 = vmatprep.subr.bf16.mxu0 %v5951_v44 }
 0xc40   : > { %5462 = vmatpush3.bf16.msra.mxu1 %v5952_v45  ;;  %5484 = vmatpush3.bf16.msra.mxu0 %v5953_v46 }
 0xc41   : > { %5463 = vmatprep.subr.bf16.mxu1 %v5954_v47  ;;  %5485 = vmatprep.subr.bf16.mxu0 %v5955_v48 }
 0xc44   : > { %5464 = vmatpush3.bf16.msra.mxu1 %v5956_v49  ;;  %5486 = vmatpush3.bf16.msra.mxu0 %v5957_v50 }
 0xc45   : > { %5465 = vmatprep.subr.bf16.mxu1 %v5958_v51  ;;  %5487 = vmatprep.subr.bf16.mxu0 %v5959_v52 }
 0xc48   : > { %5466 = vmatpush3.bf16.msra.mxu1 %v5960_v53  ;;  %5488 = vmatpush3.bf16.msra.mxu0 %v5961_v54 }
 0xc49   : > { %4167 = vmatprep.subr.bf16.mxu1 %v5228_v57  ;;  %4210 = vmatprep.subr.bf16.mxu0 %v5230_v1 }
 0xcbe   : > { %v5379_v2 = vpop.f32.mrb[52].mxu1  ;;  %v5401_v15 = vpop.f32.mrb[40].mxu0 }
 0xcbf   : > { %v5380_v3 = vpop.f32.mrb[53].mxu1  ;;  %v5402_v4 = vpop.f32.mrb[41].mxu0 }
 0xcc0   : > { %v5381_v5 = vadd.f32 %v5380_v3, %v5379_v2  ;;  %v5403_v6 = vadd.f32 %v5402_v4, %v5401_v15  ;;  %v5382_v7 = vpop.f32.mrb[54].mxu1  ;;  %v5404_v8 = vpop.f32.mrb[42].mxu0 }
 0xcc1   : > { %v5383_v9 = vpop.f32.mrb[55].mxu1  ;;  %v5405_v10 = vpop.f32.mrb[43].mxu0 }
 0xcc2   : > { %v3021_v11 = vadd.f32 %v5403_v6, %v5381_v5  ;;  %v5384_v12 = vadd.f32 %v5383_v9, %v5382_v7  ;;  %v5406_v13 = vadd.f32 %v5405_v10, %v5404_v8  ;;  %v3957_v6 = vld [vmem:[%s6814_s8 + $0xb0] sm:$0xff] }
 0xcc3   : > { %v3959_v7 = vld [vmem:[%s6814_s8 + $0xf0] sm:$0xff] }
 0xcc4   : > { %v3024_v16 = vadd.f32 %v5406_v13, %v5384_v12  ;;  %v3958_v12 = vld [vmem:[%s6814_s8 + $0xb8] sm:$0xff] }
 0xcc5   : > { %v3960_v13 = vld [vmem:[%s6814_s8 + $0xf8] sm:$0xff] }
 0xcde   : > { %v5423_v17 = vpop.f32.mrb[56].mxu1  ;;  %v5445_v18 = vpop.f32.mrb[44].mxu0 }
 0xcdf   : > { %v5424_v19 = vpop.f32.mrb[57].mxu1  ;;  %v5446_v20 = vpop.f32.mrb[45].mxu0 }
 0xce0   : > { %v5425_v21 = vadd.f32 %v5424_v19, %v5423_v17  ;;  %v5447_v22 = vadd.f32 %v5446_v20, %v5445_v18  ;;  %v5426_v23 = vpop.f32.mrb[58].mxu1  ;;  %v5448_v24 = vpop.f32.mrb[46].mxu0  ;;  %v5232_v20 = vcombine.high %v3957_v6, %v3959_v7 }
 0xce1   : > { %v5427_v27 = vpop.f32.mrb[59].mxu1  ;;  %v5449_v30 = vpop.f32.mrb[47].mxu0 }
 0xce2   : > { %v3254_v31 = vadd.f32 %v5425_v21, %v3021_v11  ;;  %v5428_v32 = vadd.f32 %v5427_v27, %v5426_v23  ;;  %v5450_v33 = vadd.f32 %v5449_v30, %v5448_v24  ;;  %v5234_v21 = vcombine.high %v3958_v12, %v3960_v13  ;;  %v3963_v23 = vld [vmem:[%s6814_s8 + $0x170] sm:$0xff]  ;;  %v3962_v24 = vld [vmem:[%s6814_s8 + $0x138] sm:$0xff] }
 0xce3   : > { %v3964_v27 = vld [vmem:[%s6814_s8 + $0x178] sm:$0xff]  ;;  %v5231_v30 = vcombine.low %v3957_v6, %v3959_v7  ;;  %v3983_v6 = vld [vmem:[%s6814_s8 + $0x3f0] sm:$0xff] }
 0xce4   : > { %v7322_v34 = vadd.f32 %v5447_v22, %v3254_v31  ;;  %v3257_v35 = vadd.f32 %v5428_v32, %v3024_v16  ;;  %v3961_v22 = vld [vmem:[%s6814_s8 + $0x130] sm:$0xff]  ;;  %v5233_v31 = vcombine.low %v3958_v12, %v3960_v13  ;;  %v5237_v63 = vcombine.low %v3962_v24, %v3964_v27  ;;  %v3982_v7 = vld [vmem:[%s6814_s8 + $0x3b8] sm:$0xff] }
 0xce5   : > { %v5236_v32 = vcombine.high %v3961_v22, %v3963_v23  ;;  %v5235_v55 = vcombine.low %v3961_v22, %v3963_v23  ;;  %v5967_v22 = vld [vmem:[%s6820_s11 + $0x3c8] sm:$0xff]  }
 0xce6   : > { %v7324_v36 = vadd.f32 %v5450_v33, %v3257_v35  ;;  %v5238_v33 = vcombine.high %v3962_v24, %v3964_v27  ;;  %v3965_v35 = vld [vmem:[%s6814_s8 + $0x1b0] sm:$0xff]  ;;  %v5968_v23 = vld [vmem:[%s6820_s11 + $0x308] sm:$0xff]  }
 0xce7   : > { %v5240_v56 = vcombine.high %v3965_v35, %v3967_v37  ;;  %v5969_v24 = vld [vmem:[%s6820_s11 + $0x388] sm:$0xff]   ;;  %v5971_v27 = vld [vmem:[%s6820_s11 + $0x3d0] sm:$0xff]  }
 0xcfe   : > { %v3549_v62 = vpop.f32.mrb[60].mxu1  ;;  %v3592_v42 = vpop.f32.mrb[48].mxu0 }
 0xcff   : > { %v3550_v44 = vadd.f32 %v3549_v62, %v3338_v38  ;;  %v3593_v45 = vadd.f32 %v3592_v42, %v3346_v39  ;;  %v3551_v46 = vpop.f32.mrb[61].mxu1  ;;  %v3594_v47 = vpop.f32.mrb[49].mxu0  ;;  %v5239_v62 = vcombine.low %v3965_v35, %v3967_v37  ;;  %v5976_v35 = vld [vmem:[%s6820_s11 + $0x318] sm:$0xff]  }
 0xd00   : > { %v3552_v48 = vadd.f32 %v3551_v46, %v3342_v40  ;;  %v3595_v49 = vadd.f32 %v3594_v47, %v3350_v61  ;;  %v3553_v50 = vpop.f32.mrb[62].mxu1  ;;  %v3596_v51 = vpop.f32.mrb[50].mxu0  ;;  %v3975_v46 = vld [vmem:[%s6814_s8 + $0x2f0] sm:$0xff]  ;;  %v3974_v47 = vld [vmem:[%s6814_s8 + $0x2b8] sm:$0xff] }
 0xd01   : > { %v3554_v52 = vadd.f32 %v3553_v50, %v3338_v38  ;;  %v3597_v53 = vadd.f32 %v3596_v51, %v3346_v39  ;;  %v3555_v54 = vpop.f32.mrb[63].mxu1  ;;  %v3598_v57 = vpop.f32.mrb[51].mxu0  ;;  %v3601_v15 = vmax.f32 %v3550_v44, 0.0  ;;  %v3603_v3 = vmax.f32 %v3593_v45, 0.0  ;;  %v3966_v38 = vld [vmem:[%s6814_s8 + $0x1b8] sm:$0xff]  ;;  %v3973_v45 = vld [vmem:[%s6814_s8 + $0x2b0] sm:$0xff] }
 0xd02   : > { %v3556_v1 = vadd.f32 %v3555_v54, %v3342_v40  ;;  %v3599_v2 = vadd.f32 %v3598_v57, %v3350_v61  ;;  %v3602_v8 = vmax.f32 %v3552_v48, 0.0  ;;  %v3604_v9 = vmax.f32 %v3595_v49, 0.0  ;;  %v3968_v39 = vld [vmem:[%s6814_s8 + $0x1f8] sm:$0xff]  ;;  %v3979_v54 = vld [vmem:[%s6814_s8 + $0x370] sm:$0xff] }
 0xd03   : > { %v3605_v4 = vmax.f32 %v3554_v52, 0.0  ;;  %v3607_v5 = vmax.f32 %v3597_v53, 0.0  ;;  %v5242_v60 = vcombine.high %v3966_v38, %v3968_v39  ;;  %v3970_v40 = vld [vmem:[%s6814_s8 + $0x238] sm:$0xff]  ;;  %v5248_v51 = vcombine.high %v3973_v45, %v3975_v46  ;;  %v3977_v53 = vld [vmem:[%s6814_s8 + $0x330] sm:$0xff] }
 0xd04   : > { %v3606_v10 = vmax.f32 %v3556_v1, 0.0  ;;  %v3608_v11 = vmax.f32 %v3599_v2, 0.0  ;;  %v3972_v61 = vld [vmem:[%s6814_s8 + $0x278] sm:$0xff]  ;;  %v5247_v2 = vcombine.low %v3973_v45, %v3975_v46 }
 0xd05   : > { %v3673_v16 = vpack.c.bf16 %v3605_v4, %v3601_v15  ;;  %v3675_v17 = vpack.c.bf16 %v3607_v5, %v3603_v3  ;;  %v5246_v44 = vcombine.high %v3970_v40, %v3972_v61  ;;  %v3976_v48 = vld [vmem:[%s6814_s8 + $0x2f8] sm:$0xff]  ;;  %v5245_v50 = vcombine.low %v3970_v40, %v3972_v61  ;;  %v3981_v5 = vld [vmem:[%s6814_s8 + $0x3b0] sm:$0xff] }
 0xd06   : > { %v3674_v18 = vpack.c.bf16 %v3606_v10, %v3602_v8  ;;  %v3676_v19 = vpack.c.bf16 %v3608_v11, %v3604_v9  ;;  %v5250_v52 = vcombine.high %v3974_v47, %v3976_v48  ;;  %v3978_v57 = vld [vmem:[%s6814_s8 + $0x338] sm:$0xff]  ;;  %v5249_v15 = vcombine.low %v3974_v47, %v3976_v48  ;;  %v5986_v40 = vld [vmem:[%s6820_s11 + $0x370] sm:$0xff]  }
 0xd07   : > { %v3980_v1 = vld [vmem:[%s6814_s8 + $0x378] sm:$0xff]  ;;  %v5252_v3 = vcombine.high %v3977_v53, %v3979_v54  ;;  %v5251_v9 = vcombine.low %v3977_v53, %v3979_v54  ;;  %v5256_v11 = vcombine.high %v3981_v5, %v3983_v6  ;;  %v5255_v13 = vcombine.low %v3981_v5, %v3983_v6  ;;  %v5987_v61 = vld [vmem:[%s6820_s11 + $0x3f0] sm:$0xff]  }
 0xd08   : > { %3901 = vmatprep.mubr.bf16.mxu1 %v3674_v18  ;;  %3942 = vmatprep.mubr.bf16.mxu0 %v3676_v19  ;;  %v5254_v4 = vcombine.high %v3978_v57, %v3980_v1  ;;  %v3984_v8 = vld [vmem:[%s6814_s8 + $0x3f8] sm:$0xff]  ;;  %v5253_v10 = vcombine.low %v3978_v57, %v3980_v1  ;;  %v5963_v18 = vld [vmem:[%s6820_s11 + $0x3c0] sm:$0xff]  }
 0xd09   : > { %3902 = vmatmul.mubr.bf16.vlgmr.msra.gmra.mrb[64].mxu1 %v3673_v16  ;;  %3943 = vmatmul.mubr.bf16.vlgmr.msra.gmra.mrb[52].mxu0 %v3675_v17  ;;  %v5258_v12 = vcombine.high %v3982_v7, %v3984_v8  ;;  %v5257_v16 = vcombine.low %v3982_v7, %v3984_v8  ;;  %v5962_v17 = vld [vmem:[%s6820_s11 + $0x340] sm:$0xff]   ;;  %v5977_v37 = vld [vmem:[%s6820_s11 + $0x398] sm:$0xff]  }
 0xd0a   : > { %4168 = vmatpush1.bf16.msra.mxu1 %v5227_v43  ;;  %4211 = vmatpush1.bf16.msra.mxu0 %v5229_v0  ;;  %v3969_v43 = vld [vmem:[%s6814_s8 + $0x230] sm:$0xff]  ;;  %v5964_v19 = vld [vmem:[%s6820_s11 + $0x300] sm:$0xff]   ;;  %v5992_v45 = vld [vmem:[%s6820_s11 + $0x338] sm:$0xff]  }
 0xd0b   : > { %4169 = vmatprep.subr.bf16.mxu1 %v5232_v20  ;;  %4212 = vmatprep.subr.bf16.mxu0 %v5234_v21  ;;  %v3971_v0 = vld [vmem:[%s6814_s8 + $0x270] sm:$0xff]  ;;  %v5965_v20 = vld [vmem:[%s6820_s11 + $0x380] sm:$0xff]   ;;  %v5966_v21 = vld [vmem:[%s6820_s11 + $0x348] sm:$0xff]  }
 0xd0c   : > { %4199 = vmatprep.mubr.bf16.mxu1 %v6378_v14  ;;  %4242 = vmatprep.mubr.bf16.mxu0 %v6378_v14  ;;  %v5241_v14 = vcombine.low %v3966_v38, %v3968_v39  ;;  %v5244_v42 = vcombine.high %v3969_v43, %v3971_v0  ;;  %v5243_v49 = vcombine.low %v3969_v43, %v3971_v0  ;;  %v5978_v38 = vld [vmem:[%s6820_s11 + $0x360] sm:$0xff]   ;;  %v5984_v43 = vld [vmem:[%s6820_s11 + $0x328] sm:$0xff]   ;;  %v5993_v46 = vld [vmem:[%s6820_s11 + $0x3b8] sm:$0xff]  }
 0xd0d   : > { %v5979_v39 = vld [vmem:[%s6820_s11 + $0x3e0] sm:$0xff]   ;;  %v5985_v0 = vld [vmem:[%s6820_s11 + $0x3a8] sm:$0xff]  }
 0xd0e   : > { %4170 = vmatpush1.bf16.msra.mxu1 %v5231_v30  ;;  %4213 = vmatpush1.bf16.msra.mxu0 %v5233_v31  ;;  %v5972_v30 = vld [vmem:[%s6820_s11 + $0x310] sm:$0xff]   ;;  %v3985_v7 = vld [vmem:[%s6828_s16 + $0xc] sm:$0xf] }
 0xd0f   : > { %4171 = vmatprep.subr.bf16.mxu1 %v5236_v32  ;;  %4214 = vmatprep.subr.bf16.mxu0 %v5238_v33  ;;  %v5973_v31 = vld [vmem:[%s6820_s11 + $0x390] sm:$0xff]   ;;  %v5974_v32 = vld [vmem:[%s6820_s11 + $0x358] sm:$0xff]   ;;  %v3990_v8 = vrot.slane %v3985_v7, %v7180_v25 }
 0xd10   : > { %v5975_v33 = vld [vmem:[%s6820_s11 + $0x3d8] sm:$0xff]  }
 0xd12   : > { %4172 = vmatpush1.bf16.msra.mxu1 %v5235_v55  ;;  %4215 = vmatpush1.bf16.msra.mxu0 %v5237_v63  ;;  %v5980_v55 = vld [vmem:[%s6820_s11 + $0x320] sm:$0xff]  }
 0xd13   : > { %4173 = vmatprep.subr.bf16.mxu1 %v5240_v56  ;;  %4216 = vmatprep.subr.bf16.mxu0 %v5242_v60  ;;  %v5981_v63 = vld [vmem:[%s6820_s11 + $0x3a0] sm:$0xff]   ;;  %v5982_v56 = vld [vmem:[%s6820_s11 + $0x368] sm:$0xff]  }
 0xd14   : > { %v5983_v60 = vld [vmem:[%s6820_s11 + $0x3e8] sm:$0xff]  }
 0xd16   : > { %4174 = vmatpush1.bf16.msra.mxu1 %v5239_v62  ;;  %4217 = vmatpush1.bf16.msra.mxu0 %v5241_v14  ;;  %v5988_v62 = vld [vmem:[%s6820_s11 + $0x330] sm:$0xff]  }
 0xd17   : > { %4175 = vmatprep.subr.bf16.mxu1 %v5244_v42  ;;  %4218 = vmatprep.subr.bf16.mxu0 %v5246_v44  ;;  %v5989_v14 = vld [vmem:[%s6820_s11 + $0x3b0] sm:$0xff]   ;;  %v5990_v42 = vld [vmem:[%s6820_s11 + $0x378] sm:$0xff]  }
 0xd18   : > { %v5991_v44 = vld [vmem:[%s6820_s11 + $0x3f8] sm:$0xff]  }
 0xd1a   : > { %4176 = vmatpush1.bf16.msra.mxu1 %v5243_v49  ;;  %4219 = vmatpush1.bf16.msra.mxu0 %v5245_v50 }
 0xd1b   : > { %4177 = vmatprep.subr.bf16.mxu1 %v5248_v51  ;;  %4220 = vmatprep.subr.bf16.mxu0 %v5250_v52 }
 0xd1e   : > { %4178 = vmatpush1.bf16.msra.mxu1 %v5247_v2  ;;  %4221 = vmatpush1.bf16.msra.mxu0 %v5249_v15 }
 0xd1f   : > { %4179 = vmatprep.subr.bf16.mxu1 %v5252_v3  ;;  %4222 = vmatprep.subr.bf16.mxu0 %v5254_v4 }
 0xd22   : > { %4180 = vmatpush1.bf16.msra.mxu1 %v5251_v9  ;;  %4223 = vmatpush1.bf16.msra.mxu0 %v5253_v10  ;;  %v3998_v9 = vrot.slane %v3985_v7, %v7182_v26  ;;  %v3994_v10 = vrot.slane %v3985_v7, %v7185_v28 }
 0xd23   : > { %4181 = vmatprep.subr.bf16.mxu1 %v5256_v11  ;;  %4224 = vmatprep.subr.bf16.mxu0 %v5258_v12  ;;  %v4002_v11 = vrot.slane %v3985_v7, %v7187_v29 }
 0xd26   : > { %4182 = vmatpush1.bf16.msra.mxu1 %v5255_v13  ;;  %4225 = vmatpush1.bf16.msra.mxu0 %v5257_v16 }
 0xd27   : > { %5495 = vmatprep.subr.bf16.mxu1 %v5962_v17  ;;  %5517 = vmatprep.subr.bf16.mxu0 %v5963_v18 }
 0xd29   : > { %4200 = vmatmul.mubr.bf16.vlgmr.msra.gmra.mrb[68].mxu1 %v7114_v41  ;;  %4243 = vmatmul.mubr.bf16.vlgmr.msra.gmra.mrb[56].mxu0 %v7114_v41  ;;  %v5970_v41 = vld [vmem:[%s6820_s11 + $0x350] sm:$0xff]  }
 0xd2a   : > { %5496 = vmatpush3.bf16.msra.mxu1 %v5964_v19  ;;  %5518 = vmatpush3.bf16.msra.mxu0 %v5965_v20 }
 0xd2b   : > { %5497 = vmatprep.subr.bf16.mxu1 %v5966_v21  ;;  %5519 = vmatprep.subr.bf16.mxu0 %v5967_v22 }
 0xd2e   : > { %5498 = vmatpush3.bf16.msra.mxu1 %v5968_v23  ;;  %5520 = vmatpush3.bf16.msra.mxu0 %v5969_v24 }
 0xd2f   : > { %5499 = vmatprep.subr.bf16.mxu1 %v5970_v41  ;;  %5521 = vmatprep.subr.bf16.mxu0 %v5971_v27 }
 0xd32   : > { %5500 = vmatpush3.bf16.msra.mxu1 %v5972_v30  ;;  %5522 = vmatpush3.bf16.msra.mxu0 %v5973_v31 }
 0xd33   : > { %5501 = vmatprep.subr.bf16.mxu1 %v5974_v32  ;;  %5523 = vmatprep.subr.bf16.mxu0 %v5975_v33 }
 0xd36   : > { %5502 = vmatpush3.bf16.msra.mxu1 %v5976_v35  ;;  %5524 = vmatpush3.bf16.msra.mxu0 %v5977_v37 }
 0xd37   : > { %5503 = vmatprep.subr.bf16.mxu1 %v5978_v38  ;;  %5525 = vmatprep.subr.bf16.mxu0 %v5979_v39 }
 0xd3a   : > { %5504 = vmatpush3.bf16.msra.mxu1 %v5980_v55  ;;  %5526 = vmatpush3.bf16.msra.mxu0 %v5981_v63 }
 0xd3b   : > { %5505 = vmatprep.subr.bf16.mxu1 %v5982_v56  ;;  %5527 = vmatprep.subr.bf16.mxu0 %v5983_v60 }
 0xd3e   : > { %5506 = vmatpush3.bf16.msra.mxu1 %v5984_v43  ;;  %5528 = vmatpush3.bf16.msra.mxu0 %v5985_v0 }
 0xd3f   : > { %5507 = vmatprep.subr.bf16.mxu1 %v5986_v40  ;;  %5529 = vmatprep.subr.bf16.mxu0 %v5987_v61 }
 0xd42   : > { %5508 = vmatpush3.bf16.msra.mxu1 %v5988_v62  ;;  %5530 = vmatpush3.bf16.msra.mxu0 %v5989_v14 }
 0xd43   : > { %5509 = vmatprep.subr.bf16.mxu1 %v5990_v42  ;;  %5531 = vmatprep.subr.bf16.mxu0 %v5991_v44 }
 0xd46   : > { %5510 = vmatpush3.bf16.msra.mxu1 %v5992_v45  ;;  %5532 = vmatpush3.bf16.msra.mxu0 %v5993_v46 }
 0xddc   : > { %v5467_v47 = vpop.f32.mrb[64].mxu1  ;;  %v5489_v48 = vpop.f32.mrb[52].mxu0 }
 0xddd   : > { %v5468_v49 = vpop.f32.mrb[65].mxu1  ;;  %v5490_v50 = vpop.f32.mrb[53].mxu0 }
 0xdde   : > { %v5469_v51 = vadd.f32 %v5468_v49, %v5467_v47  ;;  %v5491_v52 = vadd.f32 %v5490_v50, %v5489_v48  ;;  %v5470_v53 = vpop.f32.mrb[66].mxu1  ;;  %v5492_v54 = vpop.f32.mrb[54].mxu0  ;;  %v5291_v47 = vld [vmem:[%s6822_s17 + $0x4] ss:$0 sm:$0xff] }
 0xddf   : > { %v5471_v57 = vpop.f32.mrb[67].mxu1  ;;  %v5493_v1 = vpop.f32.mrb[55].mxu0 }
 0xde0   : > { %v3945_v2 = vadd.f32 %v5491_v52, %v5469_v51  ;;  %v5472_v15 = vadd.f32 %v5471_v57, %v5470_v53  ;;  %v5494_v3 = vadd.f32 %v5493_v1, %v5492_v54 }
 0xde2   : > { %v3951_v4 = vadd.f32 %v3945_v2, %v7322_v34  ;;  %v3948_v5 = vadd.f32 %v5494_v3, %v5472_v15 }
 0xde4   : > { %v3952_v6 = vadd.f32 %v3948_v5, %v7324_v36 }
 0xdfc   : > { %v4201_v12 = vpop.f32.mrb[68].mxu1  ;;  %v4244_v13 = vpop.f32.mrb[56].mxu0 }
 0xdfd   : > { %v4202_v16 = vadd.f32 %v4201_v12, %v3990_v8  ;;  %v4245_v17 = vadd.f32 %v4244_v13, %v3998_v9  ;;  %v4203_v18 = vpop.f32.mrb[69].mxu1  ;;  %v4246_v19 = vpop.f32.mrb[57].mxu0  ;;  %v5292_v12 = vld [vmem:[%s6822_s17 + $0x7] ss:$0 sm:$0xff] }
 0xdfe   : > { %v4204_v20 = vadd.f32 %v4203_v18, %v3994_v10  ;;  %v4247_v34 = vadd.f32 %v4246_v19, %v4002_v11  ;;  %v4205_v21 = vpop.f32.mrb[70].mxu1  ;;  %v4248_v22 = vpop.f32.mrb[58].mxu0 }
 0xdff   : > { %v4206_v36 = vadd.f32 %v4205_v21, %v3990_v8  ;;  %v4249_v23 = vadd.f32 %v4248_v22, %v3998_v9  ;;  %v4207_v24 = vpop.f32.mrb[71].mxu1  ;;  %v4250_v25 = vpop.f32.mrb[59].mxu0  ;;  %v4253_v27 = vmax.f32 %v4202_v16, 0.0  ;;  %v4255_v28 = vmax.f32 %v4245_v17, 0.0  ;;  %v5293_v17 = vld [vmem:[%s6822_s17 + $0x8] ss:$0 sm:$0xff] }
 0xe00   : > { %v4208_v41 = vadd.f32 %v4207_v24, %v3994_v10  ;;  %v4251_v26 = vadd.f32 %v4250_v25, %v4002_v11  ;;  %v4254_v31 = vmax.f32 %v4204_v20, 0.0  ;;  %v4256_v32 = vmax.f32 %v4247_v34, 0.0  ;;  %v6036_v22 = vld [vmem:[#allocation6] sm:$0xff] (!%p5294_p12)   ;;  %v6038_v24 = vld [vmem:[#allocation6 + $0x10] sm:$0xff] (!%p5294_p12)   ;;  %v6039_v25 = vld [vmem:[#allocation6 + $0x18] sm:$0xff] (!%p5294_p12)  }
 0xe01   : > { %v4257_v30 = vmax.f32 %v4206_v36, 0.0  ;;  %v4259_v29 = vmax.f32 %v4249_v23, 0.0  ;;  %v6384_v36 = vmov (!%p5294_p12), 0.0   ;;  %v6037_v23 = vld [vmem:[#allocation6 + $0x8] sm:$0xff] (!%p5294_p12)  }
 0xe02   : > { %v4258_v33 = vmax.f32 %v4208_v41, 0.0  ;;  %v4260_v35 = vmax.f32 %v4251_v26, 0.0  ;;  %5690 = vmatprep.subr.bf16.mxu0 (!%p5294_p12), %v6384_v36  ;;  %v6040_v41 = vld [vmem:[#allocation6 + $0x20] sm:$0xff] (!%p5294_p12)   ;;  %v6041_v26 = vld [vmem:[#allocation6 + $0x28] sm:$0xff] (!%p5294_p12)  }
 0xe03   : > { %v4325_v37 = vpack.c.bf16 %v4257_v30, %v4253_v27  ;;  %v4327_v38 = vpack.c.bf16 %v4259_v29, %v4255_v28  ;;  %v6042_v27 = vld [vmem:[#allocation6 + $0x30] sm:$0xff] (!%p5294_p12)   ;;  %v6043_v28 = vld [vmem:[#allocation6 + $0x38] sm:$0xff] (!%p5294_p12)  }
 0xe04   : > { %v4326_v39 = vpack.c.bf16 %v4258_v33, %v4254_v31  ;;  %v4328_v55 = vpack.c.bf16 %v4260_v35, %v4256_v32  ;;  %v5295_v32 = vld [vmem:[#allocation8 + $0x1] ss:$0 sm:$0xff] (!%p5294_p12) }
 0xe06   : > { %4553 = vmatprep.mubr.bf16.mxu1 %v4326_v39  ;;  %4594 = vmatprep.mubr.bf16.mxu0 %v4328_v55 }
 0xe07   : > { %4554 = vmatmul.mubr.bf16.vlgmr.msra.gmra.mrb[72].mxu1 %v4325_v37  ;;  %4595 = vmatmul.mubr.bf16.vlgmr.msra.gmra.mrb[60].mxu0 %v4327_v38 }
 0xe08   : > { %5691 = vmatpush3.bf16.msra.mxu0 (!%p5294_p12), %v6036_v22  ;;  %5706 = vmatprep.mubr.msk.bf16.mxu0 (!%p5294_p12), %vm6385_vm9, %v6384_v36 }
 0xe09   : > { %5692 = vmatprep.subr.bf16.mxu0 (!%p5294_p12), %v6384_v36 }
 0xe0c   : > { %5693 = vmatpush3.bf16.msra.mxu0 (!%p5294_p12), %v6037_v23 }
 0xe0d   : > { %5694 = vmatprep.subr.bf16.mxu0 (!%p5294_p12), %v6384_v36 }
 0xe10   : > { %5695 = vmatpush3.bf16.msra.mxu0 (!%p5294_p12), %v6038_v24 }
 0xe11   : > { %5696 = vmatprep.subr.bf16.mxu0 (!%p5294_p12), %v6384_v36 }
 0xe14   : > { %5697 = vmatpush3.bf16.msra.mxu0 (!%p5294_p12), %v6039_v25 }
 0xe15   : > { %5698 = vmatprep.subr.bf16.mxu0 (!%p5294_p12), %v6384_v36 }
 0xe18   : > { %5699 = vmatpush3.bf16.msra.mxu0 (!%p5294_p12), %v6040_v41 }
 0xe19   : > { %5700 = vmatprep.subr.bf16.mxu0 (!%p5294_p12), %v6384_v36 }
 0xe1c   : > { %5701 = vmatpush3.bf16.msra.mxu0 (!%p5294_p12), %v6041_v26 }
 0xe1d   : > { %5702 = vmatprep.subr.bf16.mxu0 (!%p5294_p12), %v6384_v36 }
 0xe20   : > { %5703 = vmatpush3.bf16.msra.mxu0 (!%p5294_p12), %v6042_v27 }
 0xe21   : > { %5704 = vmatprep.subr.bf16.mxu0 (!%p5294_p12), %v6384_v36 }
 0xe24   : > { %5705 = vmatpush3.bf16.msra.mxu0 (!%p5294_p12), %v6043_v28 }
 0xeda   : > { %v5511_v63 = vpop.f32.mrb[72].mxu1  ;;  %v5533_v56 = vpop.f32.mrb[60].mxu0 }
 0xedb   : > { %v5512_v60 = vpop.f32.mrb[73].mxu1  ;;  %v5534_v43 = vpop.f32.mrb[61].mxu0 }
 0xedc   : > { %v5513_v0 = vadd.f32 %v5512_v60, %v5511_v63  ;;  %v5535_v40 = vadd.f32 %v5534_v43, %v5533_v56  ;;  %v5514_v61 = vpop.f32.mrb[74].mxu1  ;;  %v5536_v62 = vpop.f32.mrb[62].mxu0 }
 0xedd   : > { %v5515_v14 = vpop.f32.mrb[75].mxu1  ;;  %v5537_v42 = vpop.f32.mrb[63].mxu0 }
 0xede   : > { %v4597_v44 = vadd.f32 %v5535_v40, %v5513_v0  ;;  %v5516_v45 = vadd.f32 %v5515_v14, %v5514_v61  ;;  %v5538_v46 = vadd.f32 %v5537_v42, %v5536_v62 }
 0xee0   : > { %v4603_v48 = vadd.f32 %v4597_v44, %v3951_v4  ;;  %v4600_v49 = vadd.f32 %v5538_v46, %v5516_v45 }
 0xee2   : > { %v4604_v50 = vadd.f32 %v4600_v49, %v3952_v6  ;;  %v4610_v51 = vadd.f32 %v5291_v47, %v4603_v48 }
 0xee4   : > { %v4612_v52 = vadd.f32 %v4610_v51, %v7108_v58  ;;  %v4611_v53 = vadd.f32 %v5291_v47, %v4604_v50 }
 0xee6   : > { %4616 = vadd.xlane.f32.xlu0 %v4612_v52  ;;  %v4613_v54 = vadd.f32 %v4611_v53, %v7110_v59 }
 0xee8   : > { %4618 = vadd.xlane.f32.xlu1 %v4613_v54 }
 0xf73   : > { %v4617_v57 = vpop.xlane.xlu0 %4616 }
 0xf74   : > { %v4620_v1 = vmul.f32 0.0078125, %v4617_v57 }
 0xf75   : > { %v4619_v2 = vpop.xlane.xlu1 %4618 }
 0xf76   : > { %v4622_v15 = vsub.f32 %v4612_v52, %v4620_v1  ;;  %v4621_v3 = vmul.f32 0.0078125, %v4619_v2 }
 0xf78   : > { %v4623_v5 = vsub.f32 %v4613_v54, %v4621_v3  ;;  %v4624_v7 = vmul.f32 %v4622_v15, %v4622_v15 }
 0xf7a   : > { %4626 = vadd.xlane.f32.xlu0 %v4624_v7  ;;  %v4625_v4 = vmul.f32 %v4623_v5, %v4623_v5 }
 0xf7c   : > { %4628 = vadd.xlane.f32.xlu1 %v4625_v4 }
0x1007   : > { %v4627_v6 = vpop.xlane.xlu0 %4626 }
0x1008   : > { %v4630_v8 = vmul.f32 0.0078125, %v4627_v6 }
0x1009   : > { %v4629_v58 = vpop.xlane.xlu1 %4628 }
0x100a   : > { %v4632_v9 = vadd.f32 1e-05, %v4630_v8  ;;  %v4631_v10 = vmul.f32 0.0078125, %v4629_v58 }
0x100c   : > { %6030 = vrsqrt.f32 %v4632_v9  ;;  %v4633_v59 = vadd.f32 1e-05, %v4631_v10 }
0x100e   : > { %6032 = vrsqrt.f32 %v4633_v59 }
0x1016   : > { %v6031_v11 = vpop.eup %6030 }
0x1017   : > { %v4636_v13 = vmul.f32 %v6031_v11, %v4622_v15 }
0x1018   : > { %v6033_v16 = vpop.eup %6032 }
0x1019   : > { %v4642_v18 = vmul.f32 %v5292_v12, %v4636_v13  ;;  %v4637_v19 = vmul.f32 %v6033_v16, %v4623_v5  ;;  %4654 = sbr.rel (%p5294_p12) target bundleno = 4354 (0x1102), region = 104 }
0x101b   : > { %v4648_v20 = vadd.f32 %v5293_v17, %v4642_v18  ;;  %v4643_v34 = vmul.f32 %v5292_v12, %v4637_v19 }
0x101d   : > { %4650 = vst [vmem:[#allocation2] sm:$0xff] %v4648_v20  ;;  %v4649_v21 = vadd.f32 %v5293_v17, %v4643_v34 }
0x101f   : > { %4651 = vst [vmem:[#allocation2 + $0x8] sm:$0xff] %v4649_v21 }
0x1024   : > { %v4655_v30 = vld [vmem:[#allocation2] sm:$0xff] }
0x1026   : > { %v4656_v29 = vld [vmem:[#allocation2 + $0x8] sm:$0xff] }
0x1027   : > { %v4673_v31 = vpack.c.bf16 %v4656_v29, %v4655_v30 }
0x1029   : > { %5707 = vmatmul.mubr.bf16.vlgmr.msra.gmra.mrb[0].mxu0 %v4673_v31 }
0x10fc   : > { %v4761_v33 = vpop.f32.mrb[0].mxu0 }
0x10fd   : > { %v4762_v35 = vadd.f32 %v5295_v32, %v4761_v33  ;;  %v5708_v37 = vpop.f32.mrb[1].mxu0 }
0x10fe   : > { %v4764_v38 = vpop.f32.mrb[2].mxu0 }
0x10ff   : > { %4768 = vst [vmem:[%s7525_s23] sm:$0xff] %v4762_v35  ;;  %v4765_v39 = vadd.f32 %v5295_v32, %v4764_v38  ;;  %v5709_v55 = vpop.f32.mrb[3].mxu0 }
0x1101   : > { %4769 = vst [vmem:[%s7525_s23 + $0x8] sm:$0xff] %v4765_v39 }
0x1102 PF: > { %s7526_s16 = sld [smem:[#allocation26_spill]]  ;;  %s7527_s13 = sld [smem:[#allocation23_spill]] }
0x1103   : > { %s7528_s14 = sld [smem:[#allocation24_spill]]  ;;  %s7529_s15 = sld [smem:[#allocation27_spill]] }
0x1108   : > { %p28_p4 = scmp.ge.s32.totalorder %s7526_s16, 5  }
0x110a   :  { %30 = sbr.rel (!%p28_p4) target bundleno = 16 (0x10), region = 176 }
0x1111   :  { %4781 = vsyncpa [#allocation5], 1 }
0x1112   :  { %4783 = vsyncpa [#allocation5 + $0x1], 1 }
0x1113   :  { %4784 = vsyncpa [#allocation7], 1 }
0x1114   :  { %4785 = vsyncpa [#allocation10], 1 }
0x1115   :  { %4787 = vsyncpa [#allocation10 + $0x1], 1 }
0x1116   :  { %4788 = vsyncpa [#allocation13], 1 }
0x1117   :  { %4790 = vsyncpa [#allocation13 + $0x1], 1 }
0x1118   :  { %4791 = vsyncpa [#allocation16], 1 }
0x1119   :  { %4793 = vsyncpa [#allocation16 + $0x1], 1 }

</bundles_post_ra>
